<compile_context>
chip_gen: v6e
topology: v6e:2x2x1
jax: 0.10.0
libtpu: 0.0.40
codegen_flags: <defaults>
</compile_context>

<pallas_src>
import jax
import jax.numpy as jnp
from jax.experimental import pallas as pl
from jax.experimental.pallas import tpu as pltpu

# ----- static model dimensions implied by the PyTorch module -----------------
B = 2                      # batch size (small demo batch)
H_IN, W_IN = 4, 201        # conv input spatial dims -> conv out (1, 193)
KH, KW = 4, 9              # Conv2d(1, 16, (4, 9))
C_OUT = 16
W_CONV = W_IN - KW + 1     # 193
POOL_K = 6                 # MaxPool2d((1, 6), stride=6)
W_POOL = (W_CONV - POOL_K) // POOL_K + 1   # 32 -> 16*32 = 512 conv features
SE_HID = C_OUT // 8        # SELayer reduction=8 -> hidden 2
N_FC1, N_FC2, N_FC3, N_FC4 = 512, 256, 64, 2
N_OUT_PAD = 128            # lane-dense padded final output width

_VMEM = pl.BlockSpec(memory_space=pltpu.MemorySpace.VMEM)


# ----- the single fused kernel ------------------------------------------------
def _fused_forward_kernel(x1_ref, x2_ref,
                          cw_ref, cb_ref, sw1_ref, sw2_ref,
                          w1_ref, b1_ref, w2_ref, b2_ref,
                          w3_ref, b3_ref, w4_ref, b4_ref,
                          o_ref, xs_scr, convT_scr, cat_scr):
    f32 = jnp.float32
    bf16 = jnp.bfloat16

    # ---- im2col: 36 cheap sublane stores of shifted x1 rows -----------------
    x1 = x1_ref[...]                                          # (B, 4, 201) f32
    for kh in range(KH):
        for kw in range(KW):
            t = kh * KW + kw
            xs_scr[:, t:t + 1, :] = x1[:, kh:kh + 1, kw:kw + W_CONV]

    # ---- Conv2d(1, 16, (4, 9)) + bias + ReLU on the MXU ---------------------
    cw = cw_ref[...]                                          # (16, 36)
    cb = cb_ref[...]                                          # (16, 1)
    cms = []
    for b in range(B):
        cm = jnp.dot(cw, xs_scr[b, :, :], preferred_element_type=f32)  # (16,193)
        cms.append(jnp.maximum(cm + cb, 0.0)[None])           # (1, 16, 193)
    conv = jnp.concatenate(cms, axis=0)                       # (B, 16, 193)

    # ---- SE layer: squeeze (spatial mean) -> fc -> ReLU -> fc -> sigmoid ----
    y = jnp.mean(conv, axis=-1)                                          # (B, 16)
    h = jnp.maximum(
        jnp.dot(y, sw1_ref[...], preferred_element_type=f32), 0.0)      # (B, 2)
    s = jax.nn.sigmoid(
        jnp.dot(h, sw2_ref[...], preferred_element_type=f32))           # (B, 16)

    # ---- MaxPool2d((1, 6), stride=6); SE scale applied after the max --------
    # (per-channel sigmoid scale s > 0, so max and scale commute)
    convT_scr[...] = jnp.transpose(conv, (0, 2, 1))           # (B, 193, 16)
    m = convT_scr[:, pl.ds(0, W_POOL, stride=POOL_K), :]
    for k in range(1, POOL_K):
        m = jnp.maximum(m, convT_scr[:, pl.ds(k, W_POOL, stride=POOL_K), :])
    pooled = m * s[:, None, :]                                # (B, 32, 16) f32

    # ---- torch.cat([conv branch, relu(fc1(x2))], dim=2) in a VMEM scratch ---
    # conv branch written in (w*16 + c) order; fc2 weight rows pre-permuted.
    for w in range(W_POOL):
        cat_scr[:, w * C_OUT:(w + 1) * C_OUT] = pooled[:, w, :]

    x2 = x2_ref[...].astype(bf16)                             # (B, 1024)
    h2 = jnp.maximum(
        jnp.dot(x2, w1_ref[...], preferred_element_type=f32) + b1_ref[...],
        0.0)                                                  # (B, 512) f32
    cat_scr[:, N_FC1:2 * N_FC1] = h2

    # ---- fc2 + fc3 + fc4 (+ReLU each); dropout is identity at inference -----
    xcat = cat_scr[...].astype(bf16)                          # (B, 1024)
    z = jnp.maximum(
        jnp.dot(xcat, w2_ref[...], preferred_element_type=f32) + b2_ref[...],
        0.0)                                                  # (B, 256)
    z = jnp.maximum(
        jnp.dot(z.astype(bf16), w3_ref[...], preferred_element_type=f32)
        + b3_ref[...], 0.0)                                   # (B, 64)
    z = jnp.maximum(
        jnp.dot(z.astype(bf16), w4_ref[...], preferred_element_type=f32)
        + b4_ref[...], 0.0)                                   # (B, 128)
    o_ref[...] = z                                            # lane-dense output


# ----- wrapper ----------------------------------------------------------------
def cnn_model_forward(kparams, x1, x2):
    """x1: (B, 1, 4, 201) NCHW, x2: (B, 1, 1024) -> (B, 2) float32."""
    x1r = x1.reshape(B, H_IN, W_IN)       # squeeze the single input channel
    x2r = x2.reshape(B, 1024)
    out = pl.pallas_call(
        _fused_forward_kernel,
        out_shape=jax.ShapeDtypeStruct((B, N_OUT_PAD), jnp.float32),
        in_specs=[_VMEM] * 14,
        out_specs=_VMEM,
        scratch_shapes=[
            pltpu.VMEM((B, KH * KW, W_CONV), jnp.float32),    # im2col patches
            pltpu.VMEM((B, W_CONV, C_OUT), jnp.float32),      # conv, channels-last
            pltpu.VMEM((B, 2 * N_FC1), jnp.float32),          # concat buffer
        ],
        compiler_params=pltpu.CompilerParams(vmem_limit_bytes=32 * 1024 * 1024),
    )(x1r, x2r, *kparams)
    return out[:, :N_FC4]                 # drop the lane-padding -> (B, 2)


# ----- one-time parameter preparation (pre-transpose / permute / bf16) --------
def prepare_params(p):
    f32, bf16 = jnp.float32, jnp.bfloat16
    cw = p["conv_w"].reshape(C_OUT, KH * KW).astype(f32)            # (16, 36)
    cb = p["conv_b"].reshape(C_OUT, 1).astype(f32)                  # (16, 1)
    sw1 = p["se_w1"].T.astype(f32)                                  # (16, 2)
    sw2 = p["se_w2"].T.astype(f32)                                  # (2, 16)
    w1 = p["fc1_w"].T.astype(bf16)                                  # (1024, 512)
    b1 = p["fc1_b"].reshape(1, -1).astype(f32)
    # First 512 fc2 inputs are the conv branch in PyTorch's channel-major
    # flatten order (row index c*32 + w).  The kernel fills its concat buffer
    # in (w*16 + c) order, so permute those rows here, once.
    w2a = p["fc2_w"][:, :N_FC1].T.reshape(C_OUT, W_POOL, N_FC2)     # [c, w, n]
    w2a = jnp.transpose(w2a, (1, 0, 2)).reshape(W_POOL * C_OUT, N_FC2)
    w2b = p["fc2_w"][:, N_FC1:].T                                   # (512, 256)
    w2 = jnp.concatenate([w2a, w2b], axis=0).astype(bf16)           # (1024, 256)
    b2 = p["fc2_b"].reshape(1, -1).astype(f32)
    w3 = p["fc3_w"].T.astype(bf16)                                  # (256, 64)
    b3 = p["fc3_b"].reshape(1, -1).astype(f32)
    # fc4 padded lane-dense to 128 output columns (extra columns are zero).
    w4 = jnp.zeros((N_FC3, N_OUT_PAD), bf16).at[:, :N_FC4].set(
        p["fc4_w"].T.astype(bf16))                                  # (64, 128)
    b4 = jnp.zeros((1, N_OUT_PAD), f32).at[:, :N_FC4].set(
        p["fc4_b"].reshape(1, -1).astype(f32))                      # (1, 128)
    return (cw, cb, sw1, sw2, w1, b1, w2, b2, w3, b3, w4, b4)


def init_params(key):
    """Deterministic synthetic parameters in PyTorch layout."""
    def lin(k, out_f, in_f, bias=True):
        kw_, kb_ = jax.random.split(k)
        bound = 1.0 / jnp.sqrt(jnp.float32(in_f))
        w = jax.random.uniform(kw_, (out_f, in_f), jnp.float32, -bound, bound)
        b = (jax.random.uniform(kb_, (out_f,), jnp.float32, -bound, bound)
             if bias else None)
        return w, b

    keys = jax.random.split(key, 7)
    cbound = 1.0 / jnp.sqrt(jnp.float32(KH * KW))
    conv_w = jax.random.uniform(keys[0], (C_OUT, 1, KH, KW), jnp.float32,
                                -cbound, cbound)
    conv_b = jax.random.uniform(jax.random.fold_in(keys[0], 1), (C_OUT,),
                                jnp.float32, -cbound, cbound)
    se_w1, _ = lin(keys[1], SE_HID, C_OUT, bias=False)              # (2, 16)
    se_w2, _ = lin(keys[2], C_OUT, SE_HID, bias=False)              # (16, 2)
    fc1_w, fc1_b = lin(keys[3], N_FC1, 1024)
    fc2_w, fc2_b = lin(keys[4], N_FC2, 1024)
    fc3_w, fc3_b = lin(keys[5], N_FC3, N_FC2)
    fc4_w, fc4_b = lin(keys[6], N_FC4, N_FC3)
    return dict(conv_w=conv_w, conv_b=conv_b, se_w1=se_w1, se_w2=se_w2,
                fc1_w=fc1_w, fc1_b=fc1_b, fc2_w=fc2_w, fc2_b=fc2_b,
                fc3_w=fc3_w, fc3_b=fc3_b, fc4_w=fc4_w, fc4_b=fc4_b)


if __name__ == "__main__":
    key = jax.random.PRNGKey(0)
    kp, k1, k2 = jax.random.split(key, 3)
    params = init_params(kp)
    kparams = prepare_params(params)        # one-time weight re-layout / bf16 cast
    x1 = jax.random.normal(k1, (B, 1, H_IN, W_IN), jnp.float32)   # NCHW like torch
    x2 = jax.random.normal(k2, (B, 1, 1024), jnp.float32)

    fwd = jax.jit(cnn_model_forward)
    out = fwd(kparams, x1, x2)
    jax.block_until_ready(out)
    assert out.shape == (B, N_FC4) and out.dtype == jnp.float32
    print("KERNEL_OK")
</pallas_src>

<mosaic_0001>
module attributes {stable_mosaic.version = 11 : i64} {
  func.func @_fused_forward_kernel(%arg0: memref<2x4x201xf32, #tpu.memory_space<vmem>>, %arg1: memref<2x1024xf32, #tpu.memory_space<vmem>>, %arg2: memref<16x36xf32, #tpu.memory_space<vmem>>, %arg3: memref<16x1xf32, #tpu.memory_space<vmem>>, %arg4: memref<16x2xf32, #tpu.memory_space<vmem>>, %arg5: memref<2x16xf32, #tpu.memory_space<vmem>>, %arg6: memref<1024x512xbf16, #tpu.memory_space<vmem>>, %arg7: memref<1x512xf32, #tpu.memory_space<vmem>>, %arg8: memref<1024x256xbf16, #tpu.memory_space<vmem>>, %arg9: memref<1x256xf32, #tpu.memory_space<vmem>>, %arg10: memref<256x64xbf16, #tpu.memory_space<vmem>>, %arg11: memref<1x64xf32, #tpu.memory_space<vmem>>, %arg12: memref<64x128xbf16, #tpu.memory_space<vmem>>, %arg13: memref<1x128xf32, #tpu.memory_space<vmem>>, %arg14: memref<2x128xf32, #tpu.memory_space<vmem>>, %arg15: memref<2x36x193xf32, #tpu.memory_space<vmem>>, %arg16: memref<2x193x16xf32, #tpu.memory_space<vmem>>, %arg17: memref<2x1024xf32, #tpu.memory_space<vmem>>) attributes {dimension_semantics = [], scalar_prefetch = 0 : i64, scratch_operands = 3 : i64, tpu.core_type = #tpu.core_type<tc>} {
    %c0 = arith.constant 0 : index
    %c0_0 = arith.constant 0 : index
    %c0_1 = arith.constant 0 : index
    %0 = vector.load %arg0[%c0, %c0_0, %c0_1] : memref<2x4x201xf32, #tpu.memory_space<vmem>>, vector<2x4x201xf32>
    %1 = vector.extract_strided_slice %0 {offsets = [0, 0, 0], sizes = [2, 1, 193], strides = [1, 1, 1]} : vector<2x4x201xf32> to vector<2x1x193xf32>
    %c0_2 = arith.constant 0 : index
    %c0_3 = arith.constant 0 : index
    %c0_4 = arith.constant 0 : index
    %2 = vector.load %arg15[%c0_2, %c0_3, %c0_4] : memref<2x36x193xf32, #tpu.memory_space<vmem>>, vector<2x1x193xf32>
    tpu.vector_store %arg15[%c0_2, %c0_3, %c0_4], %1 {strides = array<i32>} : memref<2x36x193xf32, #tpu.memory_space<vmem>>, vector<2x1x193xf32>,
    %3 = vector.extract_strided_slice %0 {offsets = [0, 0, 1], sizes = [2, 1, 193], strides = [1, 1, 1]} : vector<2x4x201xf32> to vector<2x1x193xf32>
    %c0_5 = arith.constant 0 : index
    %c1 = arith.constant 1 : index
    %c0_6 = arith.constant 0 : index
    %4 = vector.load %arg15[%c0_5, %c1, %c0_6] : memref<2x36x193xf32, #tpu.memory_space<vmem>>, vector<2x1x193xf32>
    tpu.vector_store %arg15[%c0_5, %c1, %c0_6], %3 {strides = array<i32>} : memref<2x36x193xf32, #tpu.memory_space<vmem>>, vector<2x1x193xf32>,
    %5 = vector.extract_strided_slice %0 {offsets = [0, 0, 2], sizes = [2, 1, 193], strides = [1, 1, 1]} : vector<2x4x201xf32> to vector<2x1x193xf32>
    %c0_7 = arith.constant 0 : index
    %c2 = arith.constant 2 : index
    %c0_8 = arith.constant 0 : index
    %6 = vector.load %arg15[%c0_7, %c2, %c0_8] : memref<2x36x193xf32, #tpu.memory_space<vmem>>, vector<2x1x193xf32>
    tpu.vector_store %arg15[%c0_7, %c2, %c0_8], %5 {strides = array<i32>} : memref<2x36x193xf32, #tpu.memory_space<vmem>>, vector<2x1x193xf32>,
    %7 = vector.extract_strided_slice %0 {offsets = [0, 0, 3], sizes = [2, 1, 193], strides = [1, 1, 1]} : vector<2x4x201xf32> to vector<2x1x193xf32>
    %c0_9 = arith.constant 0 : index
    %c3 = arith.constant 3 : index
    %c0_10 = arith.constant 0 : index
    %8 = vector.load %arg15[%c0_9, %c3, %c0_10] : memref<2x36x193xf32, #tpu.memory_space<vmem>>, vector<2x1x193xf32>
    tpu.vector_store %arg15[%c0_9, %c3, %c0_10], %7 {strides = array<i32>} : memref<2x36x193xf32, #tpu.memory_space<vmem>>, vector<2x1x193xf32>,
    %9 = vector.extract_strided_slice %0 {offsets = [0, 0, 4], sizes = [2, 1, 193], strides = [1, 1, 1]} : vector<2x4x201xf32> to vector<2x1x193xf32>
    %c0_11 = arith.constant 0 : index
    %c4 = arith.constant 4 : index
    %c0_12 = arith.constant 0 : index
    %10 = vector.load %arg15[%c0_11, %c4, %c0_12] : memref<2x36x193xf32, #tpu.memory_space<vmem>>, vector<2x1x193xf32>
    tpu.vector_store %arg15[%c0_11, %c4, %c0_12], %9 {strides = array<i32>} : memref<2x36x193xf32, #tpu.memory_space<vmem>>, vector<2x1x193xf32>,
    %11 = vector.extract_strided_slice %0 {offsets = [0, 0, 5], sizes = [2, 1, 193], strides = [1, 1, 1]} : vector<2x4x201xf32> to vector<2x1x193xf32>
    %c0_13 = arith.constant 0 : index
    %c5 = arith.constant 5 : index
    %c0_14 = arith.constant 0 : index
    %12 = vector.load %arg15[%c0_13, %c5, %c0_14] : memref<2x36x193xf32, #tpu.memory_space<vmem>>, vector<2x1x193xf32>
    tpu.vector_store %arg15[%c0_13, %c5, %c0_14], %11 {strides = array<i32>} : memref<2x36x193xf32, #tpu.memory_space<vmem>>, vector<2x1x193xf32>,
    %13 = vector.extract_strided_slice %0 {offsets = [0, 0, 6], sizes = [2, 1, 193], strides = [1, 1, 1]} : vector<2x4x201xf32> to vector<2x1x193xf32>
    %c0_15 = arith.constant 0 : index
    %c6 = arith.constant 6 : index
    %c0_16 = arith.constant 0 : index
    %14 = vector.load %arg15[%c0_15, %c6, %c0_16] : memref<2x36x193xf32, #tpu.memory_space<vmem>>, vector<2x1x193xf32>
    tpu.vector_store %arg15[%c0_15, %c6, %c0_16], %13 {strides = array<i32>} : memref<2x36x193xf32, #tpu.memory_space<vmem>>, vector<2x1x193xf32>,
    %15 = vector.extract_strided_slice %0 {offsets = [0, 0, 7], sizes = [2, 1, 193], strides = [1, 1, 1]} : vector<2x4x201xf32> to vector<2x1x193xf32>
    %c0_17 = arith.constant 0 : index
    %c7 = arith.constant 7 : index
    %c0_18 = arith.constant 0 : index
    %16 = vector.load %arg15[%c0_17, %c7, %c0_18] : memref<2x36x193xf32, #tpu.memory_space<vmem>>, vector<2x1x193xf32>
    tpu.vector_store %arg15[%c0_17, %c7, %c0_18], %15 {strides = array<i32>} : memref<2x36x193xf32, #tpu.memory_space<vmem>>, vector<2x1x193xf32>,
    %17 = vector.extract_strided_slice %0 {offsets = [0, 0, 8], sizes = [2, 1, 193], strides = [1, 1, 1]} : vector<2x4x201xf32> to vector<2x1x193xf32>
    %c0_19 = arith.constant 0 : index
    %c8 = arith.constant 8 : index
    %c0_20 = arith.constant 0 : index
    %18 = vector.load %arg15[%c0_19, %c8, %c0_20] : memref<2x36x193xf32, #tpu.memory_space<vmem>>, vector<2x1x193xf32>
    tpu.vector_store %arg15[%c0_19, %c8, %c0_20], %17 {strides = array<i32>} : memref<2x36x193xf32, #tpu.memory_space<vmem>>, vector<2x1x193xf32>,
    %19 = vector.extract_strided_slice %0 {offsets = [0, 1, 0], sizes = [2, 1, 193], strides = [1, 1, 1]} : vector<2x4x201xf32> to vector<2x1x193xf32>
    %c0_21 = arith.constant 0 : index
    %c9 = arith.constant 9 : index
    %c0_22 = arith.constant 0 : index
    %20 = vector.load %arg15[%c0_21, %c9, %c0_22] : memref<2x36x193xf32, #tpu.memory_space<vmem>>, vector<2x1x193xf32>
    tpu.vector_store %arg15[%c0_21, %c9, %c0_22], %19 {strides = array<i32>} : memref<2x36x193xf32, #tpu.memory_space<vmem>>, vector<2x1x193xf32>,
    %21 = vector.extract_strided_slice %0 {offsets = [0, 1, 1], sizes = [2, 1, 193], strides = [1, 1, 1]} : vector<2x4x201xf32> to vector<2x1x193xf32>
    %c0_23 = arith.constant 0 : index
    %c10 = arith.constant 10 : index
    %c0_24 = arith.constant 0 : index
    %22 = vector.load %arg15[%c0_23, %c10, %c0_24] : memref<2x36x193xf32, #tpu.memory_space<vmem>>, vector<2x1x193xf32>
    tpu.vector_store %arg15[%c0_23, %c10, %c0_24], %21 {strides = array<i32>} : memref<2x36x193xf32, #tpu.memory_space<vmem>>, vector<2x1x193xf32>,
    %23 = vector.extract_strided_slice %0 {offsets = [0, 1, 2], sizes = [2, 1, 193], strides = [1, 1, 1]} : vector<2x4x201xf32> to vector<2x1x193xf32>
    %c0_25 = arith.constant 0 : index
    %c11 = arith.constant 11 : index
    %c0_26 = arith.constant 0 : index
    %24 = vector.load %arg15[%c0_25, %c11, %c0_26] : memref<2x36x193xf32, #tpu.memory_space<vmem>>, vector<2x1x193xf32>
    tpu.vector_store %arg15[%c0_25, %c11, %c0_26], %23 {strides = array<i32>} : memref<2x36x193xf32, #tpu.memory_space<vmem>>, vector<2x1x193xf32>,
    %25 = vector.extract_strided_slice %0 {offsets = [0, 1, 3], sizes = [2, 1, 193], strides = [1, 1, 1]} : vector<2x4x201xf32> to vector<2x1x193xf32>
    %c0_27 = arith.constant 0 : index
    %c12 = arith.constant 12 : index
    %c0_28 = arith.constant 0 : index
    %26 = vector.load %arg15[%c0_27, %c12, %c0_28] : memref<2x36x193xf32, #tpu.memory_space<vmem>>, vector<2x1x193xf32>
    tpu.vector_store %arg15[%c0_27, %c12, %c0_28], %25 {strides = array<i32>} : memref<2x36x193xf32, #tpu.memory_space<vmem>>, vector<2x1x193xf32>,
    %27 = vector.extract_strided_slice %0 {offsets = [0, 1, 4], sizes = [2, 1, 193], strides = [1, 1, 1]} : vector<2x4x201xf32> to vector<2x1x193xf32>
    %c0_29 = arith.constant 0 : index
    %c13 = arith.constant 13 : index
    %c0_30 = arith.constant 0 : index
    %28 = vector.load %arg15[%c0_29, %c13, %c0_30] : memref<2x36x193xf32, #tpu.memory_space<vmem>>, vector<2x1x193xf32>
    tpu.vector_store %arg15[%c0_29, %c13, %c0_30], %27 {strides = array<i32>} : memref<2x36x193xf32, #tpu.memory_space<vmem>>, vector<2x1x193xf32>,
    %29 = vector.extract_strided_slice %0 {offsets = [0, 1, 5], sizes = [2, 1, 193], strides = [1, 1, 1]} : vector<2x4x201xf32> to vector<2x1x193xf32>
    %c0_31 = arith.constant 0 : index
    %c14 = arith.constant 14 : index
    %c0_32 = arith.constant 0 : index
    %30 = vector.load %arg15[%c0_31, %c14, %c0_32] : memref<2x36x193xf32, #tpu.memory_space<vmem>>, vector<2x1x193xf32>
    tpu.vector_store %arg15[%c0_31, %c14, %c0_32], %29 {strides = array<i32>} : memref<2x36x193xf32, #tpu.memory_space<vmem>>, vector<2x1x193xf32>,
    %31 = vector.extract_strided_slice %0 {offsets = [0, 1, 6], sizes = [2, 1, 193], strides = [1, 1, 1]} : vector<2x4x201xf32> to vector<2x1x193xf32>
    %c0_33 = arith.constant 0 : index
    %c15 = arith.constant 15 : index
    %c0_34 = arith.constant 0 : index
    %32 = vector.load %arg15[%c0_33, %c15, %c0_34] : memref<2x36x193xf32, #tpu.memory_space<vmem>>, vector<2x1x193xf32>
    tpu.vector_store %arg15[%c0_33, %c15, %c0_34], %31 {strides = array<i32>} : memref<2x36x193xf32, #tpu.memory_space<vmem>>, vector<2x1x193xf32>,
    %33 = vector.extract_strided_slice %0 {offsets = [0, 1, 7], sizes = [2, 1, 193], strides = [1, 1, 1]} : vector<2x4x201xf32> to vector<2x1x193xf32>
    %c0_35 = arith.constant 0 : index
    %c16 = arith.constant 16 : index
    %c0_36 = arith.constant 0 : index
    %34 = vector.load %arg15[%c0_35, %c16, %c0_36] : memref<2x36x193xf32, #tpu.memory_space<vmem>>, vector<2x1x193xf32>
    tpu.vector_store %arg15[%c0_35, %c16, %c0_36], %33 {strides = array<i32>} : memref<2x36x193xf32, #tpu.memory_space<vmem>>, vector<2x1x193xf32>,
    %35 = vector.extract_strided_slice %0 {offsets = [0, 1, 8], sizes = [2, 1, 193], strides = [1, 1, 1]} : vector<2x4x201xf32> to vector<2x1x193xf32>
    %c0_37 = arith.constant 0 : index
    %c17 = arith.constant 17 : index
    %c0_38 = arith.constant 0 : index
    %36 = vector.load %arg15[%c0_37, %c17, %c0_38] : memref<2x36x193xf32, #tpu.memory_space<vmem>>, vector<2x1x193xf32>
    tpu.vector_store %arg15[%c0_37, %c17, %c0_38], %35 {strides = array<i32>} : memref<2x36x193xf32, #tpu.memory_space<vmem>>, vector<2x1x193xf32>,
    %37 = vector.extract_strided_slice %0 {offsets = [0, 2, 0], sizes = [2, 1, 193], strides = [1, 1, 1]} : vector<2x4x201xf32> to vector<2x1x193xf32>
    %c0_39 = arith.constant 0 : index
    %c18 = arith.constant 18 : index
    %c0_40 = arith.constant 0 : index
    %38 = vector.load %arg15[%c0_39, %c18, %c0_40] : memref<2x36x193xf32, #tpu.memory_space<vmem>>, vector<2x1x193xf32>
    tpu.vector_store %arg15[%c0_39, %c18, %c0_40], %37 {strides = array<i32>} : memref<2x36x193xf32, #tpu.memory_space<vmem>>, vector<2x1x193xf32>,
    %39 = vector.extract_strided_slice %0 {offsets = [0, 2, 1], sizes = [2, 1, 193], strides = [1, 1, 1]} : vector<2x4x201xf32> to vector<2x1x193xf32>
    %c0_41 = arith.constant 0 : index
    %c19 = arith.constant 19 : index
    %c0_42 = arith.constant 0 : index
    %40 = vector.load %arg15[%c0_41, %c19, %c0_42] : memref<2x36x193xf32, #tpu.memory_space<vmem>>, vector<2x1x193xf32>
    tpu.vector_store %arg15[%c0_41, %c19, %c0_42], %39 {strides = array<i32>} : memref<2x36x193xf32, #tpu.memory_space<vmem>>, vector<2x1x193xf32>,
    %41 = vector.extract_strided_slice %0 {offsets = [0, 2, 2], sizes = [2, 1, 193], strides = [1, 1, 1]} : vector<2x4x201xf32> to vector<2x1x193xf32>
    %c0_43 = arith.constant 0 : index
    %c20 = arith.constant 20 : index
    %c0_44 = arith.constant 0 : index
    %42 = vector.load %arg15[%c0_43, %c20, %c0_44] : memref<2x36x193xf32, #tpu.memory_space<vmem>>, vector<2x1x193xf32>
    tpu.vector_store %arg15[%c0_43, %c20, %c0_44], %41 {strides = array<i32>} : memref<2x36x193xf32, #tpu.memory_space<vmem>>, vector<2x1x193xf32>,
    %43 = vector.extract_strided_slice %0 {offsets = [0, 2, 3], sizes = [2, 1, 193], strides = [1, 1, 1]} : vector<2x4x201xf32> to vector<2x1x193xf32>
    %c0_45 = arith.constant 0 : index
    %c21 = arith.constant 21 : index
    %c0_46 = arith.constant 0 : index
    %44 = vector.load %arg15[%c0_45, %c21, %c0_46] : memref<2x36x193xf32, #tpu.memory_space<vmem>>, vector<2x1x193xf32>
    tpu.vector_store %arg15[%c0_45, %c21, %c0_46], %43 {strides = array<i32>} : memref<2x36x193xf32, #tpu.memory_space<vmem>>, vector<2x1x193xf32>,
    %45 = vector.extract_strided_slice %0 {offsets = [0, 2, 4], sizes = [2, 1, 193], strides = [1, 1, 1]} : vector<2x4x201xf32> to vector<2x1x193xf32>
    %c0_47 = arith.constant 0 : index
    %c22 = arith.constant 22 : index
    %c0_48 = arith.constant 0 : index
    %46 = vector.load %arg15[%c0_47, %c22, %c0_48] : memref<2x36x193xf32, #tpu.memory_space<vmem>>, vector<2x1x193xf32>
    tpu.vector_store %arg15[%c0_47, %c22, %c0_48], %45 {strides = array<i32>} : memref<2x36x193xf32, #tpu.memory_space<vmem>>, vector<2x1x193xf32>,
    %47 = vector.extract_strided_slice %0 {offsets = [0, 2, 5], sizes = [2, 1, 193], strides = [1, 1, 1]} : vector<2x4x201xf32> to vector<2x1x193xf32>
    %c0_49 = arith.constant 0 : index
    %c23 = arith.constant 23 : index
    %c0_50 = arith.constant 0 : index
    %48 = vector.load %arg15[%c0_49, %c23, %c0_50] : memref<2x36x193xf32, #tpu.memory_space<vmem>>, vector<2x1x193xf32>
    tpu.vector_store %arg15[%c0_49, %c23, %c0_50], %47 {strides = array<i32>} : memref<2x36x193xf32, #tpu.memory_space<vmem>>, vector<2x1x193xf32>,
    %49 = vector.extract_strided_slice %0 {offsets = [0, 2, 6], sizes = [2, 1, 193], strides = [1, 1, 1]} : vector<2x4x201xf32> to vector<2x1x193xf32>
    %c0_51 = arith.constant 0 : index
    %c24 = arith.constant 24 : index
    %c0_52 = arith.constant 0 : index
    %50 = vector.load %arg15[%c0_51, %c24, %c0_52] : memref<2x36x193xf32, #tpu.memory_space<vmem>>, vector<2x1x193xf32>
    tpu.vector_store %arg15[%c0_51, %c24, %c0_52], %49 {strides = array<i32>} : memref<2x36x193xf32, #tpu.memory_space<vmem>>, vector<2x1x193xf32>,
    %51 = vector.extract_strided_slice %0 {offsets = [0, 2, 7], sizes = [2, 1, 193], strides = [1, 1, 1]} : vector<2x4x201xf32> to vector<2x1x193xf32>
    %c0_53 = arith.constant 0 : index
    %c25 = arith.constant 25 : index
    %c0_54 = arith.constant 0 : index
    %52 = vector.load %arg15[%c0_53, %c25, %c0_54] : memref<2x36x193xf32, #tpu.memory_space<vmem>>, vector<2x1x193xf32>
    tpu.vector_store %arg15[%c0_53, %c25, %c0_54], %51 {strides = array<i32>} : memref<2x36x193xf32, #tpu.memory_space<vmem>>, vector<2x1x193xf32>,
    %53 = vector.extract_strided_slice %0 {offsets = [0, 2, 8], sizes = [2, 1, 193], strides = [1, 1, 1]} : vector<2x4x201xf32> to vector<2x1x193xf32>
    %c0_55 = arith.constant 0 : index
    %c26 = arith.constant 26 : index
    %c0_56 = arith.constant 0 : index
    %54 = vector.load %arg15[%c0_55, %c26, %c0_56] : memref<2x36x193xf32, #tpu.memory_space<vmem>>, vector<2x1x193xf32>
    tpu.vector_store %arg15[%c0_55, %c26, %c0_56], %53 {strides = array<i32>} : memref<2x36x193xf32, #tpu.memory_space<vmem>>, vector<2x1x193xf32>,
    %55 = vector.extract_strided_slice %0 {offsets = [0, 3, 0], sizes = [2, 1, 193], strides = [1, 1, 1]} : vector<2x4x201xf32> to vector<2x1x193xf32>
    %c0_57 = arith.constant 0 : index
    %c27 = arith.constant 27 : index
    %c0_58 = arith.constant 0 : index
    %56 = vector.load %arg15[%c0_57, %c27, %c0_58] : memref<2x36x193xf32, #tpu.memory_space<vmem>>, vector<2x1x193xf32>
    tpu.vector_store %arg15[%c0_57, %c27, %c0_58], %55 {strides = array<i32>} : memref<2x36x193xf32, #tpu.memory_space<vmem>>, vector<2x1x193xf32>,
    %57 = vector.extract_strided_slice %0 {offsets = [0, 3, 1], sizes = [2, 1, 193], strides = [1, 1, 1]} : vector<2x4x201xf32> to vector<2x1x193xf32>
    %c0_59 = arith.constant 0 : index
    %c28 = arith.constant 28 : index
    %c0_60 = arith.constant 0 : index
    %58 = vector.load %arg15[%c0_59, %c28, %c0_60] : memref<2x36x193xf32, #tpu.memory_space<vmem>>, vector<2x1x193xf32>
    tpu.vector_store %arg15[%c0_59, %c28, %c0_60], %57 {strides = array<i32>} : memref<2x36x193xf32, #tpu.memory_space<vmem>>, vector<2x1x193xf32>,
    %59 = vector.extract_strided_slice %0 {offsets = [0, 3, 2], sizes = [2, 1, 193], strides = [1, 1, 1]} : vector<2x4x201xf32> to vector<2x1x193xf32>
    %c0_61 = arith.constant 0 : index
    %c29 = arith.constant 29 : index
    %c0_62 = arith.constant 0 : index
    %60 = vector.load %arg15[%c0_61, %c29, %c0_62] : memref<2x36x193xf32, #tpu.memory_space<vmem>>, vector<2x1x193xf32>
    tpu.vector_store %arg15[%c0_61, %c29, %c0_62], %59 {strides = array<i32>} : memref<2x36x193xf32, #tpu.memory_space<vmem>>, vector<2x1x193xf32>,
    %61 = vector.extract_strided_slice %0 {offsets = [0, 3, 3], sizes = [2, 1, 193], strides = [1, 1, 1]} : vector<2x4x201xf32> to vector<2x1x193xf32>
    %c0_63 = arith.constant 0 : index
    %c30 = arith.constant 30 : index
    %c0_64 = arith.constant 0 : index
    %62 = vector.load %arg15[%c0_63, %c30, %c0_64] : memref<2x36x193xf32, #tpu.memory_space<vmem>>, vector<2x1x193xf32>
    tpu.vector_store %arg15[%c0_63, %c30, %c0_64], %61 {strides = array<i32>} : memref<2x36x193xf32, #tpu.memory_space<vmem>>, vector<2x1x193xf32>,
    %63 = vector.extract_strided_slice %0 {offsets = [0, 3, 4], sizes = [2, 1, 193], strides = [1, 1, 1]} : vector<2x4x201xf32> to vector<2x1x193xf32>
    %c0_65 = arith.constant 0 : index
    %c31 = arith.constant 31 : index
    %c0_66 = arith.constant 0 : index
    %64 = vector.load %arg15[%c0_65, %c31, %c0_66] : memref<2x36x193xf32, #tpu.memory_space<vmem>>, vector<2x1x193xf32>
    tpu.vector_store %arg15[%c0_65, %c31, %c0_66], %63 {strides = array<i32>} : memref<2x36x193xf32, #tpu.memory_space<vmem>>, vector<2x1x193xf32>,
    %65 = vector.extract_strided_slice %0 {offsets = [0, 3, 5], sizes = [2, 1, 193], strides = [1, 1, 1]} : vector<2x4x201xf32> to vector<2x1x193xf32>
    %c0_67 = arith.constant 0 : index
    %c32 = arith.constant 32 : index
    %c0_68 = arith.constant 0 : index
    %66 = vector.load %arg15[%c0_67, %c32, %c0_68] : memref<2x36x193xf32, #tpu.memory_space<vmem>>, vector<2x1x193xf32>
    tpu.vector_store %arg15[%c0_67, %c32, %c0_68], %65 {strides = array<i32>} : memref<2x36x193xf32, #tpu.memory_space<vmem>>, vector<2x1x193xf32>,
    %67 = vector.extract_strided_slice %0 {offsets = [0, 3, 6], sizes = [2, 1, 193], strides = [1, 1, 1]} : vector<2x4x201xf32> to vector<2x1x193xf32>
    %c0_69 = arith.constant 0 : index
    %c33 = arith.constant 33 : index
    %c0_70 = arith.constant 0 : index
    %68 = vector.load %arg15[%c0_69, %c33, %c0_70] : memref<2x36x193xf32, #tpu.memory_space<vmem>>, vector<2x1x193xf32>
    tpu.vector_store %arg15[%c0_69, %c33, %c0_70], %67 {strides = array<i32>} : memref<2x36x193xf32, #tpu.memory_space<vmem>>, vector<2x1x193xf32>,
    %69 = vector.extract_strided_slice %0 {offsets = [0, 3, 7], sizes = [2, 1, 193], strides = [1, 1, 1]} : vector<2x4x201xf32> to vector<2x1x193xf32>
    %c0_71 = arith.constant 0 : index
    %c34 = arith.constant 34 : index
    %c0_72 = arith.constant 0 : index
    %70 = vector.load %arg15[%c0_71, %c34, %c0_72] : memref<2x36x193xf32, #tpu.memory_space<vmem>>, vector<2x1x193xf32>
    tpu.vector_store %arg15[%c0_71, %c34, %c0_72], %69 {strides = array<i32>} : memref<2x36x193xf32, #tpu.memory_space<vmem>>, vector<2x1x193xf32>,
    %71 = vector.extract_strided_slice %0 {offsets = [0, 3, 8], sizes = [2, 1, 193], strides = [1, 1, 1]} : vector<2x4x201xf32> to vector<2x1x193xf32>
    %c0_73 = arith.constant 0 : index
    %c35 = arith.constant 35 : index
    %c0_74 = arith.constant 0 : index
    %72 = vector.load %arg15[%c0_73, %c35, %c0_74] : memref<2x36x193xf32, #tpu.memory_space<vmem>>, vector<2x1x193xf32>
    tpu.vector_store %arg15[%c0_73, %c35, %c0_74], %71 {strides = array<i32>} : memref<2x36x193xf32, #tpu.memory_space<vmem>>, vector<2x1x193xf32>,
    %c0_75 = arith.constant 0 : index
    %c0_76 = arith.constant 0 : index
    %73 = vector.load %arg2[%c0_75, %c0_76] : memref<16x36xf32, #tpu.memory_space<vmem>>, vector<16x36xf32>
    %c0_77 = arith.constant 0 : index
    %c0_78 = arith.constant 0 : index
    %74 = vector.load %arg3[%c0_77, %c0_78] : memref<16x1xf32, #tpu.memory_space<vmem>>, vector<16x1xf32>
    %c0_79 = arith.constant 0 : index
    %c0_80 = arith.constant 0 : index
    %c0_81 = arith.constant 0 : index
    %75 = vector.load %arg15[%c0_79, %c0_80, %c0_81] : memref<2x36x193xf32, #tpu.memory_space<vmem>>, vector<1x36x193xf32>
    %76 = vector.shape_cast %75 : vector<1x36x193xf32> to vector<36x193xf32>
    %cst = arith.constant dense<0.000000e+00> : vector<16x193xf32>
    %77 = tpu.matmul %73, %76, %cst {dimension_numbers = #tpu.dot_dimension_numbers<[1], [0], [0], [1], [0, 0, 1, 1], [], []>} : vector<16x36xf32>, vector<36x193xf32>, vector<16x193xf32> -> vector<16x193xf32>
    %78 = vector.broadcast %74 : vector<16x1xf32> to vector<16x193xf32>
    %79 = arith.addf %77, %78 : vector<16x193xf32>
    %cst_82 = arith.constant 0.000000e+00 : f32
    %80 = vector.broadcast %cst_82 : f32 to vector<16x193xf32>
    %81 = arith.maximumf %79, %80 : vector<16x193xf32>
    %82 = vector.shape_cast %81 : vector<16x193xf32> to vector<1x16x193xf32>
    %c1_83 = arith.constant 1 : index
    %c0_84 = arith.constant 0 : index
    %c0_85 = arith.constant 0 : index
    %83 = vector.load %arg15[%c1_83, %c0_84, %c0_85] : memref<2x36x193xf32, #tpu.memory_space<vmem>>, vector<1x36x193xf32>
    %84 = vector.shape_cast %83 : vector<1x36x193xf32> to vector<36x193xf32>
    %cst_86 = arith.constant dense<0.000000e+00> : vector<16x193xf32>
    %85 = tpu.matmul %73, %84, %cst_86 {dimension_numbers = #tpu.dot_dimension_numbers<[1], [0], [0], [1], [0, 0, 1, 1], [], []>} : vector<16x36xf32>, vector<36x193xf32>, vector<16x193xf32> -> vector<16x193xf32>
    %86 = vector.broadcast %74 : vector<16x1xf32> to vector<16x193xf32>
    %87 = arith.addf %85, %86 : vector<16x193xf32>
    %cst_87 = arith.constant 0.000000e+00 : f32
    %88 = vector.broadcast %cst_87 : f32 to vector<16x193xf32>
    %89 = arith.maximumf %87, %88 : vector<16x193xf32>
    %90 = vector.shape_cast %89 : vector<16x193xf32> to vector<1x16x193xf32>
    %91 = tpu.concatenate %82, %90 in 0 : vector<1x16x193xf32>, vector<1x16x193xf32> -> vector<2x16x193xf32>
    %cst_88 = arith.constant dense<0.000000e+00> : vector<2x16xf32>
    %92 = vector.multi_reduction <add>, %91, %cst_88 [2] : vector<2x16x193xf32> to vector<2x16xf32>
    %cst_89 = arith.constant 1.930000e+02 : f32
    %93 = vector.broadcast %cst_89 : f32 to vector<2x16xf32>
    %94 = arith.divf %92, %93 : vector<2x16xf32>
    %c0_90 = arith.constant 0 : index
    %c0_91 = arith.constant 0 : index
    %95 = vector.load %arg4[%c0_90, %c0_91] : memref<16x2xf32, #tpu.memory_space<vmem>>, vector<16x2xf32>
    %cst_92 = arith.constant dense<0.000000e+00> : vector<2x2xf32>
    %96 = tpu.matmul %94, %95, %cst_92 {dimension_numbers = #tpu.dot_dimension_numbers<[1], [0], [0], [1], [0, 0, 1, 1], [], []>} : vector<2x16xf32>, vector<16x2xf32>, vector<2x2xf32> -> vector<2x2xf32>
    %cst_93 = arith.constant 0.000000e+00 : f32
    %97 = vector.broadcast %cst_93 : f32 to vector<2x2xf32>
    %98 = arith.maximumf %96, %97 : vector<2x2xf32>
    %c0_94 = arith.constant 0 : index
    %c0_95 = arith.constant 0 : index
    %99 = vector.load %arg5[%c0_94, %c0_95] : memref<2x16xf32, #tpu.memory_space<vmem>>, vector<2x16xf32>
    %cst_96 = arith.constant dense<0.000000e+00> : vector<2x16xf32>
    %100 = tpu.matmul %98, %99, %cst_96 {dimension_numbers = #tpu.dot_dimension_numbers<[1], [0], [0], [1], [0, 0, 1, 1], [], []>} : vector<2x2xf32>, vector<2x16xf32>, vector<2x16xf32> -> vector<2x16xf32>
    %101 = arith.negf %100 : vector<2x16xf32>
    %102 = math.exp %101 : vector<2x16xf32>
    %cst_97 = arith.constant 1.000000e+00 : f32
    %103 = vector.broadcast %cst_97 : f32 to vector<2x16xf32>
    %104 = arith.addf %103, %102 : vector<2x16xf32>
    %105 = arith.divf %103, %104 : vector<2x16xf32>
    %106 = tpu.transpose %91, [0, 2, 1] : vector<2x16x193xf32> -> vector<2x193x16xf32>
    %c0_98 = arith.constant 0 : index
    %c0_99 = arith.constant 0 : index
    %c0_100 = arith.constant 0 : index
    %107 = vector.load %arg16[%c0_98, %c0_99, %c0_100] : memref<2x193x16xf32, #tpu.memory_space<vmem>>, vector<2x193x16xf32>
    tpu.vector_store %arg16[%c0_98, %c0_99, %c0_100], %106 {strides = array<i32>} : memref<2x193x16xf32, #tpu.memory_space<vmem>>, vector<2x193x16xf32>,
    %c0_101 = arith.constant 0 : index
    %c0_102 = arith.constant 0 : index
    %c0_103 = arith.constant 0 : index
    %108 = tpu.strided_load %arg16[%c0_101, %c0_102, %c0_103] {strides = array<i32: 1, 6, 1>} : memref<2x193x16xf32, #tpu.memory_space<vmem>>, vector<2x32x16xf32>
    %c0_104 = arith.constant 0 : index
    %c1_105 = arith.constant 1 : index
    %c0_106 = arith.constant 0 : index
    %109 = tpu.strided_load %arg16[%c0_104, %c1_105, %c0_106] {strides = array<i32: 1, 6, 1>} : memref<2x193x16xf32, #tpu.memory_space<vmem>>, vector<2x32x16xf32>
    %110 = arith.maximumf %108, %109 : vector<2x32x16xf32>
    %c0_107 = arith.constant 0 : index
    %c2_108 = arith.constant 2 : index
    %c0_109 = arith.constant 0 : index
    %111 = tpu.strided_load %arg16[%c0_107, %c2_108, %c0_109] {strides = array<i32: 1, 6, 1>} : memref<2x193x16xf32, #tpu.memory_space<vmem>>, vector<2x32x16xf32>
    %112 = arith.maximumf %110, %111 : vector<2x32x16xf32>
    %c0_110 = arith.constant 0 : index
    %c3_111 = arith.constant 3 : index
    %c0_112 = arith.constant 0 : index
    %113 = tpu.strided_load %arg16[%c0_110, %c3_111, %c0_112] {strides = array<i32: 1, 6, 1>} : memref<2x193x16xf32, #tpu.memory_space<vmem>>, vector<2x32x16xf32>
    %114 = arith.maximumf %112, %113 : vector<2x32x16xf32>
    %c0_113 = arith.constant 0 : index
    %c4_114 = arith.constant 4 : index
    %c0_115 = arith.constant 0 : index
    %115 = tpu.strided_load %arg16[%c0_113, %c4_114, %c0_115] {strides = array<i32: 1, 6, 1>} : memref<2x193x16xf32, #tpu.memory_space<vmem>>, vector<2x32x16xf32>
    %116 = arith.maximumf %114, %115 : vector<2x32x16xf32>
    %c0_116 = arith.constant 0 : index
    %c5_117 = arith.constant 5 : index
    %c0_118 = arith.constant 0 : index
    %117 = tpu.strided_load %arg16[%c0_116, %c5_117, %c0_118] {strides = array<i32: 1, 6, 1>} : memref<2x193x16xf32, #tpu.memory_space<vmem>>, vector<2x32x16xf32>
    %118 = arith.maximumf %116, %117 : vector<2x32x16xf32>
    %119 = vector.shape_cast %105 : vector<2x16xf32> to vector<2x1x16xf32>
    %120 = vector.broadcast %119 : vector<2x1x16xf32> to vector<2x32x16xf32>
    %121 = arith.mulf %118, %120 : vector<2x32x16xf32>
    %122 = vector.extract_strided_slice %121 {offsets = [0, 0, 0], sizes = [2, 1, 16], strides = [1, 1, 1]} : vector<2x32x16xf32> to vector<2x1x16xf32>
    %123 = vector.shape_cast %122 : vector<2x1x16xf32> to vector<2x16xf32>
    %c0_119 = arith.constant 0 : index
    %c0_120 = arith.constant 0 : index
    %124 = vector.load %arg17[%c0_119, %c0_120] : memref<2x1024xf32, #tpu.memory_space<vmem>>, vector<2x16xf32>
    tpu.vector_store %arg17[%c0_119, %c0_120], %123 {strides = array<i32>} : memref<2x1024xf32, #tpu.memory_space<vmem>>, vector<2x16xf32>,
    %125 = vector.extract_strided_slice %121 {offsets = [0, 1, 0], sizes = [2, 1, 16], strides = [1, 1, 1]} : vector<2x32x16xf32> to vector<2x1x16xf32>
    %126 = vector.shape_cast %125 : vector<2x1x16xf32> to vector<2x16xf32>
    %c0_121 = arith.constant 0 : index
    %c16_122 = arith.constant 16 : index
    %127 = vector.load %arg17[%c0_121, %c16_122] : memref<2x1024xf32, #tpu.memory_space<vmem>>, vector<2x16xf32>
    tpu.vector_store %arg17[%c0_121, %c16_122], %126 {strides = array<i32>} : memref<2x1024xf32, #tpu.memory_space<vmem>>, vector<2x16xf32>,
    %128 = vector.extract_strided_slice %121 {offsets = [0, 2, 0], sizes = [2, 1, 16], strides = [1, 1, 1]} : vector<2x32x16xf32> to vector<2x1x16xf32>
    %129 = vector.shape_cast %128 : vector<2x1x16xf32> to vector<2x16xf32>
    %c0_123 = arith.constant 0 : index
    %c32_124 = arith.constant 32 : index
    %130 = vector.load %arg17[%c0_123, %c32_124] : memref<2x1024xf32, #tpu.memory_space<vmem>>, vector<2x16xf32>
    tpu.vector_store %arg17[%c0_123, %c32_124], %129 {strides = array<i32>} : memref<2x1024xf32, #tpu.memory_space<vmem>>, vector<2x16xf32>,
    %131 = vector.extract_strided_slice %121 {offsets = [0, 3, 0], sizes = [2, 1, 16], strides = [1, 1, 1]} : vector<2x32x16xf32> to vector<2x1x16xf32>
    %132 = vector.shape_cast %131 : vector<2x1x16xf32> to vector<2x16xf32>
    %c0_125 = arith.constant 0 : index
    %c48 = arith.constant 48 : index
    %133 = vector.load %arg17[%c0_125, %c48] : memref<2x1024xf32, #tpu.memory_space<vmem>>, vector<2x16xf32>
    tpu.vector_store %arg17[%c0_125, %c48], %132 {strides = array<i32>} : memref<2x1024xf32, #tpu.memory_space<vmem>>, vector<2x16xf32>,
    %134 = vector.extract_strided_slice %121 {offsets = [0, 4, 0], sizes = [2, 1, 16], strides = [1, 1, 1]} : vector<2x32x16xf32> to vector<2x1x16xf32>
    %135 = vector.shape_cast %134 : vector<2x1x16xf32> to vector<2x16xf32>
    %c0_126 = arith.constant 0 : index
    %c64 = arith.constant 64 : index
    %136 = vector.load %arg17[%c0_126, %c64] : memref<2x1024xf32, #tpu.memory_space<vmem>>, vector<2x16xf32>
    tpu.vector_store %arg17[%c0_126, %c64], %135 {strides = array<i32>} : memref<2x1024xf32, #tpu.memory_space<vmem>>, vector<2x16xf32>,
    %137 = vector.extract_strided_slice %121 {offsets = [0, 5, 0], sizes = [2, 1, 16], strides = [1, 1, 1]} : vector<2x32x16xf32> to vector<2x1x16xf32>
    %138 = vector.shape_cast %137 : vector<2x1x16xf32> to vector<2x16xf32>
    %c0_127 = arith.constant 0 : index
    %c80 = arith.constant 80 : index
    %139 = vector.load %arg17[%c0_127, %c80] : memref<2x1024xf32, #tpu.memory_space<vmem>>, vector<2x16xf32>
    tpu.vector_store %arg17[%c0_127, %c80], %138 {strides = array<i32>} : memref<2x1024xf32, #tpu.memory_space<vmem>>, vector<2x16xf32>,
    %140 = vector.extract_strided_slice %121 {offsets = [0, 6, 0], sizes = [2, 1, 16], strides = [1, 1, 1]} : vector<2x32x16xf32> to vector<2x1x16xf32>
    %141 = vector.shape_cast %140 : vector<2x1x16xf32> to vector<2x16xf32>
    %c0_128 = arith.constant 0 : index
    %c96 = arith.constant 96 : index
    %142 = vector.load %arg17[%c0_128, %c96] : memref<2x1024xf32, #tpu.memory_space<vmem>>, vector<2x16xf32>
    tpu.vector_store %arg17[%c0_128, %c96], %141 {strides = array<i32>} : memref<2x1024xf32, #tpu.memory_space<vmem>>, vector<2x16xf32>,
    %143 = vector.extract_strided_slice %121 {offsets = [0, 7, 0], sizes = [2, 1, 16], strides = [1, 1, 1]} : vector<2x32x16xf32> to vector<2x1x16xf32>
    %144 = vector.shape_cast %143 : vector<2x1x16xf32> to vector<2x16xf32>
    %c0_129 = arith.constant 0 : index
    %c112 = arith.constant 112 : index
    %145 = vector.load %arg17[%c0_129, %c112] : memref<2x1024xf32, #tpu.memory_space<vmem>>, vector<2x16xf32>
    tpu.vector_store %arg17[%c0_129, %c112], %144 {strides = array<i32>} : memref<2x1024xf32, #tpu.memory_space<vmem>>, vector<2x16xf32>,
    %146 = vector.extract_strided_slice %121 {offsets = [0, 8, 0], sizes = [2, 1, 16], strides = [1, 1, 1]} : vector<2x32x16xf32> to vector<2x1x16xf32>
    %147 = vector.shape_cast %146 : vector<2x1x16xf32> to vector<2x16xf32>
    %c0_130 = arith.constant 0 : index
    %c128 = arith.constant 128 : index
    %148 = vector.load %arg17[%c0_130, %c128] : memref<2x1024xf32, #tpu.memory_space<vmem>>, vector<2x16xf32>
    tpu.vector_store %arg17[%c0_130, %c128], %147 {strides = array<i32>} : memref<2x1024xf32, #tpu.memory_space<vmem>>, vector<2x16xf32>,
    %149 = vector.extract_strided_slice %121 {offsets = [0, 9, 0], sizes = [2, 1, 16], strides = [1, 1, 1]} : vector<2x32x16xf32> to vector<2x1x16xf32>
    %150 = vector.shape_cast %149 : vector<2x1x16xf32> to vector<2x16xf32>
    %c0_131 = arith.constant 0 : index
    %c144 = arith.constant 144 : index
    %151 = vector.load %arg17[%c0_131, %c144] : memref<2x1024xf32, #tpu.memory_space<vmem>>, vector<2x16xf32>
    tpu.vector_store %arg17[%c0_131, %c144], %150 {strides = array<i32>} : memref<2x1024xf32, #tpu.memory_space<vmem>>, vector<2x16xf32>,
    %152 = vector.extract_strided_slice %121 {offsets = [0, 10, 0], sizes = [2, 1, 16], strides = [1, 1, 1]} : vector<2x32x16xf32> to vector<2x1x16xf32>
    %153 = vector.shape_cast %152 : vector<2x1x16xf32> to vector<2x16xf32>
    %c0_132 = arith.constant 0 : index
    %c160 = arith.constant 160 : index
    %154 = vector.load %arg17[%c0_132, %c160] : memref<2x1024xf32, #tpu.memory_space<vmem>>, vector<2x16xf32>
    tpu.vector_store %arg17[%c0_132, %c160], %153 {strides = array<i32>} : memref<2x1024xf32, #tpu.memory_space<vmem>>, vector<2x16xf32>,
    %155 = vector.extract_strided_slice %121 {offsets = [0, 11, 0], sizes = [2, 1, 16], strides = [1, 1, 1]} : vector<2x32x16xf32> to vector<2x1x16xf32>
    %156 = vector.shape_cast %155 : vector<2x1x16xf32> to vector<2x16xf32>
    %c0_133 = arith.constant 0 : index
    %c176 = arith.constant 176 : index
    %157 = vector.load %arg17[%c0_133, %c176] : memref<2x1024xf32, #tpu.memory_space<vmem>>, vector<2x16xf32>
    tpu.vector_store %arg17[%c0_133, %c176], %156 {strides = array<i32>} : memref<2x1024xf32, #tpu.memory_space<vmem>>, vector<2x16xf32>,
    %158 = vector.extract_strided_slice %121 {offsets = [0, 12, 0], sizes = [2, 1, 16], strides = [1, 1, 1]} : vector<2x32x16xf32> to vector<2x1x16xf32>
    %159 = vector.shape_cast %158 : vector<2x1x16xf32> to vector<2x16xf32>
    %c0_134 = arith.constant 0 : index
    %c192 = arith.constant 192 : index
    %160 = vector.load %arg17[%c0_134, %c192] : memref<2x1024xf32, #tpu.memory_space<vmem>>, vector<2x16xf32>
    tpu.vector_store %arg17[%c0_134, %c192], %159 {strides = array<i32>} : memref<2x1024xf32, #tpu.memory_space<vmem>>, vector<2x16xf32>,
    %161 = vector.extract_strided_slice %121 {offsets = [0, 13, 0], sizes = [2, 1, 16], strides = [1, 1, 1]} : vector<2x32x16xf32> to vector<2x1x16xf32>
    %162 = vector.shape_cast %161 : vector<2x1x16xf32> to vector<2x16xf32>
    %c0_135 = arith.constant 0 : index
    %c208 = arith.constant 208 : index
    %163 = vector.load %arg17[%c0_135, %c208] : memref<2x1024xf32, #tpu.memory_space<vmem>>, vector<2x16xf32>
    tpu.vector_store %arg17[%c0_135, %c208], %162 {strides = array<i32>} : memref<2x1024xf32, #tpu.memory_space<vmem>>, vector<2x16xf32>,
    %164 = vector.extract_strided_slice %121 {offsets = [0, 14, 0], sizes = [2, 1, 16], strides = [1, 1, 1]} : vector<2x32x16xf32> to vector<2x1x16xf32>
    %165 = vector.shape_cast %164 : vector<2x1x16xf32> to vector<2x16xf32>
    %c0_136 = arith.constant 0 : index
    %c224 = arith.constant 224 : index
    %166 = vector.load %arg17[%c0_136, %c224] : memref<2x1024xf32, #tpu.memory_space<vmem>>, vector<2x16xf32>
    tpu.vector_store %arg17[%c0_136, %c224], %165 {strides = array<i32>} : memref<2x1024xf32, #tpu.memory_space<vmem>>, vector<2x16xf32>,
    %167 = vector.extract_strided_slice %121 {offsets = [0, 15, 0], sizes = [2, 1, 16], strides = [1, 1, 1]} : vector<2x32x16xf32> to vector<2x1x16xf32>
    %168 = vector.shape_cast %167 : vector<2x1x16xf32> to vector<2x16xf32>
    %c0_137 = arith.constant 0 : index
    %c240 = arith.constant 240 : index
    %169 = vector.load %arg17[%c0_137, %c240] : memref<2x1024xf32, #tpu.memory_space<vmem>>, vector<2x16xf32>
    tpu.vector_store %arg17[%c0_137, %c240], %168 {strides = array<i32>} : memref<2x1024xf32, #tpu.memory_space<vmem>>, vector<2x16xf32>,
    %170 = vector.extract_strided_slice %121 {offsets = [0, 16, 0], sizes = [2, 1, 16], strides = [1, 1, 1]} : vector<2x32x16xf32> to vector<2x1x16xf32>
    %171 = vector.shape_cast %170 : vector<2x1x16xf32> to vector<2x16xf32>
    %c0_138 = arith.constant 0 : index
    %c256 = arith.constant 256 : index
    %172 = vector.load %arg17[%c0_138, %c256] : memref<2x1024xf32, #tpu.memory_space<vmem>>, vector<2x16xf32>
    tpu.vector_store %arg17[%c0_138, %c256], %171 {strides = array<i32>} : memref<2x1024xf32, #tpu.memory_space<vmem>>, vector<2x16xf32>,
    %173 = vector.extract_strided_slice %121 {offsets = [0, 17, 0], sizes = [2, 1, 16], strides = [1, 1, 1]} : vector<2x32x16xf32> to vector<2x1x16xf32>
    %174 = vector.shape_cast %173 : vector<2x1x16xf32> to vector<2x16xf32>
    %c0_139 = arith.constant 0 : index
    %c272 = arith.constant 272 : index
    %175 = vector.load %arg17[%c0_139, %c272] : memref<2x1024xf32, #tpu.memory_space<vmem>>, vector<2x16xf32>
    tpu.vector_store %arg17[%c0_139, %c272], %174 {strides = array<i32>} : memref<2x1024xf32, #tpu.memory_space<vmem>>, vector<2x16xf32>,
    %176 = vector.extract_strided_slice %121 {offsets = [0, 18, 0], sizes = [2, 1, 16], strides = [1, 1, 1]} : vector<2x32x16xf32> to vector<2x1x16xf32>
    %177 = vector.shape_cast %176 : vector<2x1x16xf32> to vector<2x16xf32>
    %c0_140 = arith.constant 0 : index
    %c288 = arith.constant 288 : index
    %178 = vector.load %arg17[%c0_140, %c288] : memref<2x1024xf32, #tpu.memory_space<vmem>>, vector<2x16xf32>
    tpu.vector_store %arg17[%c0_140, %c288], %177 {strides = array<i32>} : memref<2x1024xf32, #tpu.memory_space<vmem>>, vector<2x16xf32>,
    %179 = vector.extract_strided_slice %121 {offsets = [0, 19, 0], sizes = [2, 1, 16], strides = [1, 1, 1]} : vector<2x32x16xf32> to vector<2x1x16xf32>
    %180 = vector.shape_cast %179 : vector<2x1x16xf32> to vector<2x16xf32>
    %c0_141 = arith.constant 0 : index
    %c304 = arith.constant 304 : index
    %181 = vector.load %arg17[%c0_141, %c304] : memref<2x1024xf32, #tpu.memory_space<vmem>>, vector<2x16xf32>
    tpu.vector_store %arg17[%c0_141, %c304], %180 {strides = array<i32>} : memref<2x1024xf32, #tpu.memory_space<vmem>>, vector<2x16xf32>,
    %182 = vector.extract_strided_slice %121 {offsets = [0, 20, 0], sizes = [2, 1, 16], strides = [1, 1, 1]} : vector<2x32x16xf32> to vector<2x1x16xf32>
    %183 = vector.shape_cast %182 : vector<2x1x16xf32> to vector<2x16xf32>
    %c0_142 = arith.constant 0 : index
    %c320 = arith.constant 320 : index
    %184 = vector.load %arg17[%c0_142, %c320] : memref<2x1024xf32, #tpu.memory_space<vmem>>, vector<2x16xf32>
    tpu.vector_store %arg17[%c0_142, %c320], %183 {strides = array<i32>} : memref<2x1024xf32, #tpu.memory_space<vmem>>, vector<2x16xf32>,
    %185 = vector.extract_strided_slice %121 {offsets = [0, 21, 0], sizes = [2, 1, 16], strides = [1, 1, 1]} : vector<2x32x16xf32> to vector<2x1x16xf32>
    %186 = vector.shape_cast %185 : vector<2x1x16xf32> to vector<2x16xf32>
    %c0_143 = arith.constant 0 : index
    %c336 = arith.constant 336 : index
    %187 = vector.load %arg17[%c0_143, %c336] : memref<2x1024xf32, #tpu.memory_space<vmem>>, vector<2x16xf32>
    tpu.vector_store %arg17[%c0_143, %c336], %186 {strides = array<i32>} : memref<2x1024xf32, #tpu.memory_space<vmem>>, vector<2x16xf32>,
    %188 = vector.extract_strided_slice %121 {offsets = [0, 22, 0], sizes = [2, 1, 16], strides = [1, 1, 1]} : vector<2x32x16xf32> to vector<2x1x16xf32>
    %189 = vector.shape_cast %188 : vector<2x1x16xf32> to vector<2x16xf32>
    %c0_144 = arith.constant 0 : index
    %c352 = arith.constant 352 : index
    %190 = vector.load %arg17[%c0_144, %c352] : memref<2x1024xf32, #tpu.memory_space<vmem>>, vector<2x16xf32>
    tpu.vector_store %arg17[%c0_144, %c352], %189 {strides = array<i32>} : memref<2x1024xf32, #tpu.memory_space<vmem>>, vector<2x16xf32>,
    %191 = vector.extract_strided_slice %121 {offsets = [0, 23, 0], sizes = [2, 1, 16], strides = [1, 1, 1]} : vector<2x32x16xf32> to vector<2x1x16xf32>
    %192 = vector.shape_cast %191 : vector<2x1x16xf32> to vector<2x16xf32>
    %c0_145 = arith.constant 0 : index
    %c368 = arith.constant 368 : index
    %193 = vector.load %arg17[%c0_145, %c368] : memref<2x1024xf32, #tpu.memory_space<vmem>>, vector<2x16xf32>
    tpu.vector_store %arg17[%c0_145, %c368], %192 {strides = array<i32>} : memref<2x1024xf32, #tpu.memory_space<vmem>>, vector<2x16xf32>,
    %194 = vector.extract_strided_slice %121 {offsets = [0, 24, 0], sizes = [2, 1, 16], strides = [1, 1, 1]} : vector<2x32x16xf32> to vector<2x1x16xf32>
    %195 = vector.shape_cast %194 : vector<2x1x16xf32> to vector<2x16xf32>
    %c0_146 = arith.constant 0 : index
    %c384 = arith.constant 384 : index
    %196 = vector.load %arg17[%c0_146, %c384] : memref<2x1024xf32, #tpu.memory_space<vmem>>, vector<2x16xf32>
    tpu.vector_store %arg17[%c0_146, %c384], %195 {strides = array<i32>} : memref<2x1024xf32, #tpu.memory_space<vmem>>, vector<2x16xf32>,
    %197 = vector.extract_strided_slice %121 {offsets = [0, 25, 0], sizes = [2, 1, 16], strides = [1, 1, 1]} : vector<2x32x16xf32> to vector<2x1x16xf32>
    %198 = vector.shape_cast %197 : vector<2x1x16xf32> to vector<2x16xf32>
    %c0_147 = arith.constant 0 : index
    %c400 = arith.constant 400 : index
    %199 = vector.load %arg17[%c0_147, %c400] : memref<2x1024xf32, #tpu.memory_space<vmem>>, vector<2x16xf32>
    tpu.vector_store %arg17[%c0_147, %c400], %198 {strides = array<i32>} : memref<2x1024xf32, #tpu.memory_space<vmem>>, vector<2x16xf32>,
    %200 = vector.extract_strided_slice %121 {offsets = [0, 26, 0], sizes = [2, 1, 16], strides = [1, 1, 1]} : vector<2x32x16xf32> to vector<2x1x16xf32>
    %201 = vector.shape_cast %200 : vector<2x1x16xf32> to vector<2x16xf32>
    %c0_148 = arith.constant 0 : index
    %c416 = arith.constant 416 : index
    %202 = vector.load %arg17[%c0_148, %c416] : memref<2x1024xf32, #tpu.memory_space<vmem>>, vector<2x16xf32>
    tpu.vector_store %arg17[%c0_148, %c416], %201 {strides = array<i32>} : memref<2x1024xf32, #tpu.memory_space<vmem>>, vector<2x16xf32>,
    %203 = vector.extract_strided_slice %121 {offsets = [0, 27, 0], sizes = [2, 1, 16], strides = [1, 1, 1]} : vector<2x32x16xf32> to vector<2x1x16xf32>
    %204 = vector.shape_cast %203 : vector<2x1x16xf32> to vector<2x16xf32>
    %c0_149 = arith.constant 0 : index
    %c432 = arith.constant 432 : index
    %205 = vector.load %arg17[%c0_149, %c432] : memref<2x1024xf32, #tpu.memory_space<vmem>>, vector<2x16xf32>
    tpu.vector_store %arg17[%c0_149, %c432], %204 {strides = array<i32>} : memref<2x1024xf32, #tpu.memory_space<vmem>>, vector<2x16xf32>,
    %206 = vector.extract_strided_slice %121 {offsets = [0, 28, 0], sizes = [2, 1, 16], strides = [1, 1, 1]} : vector<2x32x16xf32> to vector<2x1x16xf32>
    %207 = vector.shape_cast %206 : vector<2x1x16xf32> to vector<2x16xf32>
    %c0_150 = arith.constant 0 : index
    %c448 = arith.constant 448 : index
    %208 = vector.load %arg17[%c0_150, %c448] : memref<2x1024xf32, #tpu.memory_space<vmem>>, vector<2x16xf32>
    tpu.vector_store %arg17[%c0_150, %c448], %207 {strides = array<i32>} : memref<2x1024xf32, #tpu.memory_space<vmem>>, vector<2x16xf32>,
    %209 = vector.extract_strided_slice %121 {offsets = [0, 29, 0], sizes = [2, 1, 16], strides = [1, 1, 1]} : vector<2x32x16xf32> to vector<2x1x16xf32>
    %210 = vector.shape_cast %209 : vector<2x1x16xf32> to vector<2x16xf32>
    %c0_151 = arith.constant 0 : index
    %c464 = arith.constant 464 : index
    %211 = vector.load %arg17[%c0_151, %c464] : memref<2x1024xf32, #tpu.memory_space<vmem>>, vector<2x16xf32>
    tpu.vector_store %arg17[%c0_151, %c464], %210 {strides = array<i32>} : memref<2x1024xf32, #tpu.memory_space<vmem>>, vector<2x16xf32>,
    %212 = vector.extract_strided_slice %121 {offsets = [0, 30, 0], sizes = [2, 1, 16], strides = [1, 1, 1]} : vector<2x32x16xf32> to vector<2x1x16xf32>
    %213 = vector.shape_cast %212 : vector<2x1x16xf32> to vector<2x16xf32>
    %c0_152 = arith.constant 0 : index
    %c480 = arith.constant 480 : index
    %214 = vector.load %arg17[%c0_152, %c480] : memref<2x1024xf32, #tpu.memory_space<vmem>>, vector<2x16xf32>
    tpu.vector_store %arg17[%c0_152, %c480], %213 {strides = array<i32>} : memref<2x1024xf32, #tpu.memory_space<vmem>>, vector<2x16xf32>,
    %215 = vector.extract_strided_slice %121 {offsets = [0, 31, 0], sizes = [2, 1, 16], strides = [1, 1, 1]} : vector<2x32x16xf32> to vector<2x1x16xf32>
    %216 = vector.shape_cast %215 : vector<2x1x16xf32> to vector<2x16xf32>
    %c0_153 = arith.constant 0 : index
    %c496 = arith.constant 496 : index
    %217 = vector.load %arg17[%c0_153, %c496] : memref<2x1024xf32, #tpu.memory_space<vmem>>, vector<2x16xf32>
    tpu.vector_store %arg17[%c0_153, %c496], %216 {strides = array<i32>} : memref<2x1024xf32, #tpu.memory_space<vmem>>, vector<2x16xf32>,
    %c0_154 = arith.constant 0 : index
    %c0_155 = arith.constant 0 : index
    %218 = vector.load %arg1[%c0_154, %c0_155] : memref<2x1024xf32, #tpu.memory_space<vmem>>, vector<2x1024xf32>
    %219 = arith.truncf %218 : vector<2x1024xf32> to vector<2x1024xbf16>
    %c0_156 = arith.constant 0 : index
    %c0_157 = arith.constant 0 : index
    %220 = vector.load %arg6[%c0_156, %c0_157] : memref<1024x512xbf16, #tpu.memory_space<vmem>>, vector<1024x512xbf16>
    %cst_158 = arith.constant dense<0.000000e+00> : vector<2x512xf32>
    %221 = tpu.matmul %219, %220, %cst_158 {dimension_numbers = #tpu.dot_dimension_numbers<[1], [0], [0], [1], [0, 0, 1, 1], [], []>} : vector<2x1024xbf16>, vector<1024x512xbf16>, vector<2x512xf32> -> vector<2x512xf32>
    %c0_159 = arith.constant 0 : index
    %c0_160 = arith.constant 0 : index
    %222 = vector.load %arg7[%c0_159, %c0_160] : memref<1x512xf32, #tpu.memory_space<vmem>>, vector<1x512xf32>
    %223 = vector.broadcast %222 : vector<1x512xf32> to vector<2x512xf32>
    %224 = arith.addf %221, %223 : vector<2x512xf32>
    %cst_161 = arith.constant 0.000000e+00 : f32
    %225 = vector.broadcast %cst_161 : f32 to vector<2x512xf32>
    %226 = arith.maximumf %224, %225 : vector<2x512xf32>
    %c0_162 = arith.constant 0 : index
    %c512 = arith.constant 512 : index
    %227 = vector.load %arg17[%c0_162, %c512] : memref<2x1024xf32, #tpu.memory_space<vmem>>, vector<2x512xf32>
    tpu.vector_store %arg17[%c0_162, %c512], %226 {strides = array<i32>} : memref<2x1024xf32, #tpu.memory_space<vmem>>, vector<2x512xf32>,
    %c0_163 = arith.constant 0 : index
    %c0_164 = arith.constant 0 : index
    %228 = vector.load %arg17[%c0_163, %c0_164] : memref<2x1024xf32, #tpu.memory_space<vmem>>, vector<2x1024xf32>
    %229 = arith.truncf %228 : vector<2x1024xf32> to vector<2x1024xbf16>
    %c0_165 = arith.constant 0 : index
    %c0_166 = arith.constant 0 : index
    %230 = vector.load %arg8[%c0_165, %c0_166] : memref<1024x256xbf16, #tpu.memory_space<vmem>>, vector<1024x256xbf16>
    %cst_167 = arith.constant dense<0.000000e+00> : vector<2x256xf32>
    %231 = tpu.matmul %229, %230, %cst_167 {dimension_numbers = #tpu.dot_dimension_numbers<[1], [0], [0], [1], [0, 0, 1, 1], [], []>} : vector<2x1024xbf16>, vector<1024x256xbf16>, vector<2x256xf32> -> vector<2x256xf32>
    %c0_168 = arith.constant 0 : index
    %c0_169 = arith.constant 0 : index
    %232 = vector.load %arg9[%c0_168, %c0_169] : memref<1x256xf32, #tpu.memory_space<vmem>>, vector<1x256xf32>
    %233 = vector.broadcast %232 : vector<1x256xf32> to vector<2x256xf32>
    %234 = arith.addf %231, %233 : vector<2x256xf32>
    %cst_170 = arith.constant 0.000000e+00 : f32
    %235 = vector.broadcast %cst_170 : f32 to vector<2x256xf32>
    %236 = arith.maximumf %234, %235 : vector<2x256xf32>
    %237 = arith.truncf %236 : vector<2x256xf32> to vector<2x256xbf16>
    %c0_171 = arith.constant 0 : index
    %c0_172 = arith.constant 0 : index
    %238 = vector.load %arg10[%c0_171, %c0_172] : memref<256x64xbf16, #tpu.memory_space<vmem>>, vector<256x64xbf16>
    %cst_173 = arith.constant dense<0.000000e+00> : vector<2x64xf32>
    %239 = tpu.matmul %237, %238, %cst_173 {dimension_numbers = #tpu.dot_dimension_numbers<[1], [0], [0], [1], [0, 0, 1, 1], [], []>} : vector<2x256xbf16>, vector<256x64xbf16>, vector<2x64xf32> -> vector<2x64xf32>
    %c0_174 = arith.constant 0 : index
    %c0_175 = arith.constant 0 : index
    %240 = vector.load %arg11[%c0_174, %c0_175] : memref<1x64xf32, #tpu.memory_space<vmem>>, vector<1x64xf32>
    %241 = vector.broadcast %240 : vector<1x64xf32> to vector<2x64xf32>
    %242 = arith.addf %239, %241 : vector<2x64xf32>
    %cst_176 = arith.constant 0.000000e+00 : f32
    %243 = vector.broadcast %cst_176 : f32 to vector<2x64xf32>
    %244 = arith.maximumf %242, %243 : vector<2x64xf32>
    %245 = arith.truncf %244 : vector<2x64xf32> to vector<2x64xbf16>
    %c0_177 = arith.constant 0 : index
    %c0_178 = arith.constant 0 : index
    %246 = vector.load %arg12[%c0_177, %c0_178] : memref<64x128xbf16, #tpu.memory_space<vmem>>, vector<64x128xbf16>
    %cst_179 = arith.constant dense<0.000000e+00> : vector<2x128xf32>
    %247 = tpu.matmul %245, %246, %cst_179 {dimension_numbers = #tpu.dot_dimension_numbers<[1], [0], [0], [1], [0, 0, 1, 1], [], []>} : vector<2x64xbf16>, vector<64x128xbf16>, vector<2x128xf32> -> vector<2x128xf32>
    %c0_180 = arith.constant 0 : index
    %c0_181 = arith.constant 0 : index
    %248 = vector.load %arg13[%c0_180, %c0_181] : memref<1x128xf32, #tpu.memory_space<vmem>>, vector<1x128xf32>
    %249 = vector.broadcast %248 : vector<1x128xf32> to vector<2x128xf32>
    %250 = arith.addf %247, %249 : vector<2x128xf32>
    %cst_182 = arith.constant 0.000000e+00 : f32
    %251 = vector.broadcast %cst_182 : f32 to vector<2x128xf32>
    %252 = arith.maximumf %250, %251 : vector<2x128xf32>
    %c0_183 = arith.constant 0 : index
    %c0_184 = arith.constant 0 : index
    %253 = vector.load %arg14[%c0_183, %c0_184] : memref<2x128xf32, #tpu.memory_space<vmem>>, vector<2x128xf32>
    tpu.vector_store %arg14[%c0_183, %c0_184], %252 {strides = array<i32>} : memref<2x128xf32, #tpu.memory_space<vmem>>, vector<2x128xf32>,
    return
  }
}

</mosaic_0001>

<bundles_post_ra>
// kernel: cnn_model_forward.1
= control target key start
LH: loop header
LB: loop body
LE: loop exit
PB: predicated region body
PF: predicated region fallthrough
CT: control target
= control target key end

     0   :  { %19 = vsyncpa [#allocation6], 0  ;;  %s7652_s0 = inlined_call_operand.vmem [shape: f32[2,4,201], index: 0, kind: input, shape index: {}]   ;;  %s7653_s1 = inlined_call_operand.vmem [shape: f32[2,1024], index: 1, kind: input, shape index: {}]   ;;  %s7654_s2 = inlined_call_operand.vmem [shape: f32[16,36], index: 2, kind: input, shape index: {}]   ;;  %s7655_s3 = inlined_call_operand.vmem [shape: f32[16,1], index: 3, kind: input, shape index: {}]   ;;  %s7656_s4 = inlined_call_operand.vmem [shape: f32[16,2], index: 4, kind: input, shape index: {}]   ;;  %s7657_s5 = inlined_call_operand.vmem [shape: f32[2,16], index: 5, kind: input, shape index: {}]   ;;  %s7658_s6 = inlined_call_operand.hbm [shape: bf16[1024,512], index: 6, kind: input, shape index: {}]   ;;  %s7659_s7 = inlined_call_operand.vmem [shape: f32[1,512], index: 7, kind: input, shape index: {}]   ;;  %s7660_s8 = inlined_call_operand.hbm [shape: bf16[1024,256], index: 8, kind: input, shape index: {}]   ;;  %s7661_s9 = inlined_call_operand.vmem [shape: f32[1,256], index: 9, kind: input, shape index: {}]   ;;  %s7662_s10 = inlined_call_operand.vmem [shape: bf16[256,64], index: 10, kind: input, shape index: {}]   ;;  %s7663_s11 = inlined_call_operand.vmem [shape: f32[1,64], index: 11, kind: input, shape index: {}]   ;;  %s7664_s12 = inlined_call_operand.vmem [shape: bf16[64,128], index: 12, kind: input, shape index: {}]   ;;  %s7665_s13 = inlined_call_operand.vmem [shape: f32[1,128], index: 13, kind: input, shape index: {}]   ;;  %s7666_s14 = inlined_call_operand.hbm [shape: f32[2,128], index: 14, kind: output, shape index: {}]  }
   0x1   :  { %20 = vsyncpa [#allocation9], 0 }
   0x2   :  { %21 = vsyncpa [#allocation7], 0  ;;  %s6390_s29 = smov [#allocation5]  }
   0x3   :  { %s39_s30 = sshll.u32 %s6390_s29, 4  ;;  %s40_s30 = int_to_ptr.vmem [resolvable:$true] %s39_s30 }
   0x4   :  { %s6332_s15 = scalar_lea.vmem %s40_s30, 32768  ;;  %p6337_p1 = scmp.lt.s32.totalorder %s40_s30, %s40_s30 }
   0x5   :  { %p6333_p0 = scmp.ne.s32.totalorder %s40_s30, %s6332_s15  ;;  %p6338_p2 = scmp.lt.s32.totalorder %s6332_s15, %s6332_s15 }
   0x7   :  { %p6339_p3 = por %p6338_p2, %p6337_p1 }
   0x9   :  { %p6340_p4 = pnand %p6339_p3, %p6333_p0 }
   0xb   :  { %6343 = shalt.err (!%p6340_p4)
}
   0xc   :  { %s6391_s16 = smov 256   ;;  %s6392_s17 = smov 16  }
   0xd   :  { %45 = dma.hbm_to_vmem [thread:$0]  %s7658_s6, 32768, %s40_s30, [#allocation6], %s6391_s16, %s6391_s16, %s6392_s17  }
   0xe   :  { %s6393_s20 = smov [#allocation8]  }
   0xf   :  { %s53_s21 = sshll.u32 %s6393_s20, 4  ;;  %s54_s21 = int_to_ptr.vmem [resolvable:$true] %s53_s21 }
  0x10   :  { %s6352_s22 = scalar_lea.vmem %s54_s21, 16384  ;;  %p6357_p6 = scmp.lt.s32.totalorder %s54_s21, %s54_s21 }
  0x11   :  { %p6353_p5 = scmp.ne.s32.totalorder %s54_s21, %s6352_s22  ;;  %p6358_p7 = scmp.lt.s32.totalorder %s6352_s22, %s6352_s22 }
  0x13   :  { %p6359_p8 = por %p6358_p7, %p6357_p6 }
  0x15   :  { %p6360_p9 = pnand %p6359_p8, %p6353_p5 }
  0x17   :  { %6363 = shalt.err (!%p6360_p9)
}
  0x18   :  { %s6394_s23 = smov 128   ;;  %s6395_s24 = smov 8  }
  0x19   :  { %59 = dma.hbm_to_vmem [thread:$0]  %s7660_s8, 16384, %s54_s21, [#allocation9], %s6394_s23, %s6394_s23, %s6395_s24  }
  0x1a   :  { %6384 = dma.done.wait [#allocation6], 32768  }
  0x1b   :  { %6385 = vsyncadd [#allocation6], 4294934528 }
  0x1c   :  { %6386 = dma.done.wait [#allocation9], 16384  }
  0x1d   :  { %6387 = vsyncadd [#allocation9], 4294950912  ;;  %v91_v0 = vlaneseq  ;;  %v6396_v1 = vmov 1966171168   ;;  %s6398_s29 = smov 123   ;;  %s6399_s30 = smov 121  }
  0x1e   :  { %v89_v2 = vunpack.c.l.s4 %v6396_v1  ;;  %v5215_v6 = vld.sshfl [vmem:[%s7652_s0] sm:$0xff pattern:$0x75316420]  ;;  %v5216_v7 = vld.sshfl [vmem:[%s7652_s0 + $0x8] sm:$0xff pattern:$0x75316420] }
  0x1f   :  { %v6499_v3 = vshrl.u32 %v91_v0, 7  ;;  %v256_v8 = vcombine.high %v5215_v6, %v5215_v6  ;;  %v264_v9 = vcombine.high %v5216_v7, %v5216_v7  ;;  %vm6517_vm0 = vcmp.lt.s32.totalorder %v91_v0, 193  ;;  %s6397_s0 = smov 122   ;;  %s6400_s15 = smov 120   ;;  %v686_v42 = vld [vmem:[%s7655_s3] sm:$0xff]  ;;  %v687_v43 = vld [vmem:[%s7655_s3 + $0x8] sm:$0xff] }
  0x20   :  { %v90_v4 = vunpack.c.0.s8 %v89_v2  ;;  %s6401_s16 = smov 127   ;;  %s6402_s18 = smov 126   ;;  %vm211_vm1 = vcmask 998400   ;;  %vm194_vm2 = vcmask 1006592   ;;  %vm228_vm3 = vcmask 990208   ;;  %v685_v12 = vld [vmem:[%s7654_s2 + $0x8] sm:$0xff] }
  0x21   :  { %s6403_s19 = smov 125   ;;  %s6404_s20 = smov 124   ;;  %vm245_vm4 = vcmask 982016   ;;  %v6405_v37 = vmov 0.0   ;;  %vm715_vm5 = vcmask 1043456   ;;  %v6406_v46 = vmov 0  }
  0x22   :  { %v6502_v5 = vsub.s32 %v90_v4, %v6499_v3  ;;  %786 = vmatprep.mubr.f32.mxu0 %v6405_v37  ;;  %884 = vmatprep.mubr.f32.mxu1 %v6405_v37  ;;  %vm126_vm6 = vcmask 1039360   ;;  %vm143_vm7 = vcmask 1031168   ;;  %vm160_vm8 = vcmask 1022976   ;;  %s6413_s21 = smov 112   ;;  %s6414_s22 = smov 96  }
  0x23   :  { %5718 = vset.pattern.permute.xlu0 %v6406_v46  ;;  %5719 = vset.pattern.permute.xlu1 %v6406_v46  ;;  %vm177_vm9 = vcmask 1014784   ;;  %vm708_vm10 = vcmask 293888   ;;  %vm901_vm11 = vcmask 531456   ;;  %vm6407_vm12 = vmmov 0  }
  0x24   :  { %v6511_v10 = vrot.slane %v5216_v7, %v6502_v5  ;;  %v6514_v11 = vrot.slane %v5215_v6, %v6502_v5  ;;  %v6522_v13 = vrot.slane %v256_v8, %v6502_v5  ;;  %v6525_v14 = vrot.slane %v264_v9, %v6502_v5 }
  0x25   :  { %vm940_vm13 = vcmask 130112   ;;  %vm951_vm14 = vcmask 1041409   ;;  %vm953_vm15 = vcmask 130048  }
  0x26   :  { %v409_v15 = vcombine.high %v6511_v10, %v6511_v10  ;;  %118 = vst.msk [vmem:[#allocation2 + $0x50] ss:$8 sm:$0x3] %vm6517_vm0, %v6511_v10  ;;  %v408_v16 = vcombine.high %v6514_v11, %v6514_v11  ;;  %115 = vst.msk [vmem:[#allocation2] ss:$8 sm:$0x3] %vm6517_vm0, %v6514_v11  ;;  %v546_v17 = vcombine.high %v6522_v13, %v6522_v13 }
  0x27   :  { %275 = vst.msk [vmem:[#allocation2 + $0x11] ss:$8 sm:$0x3] %vm6517_vm0, %v6522_v13  ;;  %v547_v18 = vcombine.high %v6525_v14, %v6525_v14  ;;  %278 = vst.msk [vmem:[#allocation2 + $0x61] ss:$8 sm:$0x3] %vm6517_vm0, %v6525_v14 }
  0x28   :  { %416 = vst.msk [vmem:[#allocation2 + $0x72] ss:$8 sm:$0x3] %vm6517_vm0, %v409_v15  ;;  %413 = vst.msk [vmem:[#allocation2 + $0x22] ss:$8 sm:$0x3] %vm6517_vm0, %v408_v16  ;;  %636 = vrot.lane.b32.xlu1 %v546_v17, %s6397_s0  ;;  %620 = vrot.lane.b32.xlu0 %v546_v17, %s6398_s29 }
  0x29   :  { %551 = vst.msk [vmem:[#allocation2 + $0x33] ss:$8 sm:$0x3] %vm6517_vm0, %v546_v17  ;;  %554 = vst.msk [vmem:[#allocation2 + $0x83] ss:$8 sm:$0x3] %vm6517_vm0, %v547_v18 }
  0x2c   :  { %638 = vrot.lane.b32.xlu1 %v547_v18, %s6397_s0  ;;  %622 = vrot.lane.b32.xlu0 %v547_v18, %s6398_s29 }
  0x30   :  { %654 = vrot.lane.b32.xlu1 %v547_v18, %s6399_s30  ;;  %652 = vrot.lane.b32.xlu0 %v546_v17, %s6399_s30 }
  0x34   :  { %670 = vrot.lane.b32.xlu1 %v547_v18, %s6400_s15  ;;  %668 = vrot.lane.b32.xlu0 %v546_v17, %s6400_s15 }
  0x38   :  { %500 = vrot.lane.b32.xlu1 %v409_v15, %s6397_s0  ;;  %498 = vrot.lane.b32.xlu0 %v408_v16, %s6397_s0 }
  0x3c   :  { %516 = vrot.lane.b32.xlu1 %v409_v15, %s6399_s30  ;;  %514 = vrot.lane.b32.xlu0 %v408_v16, %s6399_s30 }
  0x40   :  { %532 = vrot.lane.b32.xlu1 %v409_v15, %s6400_s15  ;;  %530 = vrot.lane.b32.xlu0 %v408_v16, %s6400_s15 }
  0x44   :  { %558 = vrot.lane.b32.xlu1 %v547_v18, %s6401_s16  ;;  %556 = vrot.lane.b32.xlu0 %v546_v17, %s6401_s16 }
  0x48   :  { %574 = vrot.lane.b32.xlu1 %v547_v18, %s6402_s18  ;;  %572 = vrot.lane.b32.xlu0 %v546_v17, %s6402_s18 }
  0x4c   :  { %590 = vrot.lane.b32.xlu1 %v547_v18, %s6403_s19  ;;  %588 = vrot.lane.b32.xlu0 %v546_v17, %s6403_s19 }
  0x50   :  { %606 = vrot.lane.b32.xlu1 %v547_v18, %s6404_s20  ;;  %604 = vrot.lane.b32.xlu0 %v546_v17, %s6404_s20 }
  0x54   :  { %378 = vrot.lane.b32.xlu1 %v6525_v14, %s6399_s30  ;;  %376 = vrot.lane.b32.xlu0 %v6522_v13, %s6399_s30 }
  0x58   :  { %394 = vrot.lane.b32.xlu1 %v6525_v14, %s6400_s15  ;;  %392 = vrot.lane.b32.xlu0 %v6522_v13, %s6400_s15 }
  0x5c   :  { %420 = vrot.lane.b32.xlu1 %v409_v15, %s6401_s16  ;;  %418 = vrot.lane.b32.xlu0 %v408_v16, %s6401_s16 }
  0x60   :  { %436 = vrot.lane.b32.xlu1 %v409_v15, %s6402_s18  ;;  %434 = vrot.lane.b32.xlu0 %v408_v16, %s6402_s18 }
  0x64   :  { %452 = vrot.lane.b32.xlu1 %v409_v15, %s6403_s19  ;;  %450 = vrot.lane.b32.xlu0 %v408_v16, %s6403_s19 }
  0x68   :  { %468 = vrot.lane.b32.xlu1 %v409_v15, %s6404_s20  ;;  %466 = vrot.lane.b32.xlu0 %v408_v16, %s6404_s20 }
  0x6c   :  { %484 = vrot.lane.b32.xlu1 %v409_v15, %s6398_s29  ;;  %482 = vrot.lane.b32.xlu0 %v408_v16, %s6398_s29 }
  0x70   :  { %241 = vrot.lane.b32.xlu1 %v6511_v10, %s6400_s15  ;;  %239 = vrot.lane.b32.xlu0 %v6514_v11, %s6400_s15 }
  0x74   :  { %282 = vrot.lane.b32.xlu1 %v6525_v14, %s6401_s16  ;;  %280 = vrot.lane.b32.xlu0 %v6522_v13, %s6401_s16 }
  0x78   :  { %298 = vrot.lane.b32.xlu1 %v6525_v14, %s6402_s18  ;;  %296 = vrot.lane.b32.xlu0 %v6522_v13, %s6402_s18 }
  0x7c   :  { %314 = vrot.lane.b32.xlu1 %v6525_v14, %s6403_s19  ;;  %312 = vrot.lane.b32.xlu0 %v6522_v13, %s6403_s19 }
  0x80   :  { %330 = vrot.lane.b32.xlu1 %v6525_v14, %s6404_s20  ;;  %328 = vrot.lane.b32.xlu0 %v6522_v13, %s6404_s20 }
  0x84   :  { %346 = vrot.lane.b32.xlu1 %v6525_v14, %s6398_s29  ;;  %344 = vrot.lane.b32.xlu0 %v6522_v13, %s6398_s29 }
  0x88   :  { %362 = vrot.lane.b32.xlu1 %v6525_v14, %s6397_s0  ;;  %360 = vrot.lane.b32.xlu0 %v6522_v13, %s6397_s0 }
  0x8c   :  { %122 = vrot.lane.b32.xlu1 %v6511_v10, %s6401_s16  ;;  %120 = vrot.lane.b32.xlu0 %v6514_v11, %s6401_s16 }
  0x90   :  { %139 = vrot.lane.b32.xlu1 %v6511_v10, %s6402_s18  ;;  %137 = vrot.lane.b32.xlu0 %v6514_v11, %s6402_s18  ;;  %s6410_s18 = smov 80  }
  0x94   :  { %156 = vrot.lane.b32.xlu1 %v6511_v10, %s6403_s19  ;;  %154 = vrot.lane.b32.xlu0 %v6514_v11, %s6403_s19  ;;  %s6411_s19 = smov 32  }
  0x98   :  { %173 = vrot.lane.b32.xlu1 %v6511_v10, %s6404_s20  ;;  %171 = vrot.lane.b32.xlu0 %v6514_v11, %s6404_s20  ;;  %s6412_s20 = smov 64  }
  0x9a   :  { %v637_v19 = vpop.permute.xlu1 %636  ;;  %v621_v20 = vpop.permute.xlu0 %620 }
  0x9b   :  { %v640_v21 = vrot.slane %v637_v19, 1  ;;  %v624_v22 = vrot.slane %v621_v20, 1 }
  0x9c   :  { %190 = vrot.lane.b32.xlu1 %v6511_v10, %s6398_s29  ;;  %188 = vrot.lane.b32.xlu0 %v6514_v11, %s6398_s29 }
  0x9d   :  { %v642_v23 = vsel %vm211_vm1, %v637_v19, %v640_v21  ;;  %v626_v24 = vsel %vm194_vm2, %v621_v20, %v624_v22 }
  0x9e   :  { %647 = vst.msk [vmem:[#allocation2 + $0x41] ss:$8 sm:$0x3] %vm6517_vm0, %v642_v23  ;;  %631 = vst.msk [vmem:[#allocation2 + $0x40] ss:$8 sm:$0x3] %vm6517_vm0, %v626_v24  ;;  %v639_v25 = vpop.permute.xlu1 %638  ;;  %v623_v26 = vpop.permute.xlu0 %622 }
  0x9f   :  { %v641_v27 = vrot.slane %v639_v25, 1  ;;  %v625_v28 = vrot.slane %v623_v26, 1 }
  0xa0   :  { %207 = vrot.lane.b32.xlu1 %v6511_v10, %s6397_s0  ;;  %205 = vrot.lane.b32.xlu0 %v6514_v11, %s6397_s0 }
  0xa1   :  { %v643_v29 = vsel %vm211_vm1, %v639_v25, %v641_v27  ;;  %v627_v30 = vsel %vm194_vm2, %v623_v26, %v625_v28 }
  0xa2   :  { %650 = vst.msk [vmem:[#allocation2 + $0x91] ss:$8 sm:$0x3] %vm6517_vm0, %v643_v29  ;;  %634 = vst.msk [vmem:[#allocation2 + $0x90] ss:$8 sm:$0x3] %vm6517_vm0, %v627_v30  ;;  %v655_v31 = vpop.permute.xlu1 %654  ;;  %v653_v32 = vpop.permute.xlu0 %652 }
  0xa3   :  { %v657_v33 = vrot.slane %v655_v31, 1  ;;  %v656_v34 = vrot.slane %v653_v32, 1 }
  0xa4   :  { %224 = vrot.lane.b32.xlu1 %v6511_v10, %s6399_s30  ;;  %222 = vrot.lane.b32.xlu0 %v6514_v11, %s6399_s30 }
  0xa5   :  { %v659_v35 = vsel %vm228_vm3, %v655_v31, %v657_v33  ;;  %v658_v36 = vsel %vm228_vm3, %v653_v32, %v656_v34 }
  0xa6   :  { %666 = vst.msk [vmem:[#allocation2 + $0x92] ss:$8 sm:$0x3] %vm6517_vm0, %v659_v35  ;;  %663 = vst.msk [vmem:[#allocation2 + $0x42] ss:$8 sm:$0x3] %vm6517_vm0, %v658_v36  ;;  %v671_v38 = vpop.permute.xlu1 %670  ;;  %v669_v39 = vpop.permute.xlu0 %668 }
  0xa7   :  { %v673_v40 = vrot.slane %v671_v38, 1  ;;  %v672_v41 = vrot.slane %v669_v39, 1 }
  0xa8   :  { %700 = vperm.xlu0 %5718, %v686_v42   ;;  %705 = vperm.xlu1 %5719, %v687_v43  }
  0xa9   :  { %v675_v44 = vsel %vm245_vm4, %v671_v38, %v673_v40  ;;  %v674_v45 = vsel %vm245_vm4, %v669_v39, %v672_v41 }
  0xaa   :  { %682 = vst.msk [vmem:[#allocation2 + $0x93] ss:$8 sm:$0x3] %vm6517_vm0, %v675_v44  ;;  %679 = vst.msk [vmem:[#allocation2 + $0x43] ss:$8 sm:$0x3] %vm6517_vm0, %v674_v45  ;;  %v501_v47 = vpop.permute.xlu1 %500  ;;  %v499_v48 = vpop.permute.xlu0 %498 }
  0xab   :  { %v503_v49 = vrot.slane %v501_v47, 1  ;;  %v502_v50 = vrot.slane %v499_v48, 1 }
  0xad   :  { %v505_v51 = vsel %vm211_vm1, %v501_v47, %v503_v49  ;;  %v504_v52 = vsel %vm211_vm1, %v499_v48, %v502_v50 }
  0xae   :  { %512 = vst.msk [vmem:[#allocation2 + $0x80] ss:$8 sm:$0x3] %vm6517_vm0, %v505_v51  ;;  %509 = vst.msk [vmem:[#allocation2 + $0x30] ss:$8 sm:$0x3] %vm6517_vm0, %v504_v52  ;;  %v517_v53 = vpop.permute.xlu1 %516  ;;  %v515_v54 = vpop.permute.xlu0 %514 }
  0xaf   :  { %v519_v55 = vrot.slane %v517_v53, 1  ;;  %v518_v56 = vrot.slane %v515_v54, 1 }
  0xb1   :  { %v521_v57 = vsel %vm228_vm3, %v517_v53, %v519_v55  ;;  %v520_v58 = vsel %vm228_vm3, %v515_v54, %v518_v56  ;;  %v697_v59 = vld [vmem:[#allocation2 + $0x48] sm:$0xf]  ;;  %v813_v60 = vld [vmem:[#allocation2 + $0x98] sm:$0xf]  ;;  %v696_v61 = vld [vmem:[#allocation2 + $0x40] sm:$0xf] }
  0xb2   :  { %528 = vst.msk [vmem:[#allocation2 + $0x81] ss:$8 sm:$0x3] %vm6517_vm0, %v521_v57  ;;  %525 = vst.msk [vmem:[#allocation2 + $0x31] ss:$8 sm:$0x3] %vm6517_vm0, %v520_v58  ;;  %v533_v62 = vpop.permute.xlu1 %532  ;;  %5217 = vmatprep.subr.msk.mxu0 %vm715_vm5, %v697_v59  ;;  %5221 = vmatprep.subr.msk.mxu1 %vm715_vm5, %v813_v60  ;;  %v531_v63 = vpop.permute.xlu0 %530 }
  0xb3   :  { %v812_v1 = vld [vmem:[#allocation2 + $0x90] sm:$0xf]  ;;  %v535_v2 = vrot.slane %v533_v62, 1  ;;  %v534_v4 = vrot.slane %v531_v63, 1  ;;  %5218 = vmatpush1.msk.msra.mxu0 %vm715_vm5, %v696_v61 }
  0xb4   :  { %5222 = vmatpush1.msk.msra.mxu1 %vm715_vm5, %v812_v1  ;;  %vm1496_vm5 = vcmask 123904  }
  0xb5   :  { %v537_v6 = vsel %vm245_vm4, %v533_v62, %v535_v2  ;;  %v536_v7 = vsel %vm245_vm4, %v531_v63, %v534_v4 }
  0xb6   :  { %544 = vst.msk [vmem:[#allocation2 + $0x82] ss:$8 sm:$0x3] %vm6517_vm0, %v537_v6  ;;  %541 = vst.msk [vmem:[#allocation2 + $0x32] ss:$8 sm:$0x3] %vm6517_vm0, %v536_v7  ;;  %v559_v8 = vpop.permute.xlu1 %558  ;;  %v557_v9 = vpop.permute.xlu0 %556 }
  0xb7   :  { %v561_v10 = vrot.slane %v559_v8, 1  ;;  %v560_v11 = vrot.slane %v557_v9, 1 }
  0xb9   :  { %v563_v13 = vsel %vm126_vm6, %v559_v8, %v561_v10  ;;  %v562_v14 = vsel %vm126_vm6, %v557_v9, %v560_v11 }
  0xba   :  { %570 = vst.msk [vmem:[#allocation2 + $0x84] ss:$8 sm:$0x3] %vm6517_vm0, %v563_v13  ;;  %567 = vst.msk [vmem:[#allocation2 + $0x34] ss:$8 sm:$0x3] %vm6517_vm0, %v562_v14  ;;  %v575_v15 = vpop.permute.xlu1 %574  ;;  %v573_v16 = vpop.permute.xlu0 %572 }
  0xbb   :  { %v577_v17 = vrot.slane %v575_v15, 1  ;;  %v576_v18 = vrot.slane %v573_v16, 1 }
  0xbd   :  { %v579_v19 = vsel %vm143_vm7, %v575_v15, %v577_v17  ;;  %v578_v20 = vsel %vm143_vm7, %v573_v16, %v576_v18 }
  0xbe   :  { %586 = vst.msk [vmem:[#allocation2 + $0x85] ss:$8 sm:$0x3] %vm6517_vm0, %v579_v19  ;;  %583 = vst.msk [vmem:[#allocation2 + $0x35] ss:$8 sm:$0x3] %vm6517_vm0, %v578_v20  ;;  %v591_v21 = vpop.permute.xlu1 %590  ;;  %v589_v22 = vpop.permute.xlu0 %588 }
  0xbf   :  { %v593_v23 = vrot.slane %v591_v21, 1  ;;  %v592_v24 = vrot.slane %v589_v22, 1 }
  0xc1   :  { %v595_v25 = vsel %vm160_vm8, %v591_v21, %v593_v23  ;;  %v594_v26 = vsel %vm160_vm8, %v589_v22, %v592_v24 }
  0xc2   :  { %602 = vst.msk [vmem:[#allocation2 + $0x86] ss:$8 sm:$0x3] %vm6517_vm0, %v595_v25  ;;  %599 = vst.msk [vmem:[#allocation2 + $0x36] ss:$8 sm:$0x3] %vm6517_vm0, %v594_v26  ;;  %v607_v27 = vpop.permute.xlu1 %606  ;;  %v605_v28 = vpop.permute.xlu0 %604 }
  0xc3   :  { %v609_v29 = vrot.slane %v607_v27, 1  ;;  %v608_v30 = vrot.slane %v605_v28, 1 }
  0xc5   :  { %v611_v31 = vsel %vm177_vm9, %v607_v27, %v609_v29  ;;  %v610_v32 = vsel %vm177_vm9, %v605_v28, %v608_v30 }
  0xc6   :  { %618 = vst.msk [vmem:[#allocation2 + $0x87] ss:$8 sm:$0x3] %vm6517_vm0, %v611_v31  ;;  %615 = vst.msk [vmem:[#allocation2 + $0x37] ss:$8 sm:$0x3] %vm6517_vm0, %v610_v32  ;;  %v379_v33 = vpop.permute.xlu1 %378  ;;  %v377_v34 = vpop.permute.xlu0 %376 }
  0xc7   :  { %v381_v35 = vrot.slane %v379_v33, 1  ;;  %v380_v36 = vrot.slane %v377_v34, 1 }
  0xc9   :  { %v383_v38 = vsel %vm228_vm3, %v379_v33, %v381_v35  ;;  %v382_v39 = vsel %vm228_vm3, %v377_v34, %v380_v36 }
  0xca   :  { %390 = vst.msk [vmem:[#allocation2 + $0x70] ss:$8 sm:$0x3] %vm6517_vm0, %v383_v38  ;;  %387 = vst.msk [vmem:[#allocation2 + $0x20] ss:$8 sm:$0x3] %vm6517_vm0, %v382_v39  ;;  %v395_v40 = vpop.permute.xlu1 %394  ;;  %v393_v41 = vpop.permute.xlu0 %392 }
  0xcb   :  { %v397_v42 = vrot.slane %v395_v40, 1  ;;  %v396_v43 = vrot.slane %v393_v41, 1 }
  0xcd   :  { %v399_v44 = vsel %vm245_vm4, %v395_v40, %v397_v42  ;;  %v398_v45 = vsel %vm245_vm4, %v393_v41, %v396_v43  ;;  %v695_v46 = vld [vmem:[#allocation2 + $0x38] sm:$0xff]  ;;  %v811_v47 = vld [vmem:[#allocation2 + $0x88] sm:$0xff]  ;;  %v694_v48 = vld [vmem:[#allocation2 + $0x30] sm:$0xff] }
  0xce   :  { %406 = vst.msk [vmem:[#allocation2 + $0x71] ss:$8 sm:$0x3] %vm6517_vm0, %v399_v44  ;;  %403 = vst.msk [vmem:[#allocation2 + $0x21] ss:$8 sm:$0x3] %vm6517_vm0, %v398_v45  ;;  %v421_v49 = vpop.permute.xlu1 %420  ;;  %746 = vmatprep.subr.mxu0 %v695_v46  ;;  %844 = vmatprep.subr.mxu1 %v811_v47  ;;  %v419_v50 = vpop.permute.xlu0 %418 }
  0xcf   :  { %v810_v51 = vld [vmem:[#allocation2 + $0x80] sm:$0xff]  ;;  %v423_v52 = vrot.slane %v421_v49, 1  ;;  %v422_v53 = vrot.slane %v419_v50, 1  ;;  %747 = vmatpush1.msra.mxu0 %v694_v48 }
  0xd0   :  { %845 = vmatpush1.msra.mxu1 %v810_v51 }
  0xd1   :  { %v425_v54 = vsel %vm126_vm6, %v421_v49, %v423_v52  ;;  %v424_v55 = vsel %vm126_vm6, %v419_v50, %v422_v53 }
  0xd2   :  { %432 = vst.msk [vmem:[#allocation2 + $0x73] ss:$8 sm:$0x3] %vm6517_vm0, %v425_v54  ;;  %429 = vst.msk [vmem:[#allocation2 + $0x23] ss:$8 sm:$0x3] %vm6517_vm0, %v424_v55  ;;  %v437_v56 = vpop.permute.xlu1 %436  ;;  %v435_v57 = vpop.permute.xlu0 %434 }
  0xd3   :  { %v439_v58 = vrot.slane %v437_v56, 1  ;;  %v438_v59 = vrot.slane %v435_v57, 1 }
  0xd5   :  { %v441_v60 = vsel %vm143_vm7, %v437_v56, %v439_v58  ;;  %v440_v61 = vsel %vm143_vm7, %v435_v57, %v438_v59 }
  0xd6   :  { %448 = vst.msk [vmem:[#allocation2 + $0x74] ss:$8 sm:$0x3] %vm6517_vm0, %v441_v60  ;;  %445 = vst.msk [vmem:[#allocation2 + $0x24] ss:$8 sm:$0x3] %vm6517_vm0, %v440_v61  ;;  %v453_v62 = vpop.permute.xlu1 %452  ;;  %v451_v63 = vpop.permute.xlu0 %450 }
  0xd7   :  { %v455_v1 = vrot.slane %v453_v62, 1  ;;  %v454_v2 = vrot.slane %v451_v63, 1 }
  0xd9   :  { %v457_v4 = vsel %vm160_vm8, %v453_v62, %v455_v1  ;;  %v456_v6 = vsel %vm160_vm8, %v451_v63, %v454_v2 }
  0xda   :  { %464 = vst.msk [vmem:[#allocation2 + $0x75] ss:$8 sm:$0x3] %vm6517_vm0, %v457_v4  ;;  %461 = vst.msk [vmem:[#allocation2 + $0x25] ss:$8 sm:$0x3] %vm6517_vm0, %v456_v6  ;;  %v469_v7 = vpop.permute.xlu1 %468  ;;  %v467_v8 = vpop.permute.xlu0 %466 }
  0xdb   :  { %v471_v9 = vrot.slane %v469_v7, 1  ;;  %v470_v10 = vrot.slane %v467_v8, 1 }
  0xdd   :  { %v473_v11 = vsel %vm177_vm9, %v469_v7, %v471_v9  ;;  %v472_v13 = vsel %vm177_vm9, %v467_v8, %v470_v10 }
  0xde   :  { %480 = vst.msk [vmem:[#allocation2 + $0x76] ss:$8 sm:$0x3] %vm6517_vm0, %v473_v11  ;;  %477 = vst.msk [vmem:[#allocation2 + $0x26] ss:$8 sm:$0x3] %vm6517_vm0, %v472_v13  ;;  %v485_v14 = vpop.permute.xlu1 %484  ;;  %v483_v15 = vpop.permute.xlu0 %482 }
  0xdf   :  { %v487_v16 = vrot.slane %v485_v14, 1  ;;  %v486_v17 = vrot.slane %v483_v15, 1 }
  0xe1   :  { %v489_v18 = vsel %vm194_vm2, %v485_v14, %v487_v16  ;;  %v488_v19 = vsel %vm194_vm2, %v483_v15, %v486_v17 }
  0xe2   :  { %496 = vst.msk [vmem:[#allocation2 + $0x77] ss:$8 sm:$0x3] %vm6517_vm0, %v489_v18  ;;  %493 = vst.msk [vmem:[#allocation2 + $0x27] ss:$8 sm:$0x3] %vm6517_vm0, %v488_v19  ;;  %v242_v20 = vpop.permute.xlu1 %241  ;;  %v240_v21 = vpop.permute.xlu0 %239 }
  0xe3   :  { %v244_v22 = vrot.slane %v242_v20, 1  ;;  %v243_v23 = vrot.slane %v240_v21, 1 }
  0xe5   :  { %v247_v24 = vsel %vm245_vm4, %v242_v20, %v244_v22  ;;  %v246_v25 = vsel %vm245_vm4, %v240_v21, %v243_v23  ;;  %vm1493_vm4 = vcmask 1047559  }
  0xe6   :  { %254 = vst.msk [vmem:[#allocation2 + $0x60] ss:$8 sm:$0x3] %vm6517_vm0, %v247_v24  ;;  %251 = vst.msk [vmem:[#allocation2 + $0x10] ss:$8 sm:$0x3] %vm6517_vm0, %v246_v25  ;;  %v283_v26 = vpop.permute.xlu1 %282  ;;  %v281_v27 = vpop.permute.xlu0 %280 }
  0xe7   :  { %v285_v28 = vrot.slane %v283_v26, 1  ;;  %v284_v29 = vrot.slane %v281_v27, 1 }
  0xe9   :  { %v287_v30 = vsel %vm126_vm6, %v283_v26, %v285_v28  ;;  %v286_v31 = vsel %vm126_vm6, %v281_v27, %v284_v29  ;;  %v809_v32 = vld [vmem:[#allocation2 + $0x78] sm:$0xff]  ;;  %v693_v33 = vld [vmem:[#allocation2 + $0x28] sm:$0xff]  ;;  %v692_v34 = vld [vmem:[#allocation2 + $0x20] sm:$0xff] }
  0xea   :  { %294 = vst.msk [vmem:[#allocation2 + $0x62] ss:$8 sm:$0x3] %vm6517_vm0, %v287_v30  ;;  %291 = vst.msk [vmem:[#allocation2 + $0x12] ss:$8 sm:$0x3] %vm6517_vm0, %v286_v31  ;;  %v299_v35 = vpop.permute.xlu1 %298  ;;  %846 = vmatprep.subr.mxu1 %v809_v32  ;;  %v297_v36 = vpop.permute.xlu0 %296  ;;  %748 = vmatprep.subr.mxu0 %v693_v33 }
  0xeb   :  { %v808_v38 = vld [vmem:[#allocation2 + $0x70] sm:$0xff]  ;;  %v301_v39 = vrot.slane %v299_v35, 1  ;;  %v300_v40 = vrot.slane %v297_v36, 1  ;;  %749 = vmatpush1.msra.mxu0 %v692_v34 }
  0xec   :  { %847 = vmatpush1.msra.mxu1 %v808_v38 }
  0xed   :  { %v303_v41 = vsel %vm143_vm7, %v299_v35, %v301_v39  ;;  %v302_v42 = vsel %vm143_vm7, %v297_v36, %v300_v40 }
  0xee   :  { %310 = vst.msk [vmem:[#allocation2 + $0x63] ss:$8 sm:$0x3] %vm6517_vm0, %v303_v41  ;;  %307 = vst.msk [vmem:[#allocation2 + $0x13] ss:$8 sm:$0x3] %vm6517_vm0, %v302_v42  ;;  %v315_v43 = vpop.permute.xlu1 %314  ;;  %v313_v44 = vpop.permute.xlu0 %312 }
  0xef   :  { %v317_v45 = vrot.slane %v315_v43, 1  ;;  %v316_v46 = vrot.slane %v313_v44, 1 }
  0xf1   :  { %v319_v47 = vsel %vm160_vm8, %v315_v43, %v317_v45  ;;  %v318_v48 = vsel %vm160_vm8, %v313_v44, %v316_v46 }
  0xf2   :  { %326 = vst.msk [vmem:[#allocation2 + $0x64] ss:$8 sm:$0x3] %vm6517_vm0, %v319_v47  ;;  %323 = vst.msk [vmem:[#allocation2 + $0x14] ss:$8 sm:$0x3] %vm6517_vm0, %v318_v48  ;;  %v331_v49 = vpop.permute.xlu1 %330  ;;  %v329_v50 = vpop.permute.xlu0 %328 }
  0xf3   :  { %v333_v51 = vrot.slane %v331_v49, 1  ;;  %v332_v52 = vrot.slane %v329_v50, 1 }
  0xf5   :  { %v335_v53 = vsel %vm177_vm9, %v331_v49, %v333_v51  ;;  %v334_v54 = vsel %vm177_vm9, %v329_v50, %v332_v52 }
  0xf6   :  { %342 = vst.msk [vmem:[#allocation2 + $0x65] ss:$8 sm:$0x3] %vm6517_vm0, %v335_v53  ;;  %339 = vst.msk [vmem:[#allocation2 + $0x15] ss:$8 sm:$0x3] %vm6517_vm0, %v334_v54  ;;  %v347_v55 = vpop.permute.xlu1 %346  ;;  %v345_v56 = vpop.permute.xlu0 %344 }
  0xf7   :  { %v349_v57 = vrot.slane %v347_v55, 1  ;;  %v348_v58 = vrot.slane %v345_v56, 1  ;;  %v684_v54 = vld [vmem:[%s7654_s2] sm:$0xff] }
  0xf9   :  { %v351_v59 = vsel %vm194_vm2, %v347_v55, %v349_v57  ;;  %v350_v60 = vsel %vm194_vm2, %v345_v56, %v348_v58 }
  0xfa   :  { %358 = vst.msk [vmem:[#allocation2 + $0x66] ss:$8 sm:$0x3] %vm6517_vm0, %v351_v59  ;;  %355 = vst.msk [vmem:[#allocation2 + $0x16] ss:$8 sm:$0x3] %vm6517_vm0, %v350_v60  ;;  %v363_v61 = vpop.permute.xlu1 %362  ;;  %v361_v62 = vpop.permute.xlu0 %360 }
  0xfb   :  { %v365_v63 = vrot.slane %v363_v61, 1  ;;  %v364_v1 = vrot.slane %v361_v62, 1 }
  0xfd   :  { %v367_v2 = vsel %vm211_vm1, %v363_v61, %v365_v63  ;;  %v366_v4 = vsel %vm211_vm1, %v361_v62, %v364_v1 }
  0xfe   :  { %374 = vst.msk [vmem:[#allocation2 + $0x67] ss:$8 sm:$0x3] %vm6517_vm0, %v367_v2  ;;  %371 = vst.msk [vmem:[#allocation2 + $0x17] ss:$8 sm:$0x3] %vm6517_vm0, %v366_v4  ;;  %v123_v6 = vpop.permute.xlu1 %122  ;;  %v121_v7 = vpop.permute.xlu0 %120 }
  0xff   :  { %v125_v8 = vrot.slane %v123_v6, 1  ;;  %v124_v9 = vrot.slane %v121_v7, 1 }
 0x101   :  { %v128_v10 = vsel %vm126_vm6, %v123_v6, %v125_v8  ;;  %v127_v11 = vsel %vm126_vm6, %v121_v7, %v124_v9  ;;  %vm1508_vm6 = vcmask 255104  }
 0x102   :  { %135 = vst.msk [vmem:[#allocation2 + $0x51] ss:$8 sm:$0x3] %vm6517_vm0, %v128_v10  ;;  %132 = vst.msk [vmem:[#allocation2 + $0x1] ss:$8 sm:$0x3] %vm6517_vm0, %v127_v11  ;;  %v140_v13 = vpop.permute.xlu1 %139  ;;  %v138_v14 = vpop.permute.xlu0 %137 }
 0x103   :  { %v142_v15 = vrot.slane %v140_v13, 1  ;;  %v141_v16 = vrot.slane %v138_v14, 1 }
 0x105   :  { %v145_v17 = vsel %vm143_vm7, %v140_v13, %v142_v15  ;;  %v144_v18 = vsel %vm143_vm7, %v138_v14, %v141_v16  ;;  %v807_v19 = vld [vmem:[#allocation2 + $0x68] sm:$0xff]  ;;  %v691_v20 = vld [vmem:[#allocation2 + $0x18] sm:$0xff]  ;;  %v690_v21 = vld [vmem:[#allocation2 + $0x10] sm:$0xff]  ;;  %vm1522_vm7 = vcmask 386304  }
 0x106   :  { %152 = vst.msk [vmem:[#allocation2 + $0x52] ss:$8 sm:$0x3] %vm6517_vm0, %v145_v17  ;;  %149 = vst.msk [vmem:[#allocation2 + $0x2] ss:$8 sm:$0x3] %vm6517_vm0, %v144_v18  ;;  %v157_v22 = vpop.permute.xlu1 %156  ;;  %848 = vmatprep.subr.mxu1 %v807_v19  ;;  %v155_v23 = vpop.permute.xlu0 %154  ;;  %750 = vmatprep.subr.mxu0 %v691_v20 }
 0x107   :  { %v806_v24 = vld [vmem:[#allocation2 + $0x60] sm:$0xff]  ;;  %v159_v25 = vrot.slane %v157_v22, 1  ;;  %v158_v26 = vrot.slane %v155_v23, 1  ;;  %751 = vmatpush1.msra.mxu0 %v690_v21 }
 0x108   :  { %849 = vmatpush1.msra.mxu1 %v806_v24 }
 0x109   :  { %v162_v27 = vsel %vm160_vm8, %v157_v22, %v159_v25  ;;  %v161_v28 = vsel %vm160_vm8, %v155_v23, %v158_v26  ;;  %vm1534_vm8 = vcmask 517504  }
 0x10a   :  { %169 = vst.msk [vmem:[#allocation2 + $0x53] ss:$8 sm:$0x3] %vm6517_vm0, %v162_v27  ;;  %166 = vst.msk [vmem:[#allocation2 + $0x3] ss:$8 sm:$0x3] %vm6517_vm0, %v161_v28  ;;  %v174_v29 = vpop.permute.xlu1 %173  ;;  %v172_v30 = vpop.permute.xlu0 %171 }
 0x10b   :  { %v176_v31 = vrot.slane %v174_v29, 1  ;;  %v175_v32 = vrot.slane %v172_v30, 1 }
 0x10d   :  { %v179_v33 = vsel %vm177_vm9, %v174_v29, %v176_v31  ;;  %v178_v34 = vsel %vm177_vm9, %v172_v30, %v175_v32  ;;  %vm1562_vm9 = vcmask 648704  }
 0x10e   :  { %186 = vst.msk [vmem:[#allocation2 + $0x54] ss:$8 sm:$0x3] %vm6517_vm0, %v179_v33  ;;  %183 = vst.msk [vmem:[#allocation2 + $0x4] ss:$8 sm:$0x3] %vm6517_vm0, %v178_v34  ;;  %v191_v35 = vpop.permute.xlu1 %190  ;;  %v189_v36 = vpop.permute.xlu0 %188 }
 0x10f   :  { %v193_v38 = vrot.slane %v191_v35, 1  ;;  %v192_v39 = vrot.slane %v189_v36, 1  ;;  %v924_v33 = vld [vmem:[%s7656_s4 + $0x8] sm:$0xff]  ;;  %v923_v34 = vld [vmem:[%s7656_s4] sm:$0xff] }
 0x111   :  { %v196_v40 = vsel %vm194_vm2, %v191_v35, %v193_v38  ;;  %v195_v41 = vsel %vm194_vm2, %v189_v36, %v192_v39  ;;  %v5720_v35 = vld [vmem:[#allocation5 + $0xe0] ss:$16 sps:$4 sm:$0xff]   ;;  %v5722_v36 = vld [vmem:[#allocation5 + $0xe4] ss:$16 sps:$4 sm:$0xff]   ;;  %vm1489_vm2 = vcmask 1043459  }
 0x112   :  { %203 = vst.msk [vmem:[#allocation2 + $0x55] ss:$8 sm:$0x3] %vm6517_vm0, %v196_v40  ;;  %200 = vst.msk [vmem:[#allocation2 + $0x5] ss:$8 sm:$0x3] %vm6517_vm0, %v195_v41  ;;  %v208_v42 = vpop.permute.xlu1 %207  ;;  %v206_v43 = vpop.permute.xlu0 %205 }
 0x113   :  { %v210_v44 = vrot.slane %v208_v42, 1  ;;  %v209_v45 = vrot.slane %v206_v43, 1  ;;  %v5725_v38 = vld [vmem:[#allocation5 + $0xc4] ss:$16 sps:$4 sm:$0xff]   ;;  %v5723_v39 = vld [vmem:[#allocation5 + $0xc0] ss:$16 sps:$4 sm:$0xff]  }
 0x114   :  { %v5728_v40 = vld [vmem:[#allocation5 + $0xa4] ss:$16 sps:$4 sm:$0xff]   ;;  %v5726_v41 = vld [vmem:[#allocation5 + $0xa0] ss:$16 sps:$4 sm:$0xff]  }
 0x115   :  { %v213_v46 = vsel %vm211_vm1, %v208_v42, %v210_v44  ;;  %v212_v47 = vsel %vm211_vm1, %v206_v43, %v209_v45  ;;  %v5731_v42 = vld [vmem:[#allocation5 + $0x84] ss:$16 sps:$4 sm:$0xff]   ;;  %v5729_v43 = vld [vmem:[#allocation5 + $0x80] ss:$16 sps:$4 sm:$0xff]   ;;  %vm1028_vm1 = vcmask 15360  }
 0x116   :  { %220 = vst.msk [vmem:[#allocation2 + $0x56] ss:$8 sm:$0x3] %vm6517_vm0, %v213_v46  ;;  %217 = vst.msk [vmem:[#allocation2 + $0x6] ss:$8 sm:$0x3] %vm6517_vm0, %v212_v47  ;;  %v225_v48 = vpop.permute.xlu1 %224  ;;  %v223_v49 = vpop.permute.xlu0 %222 }
 0x117   :  { %v227_v50 = vrot.slane %v225_v48, 1  ;;  %v226_v51 = vrot.slane %v223_v49, 1  ;;  %v5734_v44 = vld [vmem:[#allocation5 + $0x64] ss:$16 sps:$4 sm:$0xff]   ;;  %v5732_v45 = vld [vmem:[#allocation5 + $0x60] ss:$16 sps:$4 sm:$0xff]  }
 0x118   :  { %v5737_v46 = vld [vmem:[#allocation5 + $0x44] ss:$16 sps:$4 sm:$0xff]   ;;  %v5735_v47 = vld [vmem:[#allocation5 + $0x40] ss:$16 sps:$4 sm:$0xff]  }
 0x119   :  { %v230_v52 = vsel %vm228_vm3, %v225_v48, %v227_v50  ;;  %v229_v53 = vsel %vm228_vm3, %v223_v49, %v226_v51  ;;  %v5740_v48 = vld [vmem:[#allocation5 + $0x24] ss:$16 sps:$4 sm:$0xff]   ;;  %v5738_v49 = vld [vmem:[#allocation5 + $0x20] ss:$16 sps:$4 sm:$0xff]   ;;  %vm1491_vm3 = vcmask 1045509  }
 0x11a   :  { %237 = vst.msk [vmem:[#allocation2 + $0x57] ss:$8 sm:$0x3] %vm6517_vm0, %v230_v52  ;;  %234 = vst.msk [vmem:[#allocation2 + $0x7] ss:$8 sm:$0x3] %vm6517_vm0, %v229_v53 }
 0x11b   :  { %v5743_v50 = vld [vmem:[#allocation5 + $0x4] ss:$16 sps:$4 sm:$0xff]   ;;  %v5741_v51 = vld [vmem:[#allocation5] ss:$16 sps:$4 sm:$0xff]   ;;  %vm1032_vm0 = vcmask 1041408  }
 0x11c   :  { %v5746_v52 = vld [vmem:[#allocation5 + $0x1e4] ss:$16 sps:$4 sm:$0xff]   ;;  %v5744_v53 = vld [vmem:[#allocation5 + $0x1e0] ss:$16 sps:$4 sm:$0xff]  }
 0x121   :  { %v689_v55 = vld [vmem:[#allocation2 + $0x8] sm:$0xff]  ;;  %v805_v56 = vld [vmem:[#allocation2 + $0x58] sm:$0xff]  ;;  %v688_v57 = vld [vmem:[#allocation2] sm:$0xff] }
 0x122   :  { %752 = vmatprep.subr.mxu0 %v689_v55  ;;  %850 = vmatprep.subr.mxu1 %v805_v56  ;;  %v804_v58 = vld [vmem:[#allocation2 + $0x50] sm:$0xff] }
 0x123   :  { %753 = vmatpush1.msra.mxu0 %v688_v57  ;;  %851 = vmatpush1.msra.mxu1 %v804_v58  ;;  %v701_v59 = vpop.permute.xlu0 %700  ;;  %v706_v4 = vpop.permute.xlu1 %705  ;;  %v5747_v55 = vld [vmem:[#allocation5 + $0x1c0] ss:$16 sps:$4 sm:$0xff]   ;;  %v5752_v56 = vld [vmem:[#allocation5 + $0x1a4] ss:$16 sps:$4 sm:$0xff]  }
 0x124   :  { %5219 = vmatmul.mubr.msk.f32.vlgmr.msra.gmra.mxu0 %vm708_vm10, %v684_v54  ;;  %5223 = vmatmul.mubr.msk.f32.vlgmr.msra.gmra.mxu1 %vm708_vm10, %v684_v54  ;;  %v5749_v54 = vld [vmem:[#allocation5 + $0x1c4] ss:$16 sps:$4 sm:$0xff]   ;;  %v5750_v57 = vld [vmem:[#allocation5 + $0x1a0] ss:$16 sps:$4 sm:$0xff]  }
 0x125   :  { %792 = vmatprep.mubr.f32.mxu0 %v6405_v37  ;;  %890 = vmatprep.mubr.f32.mxu1 %v6405_v37  ;;  %v5755_v58 = vld [vmem:[#allocation5 + $0x184] ss:$16 sps:$4 sm:$0xff]  }
 0x126   :  { %5668 = vmatprep.subr.mxu1 %v6405_v37  ;;  %3580 = vmatprep.subr.bf16.mxu0 %v5722_v36 }
 0x127   :  { %5669 = vmatpush3.msra.mxu1 %v924_v33  ;;  %3581 = vmatpush1.bf16.msra.mxu0 %v5720_v35  ;;  %v5782_v33 = vld [vmem:[#allocation5 + $0x4e4] ss:$16 sps:$4 sm:$0xff]  }
 0x128   :  { %5220 = vmatmul.mubr.msk.f32.gmra.mxu0 %vm708_vm10, %v685_v12  ;;  %5224 = vmatmul.mubr.msk.f32.gmra.mxu1 %vm708_vm10, %v685_v12  ;;  %v5753_v12 = vld [vmem:[#allocation5 + $0x180] ss:$16 sps:$4 sm:$0xff]   ;;  %vm1574_vm10 = vcmask 779904  }
 0x129   :  { %5670 = vmatprep.subr.mxu1 %v6405_v37  ;;  %5672 = vmatprep.mubr.msk.f32.mxu1 %vm6407_vm12, %v6405_v37 }
 0x12a   :  { %5671 = vmatpush3.msra.mxu1 %v923_v34  ;;  %3582 = vmatprep.subr.bf16.mxu0 %v5725_v38  ;;  %v5780_v38 = vld [vmem:[#allocation5 + $0x4e0] ss:$16 sps:$4 sm:$0xff]  }
 0x12b   :  { %5675 = vmatprep.subr.mxu1 %v6405_v37  ;;  %3583 = vmatpush1.bf16.msra.mxu0 %v5723_v39  ;;  %v5788_v39 = vld [vmem:[#allocation5 + $0x4c4] ss:$16 sps:$4 sm:$0xff]  }
 0x12c   :  { %3584 = vmatprep.subr.bf16.mxu0 %v5728_v40  ;;  %v5786_v40 = vld [vmem:[#allocation5 + $0x4c0] ss:$16 sps:$4 sm:$0xff]  }
 0x12f   :  { %3585 = vmatpush1.bf16.msra.mxu0 %v5726_v41  ;;  %v5794_v41 = vld [vmem:[#allocation5 + $0x4a4] ss:$16 sps:$4 sm:$0xff]  }
 0x130   :  { %3586 = vmatprep.subr.bf16.mxu0 %v5731_v42  ;;  %v5792_v42 = vld [vmem:[#allocation5 + $0x4a0] ss:$16 sps:$4 sm:$0xff]  }
 0x133   :  { %3587 = vmatpush1.bf16.msra.mxu0 %v5729_v43  ;;  %v5800_v43 = vld [vmem:[#allocation5 + $0x484] ss:$16 sps:$4 sm:$0xff]  }
 0x134   :  { %3588 = vmatprep.subr.bf16.mxu0 %v5734_v44  ;;  %v5798_v44 = vld [vmem:[#allocation5 + $0x480] ss:$16 sps:$4 sm:$0xff]  }
 0x137   :  { %3589 = vmatpush1.bf16.msra.mxu0 %v5732_v45  ;;  %v5806_v45 = vld [vmem:[#allocation5 + $0x464] ss:$16 sps:$4 sm:$0xff]  }
 0x138   :  { %3590 = vmatprep.subr.bf16.mxu0 %v5737_v46  ;;  %v5804_v46 = vld [vmem:[#allocation5 + $0x460] ss:$16 sps:$4 sm:$0xff]  }
 0x13b   :  { %3591 = vmatpush1.bf16.msra.mxu0 %v5735_v47  ;;  %v5812_v47 = vld [vmem:[#allocation5 + $0x444] ss:$16 sps:$4 sm:$0xff]  }
 0x13c   :  { %3592 = vmatprep.subr.bf16.mxu0 %v5740_v48  ;;  %v5810_v48 = vld [vmem:[#allocation5 + $0x440] ss:$16 sps:$4 sm:$0xff]  }
 0x13f   :  { %3593 = vmatpush1.bf16.msra.mxu0 %v5738_v49  ;;  %v5818_v49 = vld [vmem:[#allocation5 + $0x424] ss:$16 sps:$4 sm:$0xff]  }
 0x140   :  { %3594 = vmatprep.subr.bf16.mxu0 %v5743_v50  ;;  %v5816_v50 = vld [vmem:[#allocation5 + $0x420] ss:$16 sps:$4 sm:$0xff]  }
 0x143   :  { %3595 = vmatpush1.bf16.msra.mxu0 %v5741_v51  ;;  %v5824_v51 = vld [vmem:[#allocation5 + $0x404] ss:$16 sps:$4 sm:$0xff]  }
 0x144   :  { %3596 = vmatprep.subr.bf16.mxu0 %v5746_v52  ;;  %v5822_v52 = vld [vmem:[#allocation5 + $0x400] ss:$16 sps:$4 sm:$0xff]  }
 0x147   :  { %3597 = vmatpush2.bf16.msra.mxu0 %v5744_v53  ;;  %v5830_v53 = vld [vmem:[#allocation5 + $0x5e4] ss:$16 sps:$4 sm:$0xff]  }
 0x148   :  { %3598 = vmatprep.subr.bf16.mxu0 %v5749_v54  ;;  %v5828_v54 = vld [vmem:[#allocation5 + $0x5e0] ss:$16 sps:$4 sm:$0xff]  }
 0x14b   :  { %3599 = vmatpush2.bf16.msra.mxu0 %v5747_v55  ;;  %v5836_v55 = vld [vmem:[#allocation5 + $0x5c4] ss:$16 sps:$4 sm:$0xff]  }
 0x14c   :  { %3600 = vmatprep.subr.bf16.mxu0 %v5752_v56  ;;  %v5834_v56 = vld [vmem:[#allocation5 + $0x5c0] ss:$16 sps:$4 sm:$0xff]  }
 0x14f   :  { %3601 = vmatpush2.bf16.msra.mxu0 %v5750_v57  ;;  %v5842_v57 = vld [vmem:[#allocation5 + $0x5a4] ss:$16 sps:$4 sm:$0xff]  }
 0x150   :  { %3602 = vmatprep.subr.bf16.mxu0 %v5755_v58  ;;  %v5840_v58 = vld [vmem:[#allocation5 + $0x5a0] ss:$16 sps:$4 sm:$0xff]  }
 0x153   :  { %3603 = vmatpush2.bf16.msra.mxu0 %v5753_v12  ;;  %v5848_v12 = vld [vmem:[#allocation5 + $0x584] ss:$16 sps:$4 sm:$0xff]  }
 0x1e4   :  { %v886_v60 = vpop.f32.mrf.mxu1  ;;  %v788_v61 = vpop.f32.mrf.mxu0 }
 0x1e5   :  { %v6864_v1 = vadd.f32 %v788_v61, %v701_v59  ;;  %v887_v20 = vadd.f32 %v886_v60, %v701_v59  ;;  %v5756_v60 = vld [vmem:[#allocation5 + $0x160] ss:$16 sps:$4 sm:$0xff]   ;;  %v930_v61 = vand.u32 127, %v91_v0 }
 0x1e6   :  { %v790_v62 = vpop.f32.mrf.mxu0  ;;  %v888_v63 = vpop.f32.mrf.mxu1 }
 0x1e7   :  { %v6866_v2 = vadd.f32 %v790_v62, %v701_v59  ;;  %v6869_v9 = vadd.f32 %v888_v63, %v701_v59  ;;  %v799_v15 = vmax.f32 %v6864_v1, 0.0  ;;  %v897_v30 = vmax.f32 %v887_v20, 0.0  ;;  %v5758_v59 = vld [vmem:[#allocation5 + $0x164] ss:$16 sps:$4 sm:$0xff]  }
 0x1e8   :  { %v794_v6 = vpop.f32.mrf.mxu0  ;;  %v892_v7 = vpop.f32.mrf.mxu1  ;;  %3604 = vmatprep.subr.bf16.mxu0 %v5758_v59  ;;  %v935_v63 = vadd.s32 4294967288, %v930_v61  ;;  %v6408_v20 = vmov 1983009808   ;;  %v5846_v59 = vld [vmem:[#allocation5 + $0x580] ss:$16 sps:$4 sm:$0xff]  }
 0x1e9   :  { %v800_v8 = vmax.f32 %v6866_v2, 0.0  ;;  %v6871_v10 = vadd.f32 %v892_v7, %v706_v4  ;;  %v6873_v11 = vadd.f32 %v794_v6, %v706_v4  ;;  %v898_v21 = vmax.f32 %v6869_v9, 0.0  ;;  %3605 = vmatpush2.bf16.msra.mxu0 %v5756_v60  ;;  %v5854_v60 = vld [vmem:[#allocation5 + $0x564] ss:$16 sps:$4 sm:$0xff]  }
 0x1ea   :  { %v796_v13 = vpop.f32.mrf.mxu0  ;;  %v894_v14 = vpop.f32.mrf.mxu1  ;;  %v933_v9 = vsub.s32 %v930_v61, %v6499_v3  ;;  %v5852_v61 = vld [vmem:[#allocation5 + $0x560] ss:$16 sps:$4 sm:$0xff]  }
 0x1eb   :  { %v6876_v16 = vadd.f32 %v796_v13, %v706_v4  ;;  %v6878_v17 = vadd.f32 %v894_v14, %v706_v4  ;;  %v899_v18 = vmax.f32 %v6871_v10, 0.0  ;;  %v902_v19 = vsel %vm901_vm11, %v800_v8, 0.0 }
 0x1ec   :  { %v903_v24 = vadd.f32 %v902_v19, %v799_v15  ;;  %v801_v25 = vmax.f32 %v6873_v11, 0.0  ;;  %v910_v31 = vsel %vm901_vm11, %v898_v21, 0.0  ;;  %v938_v4 = vsub.s32 %v935_v63, %v6499_v3  ;;  %v5856_v63 = vld [vmem:[#allocation5 + $0x540] ss:$16 sps:$4 sm:$0xff]  }
 0x1ed   :  { %v802_v22 = vmax.f32 %v6876_v16, 0.0  ;;  %v900_v23 = vmax.f32 %v6878_v17, 0.0  ;;  %v911_v32 = vadd.f32 %v910_v31, %v897_v30  ;;  %v6939_v31 = vld [vmem:[%s7653_s1] sm:$0xff] }
 0x1ee   :  { %904 = vadd.xlane.f32.xlu1 %v903_v24  ;;  %v5761_v24 = vld [vmem:[#allocation5 + $0x144] ss:$16 sps:$4 sm:$0xff]  }
 0x1ef   :  { %v906_v26 = vsel %vm901_vm11, %v802_v22, 0.0  ;;  %v914_v27 = vsel %vm901_vm11, %v900_v23, 0.0  ;;  %3606 = vmatprep.subr.bf16.mxu0 %v5761_v24  ;;  %vm1588_vm11 = vcmask 911104  }
 0x1f0   :  { %v907_v28 = vadd.f32 %v906_v26, %v801_v25  ;;  %v915_v29 = vadd.f32 %v914_v27, %v899_v18  ;;  %v5765_v27 = vld [vmem:[#allocation5 + $0x120] ss:$16 sps:$4 sm:$0xff]  }
 0x1f2   :  { %908 = vadd.xlane.f32.xlu0 %v907_v28  ;;  %916 = vadd.xlane.f32.xlu1 %v915_v29  ;;  %v5773_v28 = vld [vmem:[#allocation5 + $0x104] ss:$16 sps:$4 sm:$0xff]  }
 0x1f6   :  { %912 = vadd.xlane.f32.xlu0 %v911_v32 }
 0x223   :  { %1176 = vxpose.xlu0.b32.start [1/2] (short) %v897_v30, 128  ;;  %v5771_v30 = vld [vmem:[#allocation5 + $0x100] ss:$16 sps:$4 sm:$0xff]  }
 0x225   :  { %1112 = vxpose.xlu1.b32.start [1/2] (short) %v799_v15, 128 }
 0x227   :  { %1177 = vxpose.xlu0.b32.end [2/2] (short) %v899_v18, 128  ;;  %v1027_v18 = vld [vmem:[%s7657_s5] sm:$0x3] }
 0x229   :  { %1113 = vxpose.xlu1.b32.end [2/2] (short) %v801_v25, 128  ;;  %v5767_v25 = vld [vmem:[#allocation5 + $0x124] ss:$16 sps:$4 sm:$0xff]  }
 0x260   :  { %1208 = vxpose.xlu0.b32.start [1/2] (short) (narrow) %v898_v21, 72  ;;  %v1470_v21 = vunpack.c.l.s4 %v6408_v20  ;;  %v5903_v20 = vld [vmem:[#allocation5 + $0x6c] ss:$16 sps:$4 sm:$0xff]  }
 0x262   :  { %1144 = vxpose.xlu1.b32.start [1/2] (short) (narrow) %v800_v8, 72  ;;  %v1471_v26 = vunpack.c.0.s8 %v1470_v21  ;;  %v5901_v21 = vld [vmem:[#allocation5 + $0x68] ss:$16 sps:$4 sm:$0xff]  }
 0x264   :  { %1209 = vxpose.xlu0.b32.end [2/2] (short) (narrow) %v900_v23, 72  ;;  %v5759_v23 = vld [vmem:[#allocation5 + $0x140] ss:$16 sps:$4 sm:$0xff]   ;;  %v6934_v29 = vsub.s32 %v1471_v26, %v6499_v3  ;;  %v5915_v26 = vld [vmem:[#allocation5 + $0x2c] ss:$16 sps:$4 sm:$0xff]  }
 0x265   :  { %3607 = vmatpush2.bf16.msra.mxu0 %v5759_v23 }
 0x266   :  { %1145 = vxpose.xlu1.b32.end [2/2] (short) (narrow) %v802_v22, 72  ;;  %v5764_v22 = vld [vmem:[#allocation5 + $0x2e4] ss:$16 sps:$4 sm:$0xff]   ;;  %3608 = vmatprep.subr.bf16.mxu0 %v5767_v25  ;;  %v1979_v32 = vrot.slane %v6939_v31, %v6934_v29  ;;  %v5907_v25 = vld [vmem:[#allocation5 + $0x48] ss:$16 sps:$4 sm:$0xff]  }
 0x268   :  { %v1987_v34 = vcombine.high %v1979_v32, %v1979_v32  ;;  %v6943_v35 = vpack.c.bf16 %v1979_v32, %v1979_v32  ;;  %v5921_v32 = vld [vmem:[#allocation5 + $0xc] ss:$16 sps:$4 sm:$0xff]  }
 0x269   :  { %3609 = vmatpush2.bf16.msra.mxu0 %v5765_v27 }
 0x26a   :  { %3610 = vmatprep.subr.bf16.mxu0 %v5773_v28  ;;  %v6945_v36 = vpack.c.bf16 %v1987_v34, %v1987_v34 }
 0x26c   :  { %3612 = vmatprep.mubr.bf16.mxu0 %v6945_v36 }
 0x26d   :  { %3611 = vmatpush2.bf16.msra.mxu0 %v5771_v30  ;;  %v5913_v30 = vld [vmem:[#allocation5 + $0x28] ss:$16 sps:$4 sm:$0xff]  }
 0x26e   :  { %3662 = vmatprep.subr.bf16.mxu0 %v5782_v33 }
 0x270   :  { %3613 = vmatmul.mubr.bf16.vlgmr.msra.gmra.mxu0 %v6943_v35 }
 0x271   :  { %3663 = vmatpush1.bf16.msra.mxu0 %v5780_v38  ;;  %v5927_v38 = vld [vmem:[#allocation5 + $0x1ec] ss:$16 sps:$4 sm:$0xff]  }
 0x272   :  { %3664 = vmatprep.subr.bf16.mxu0 %v5788_v39 }
 0x275   :  { %3665 = vmatpush1.bf16.msra.mxu0 %v5786_v40 }
 0x276   :  { %3666 = vmatprep.subr.bf16.mxu0 %v5794_v41  ;;  %v5925_v41 = vld [vmem:[#allocation5 + $0x1e8] ss:$16 sps:$4 sm:$0xff]  }
 0x277   :  { %v905_v62 = vpop.xlane.xlu1 %904 }
 0x278   :  { %v919_v10 = vmul.f32 0.005181347, %v905_v62  ;;  %v5858_v62 = vld [vmem:[#allocation5 + $0x544] ss:$16 sps:$4 sm:$0xff]  }
 0x279   :  { %3667 = vmatpush1.bf16.msra.mxu0 %v5792_v42  ;;  %v5933_v42 = vld [vmem:[#allocation5 + $0x1cc] ss:$16 sps:$4 sm:$0xff]  }
 0x27a   :  { %v934_v14 = vrot.slane %v919_v10, %v933_v9  ;;  %3668 = vmatprep.subr.bf16.mxu0 %v5800_v43  ;;  %v1972_v43 = vcombine.high %v6939_v31, %v6939_v31  ;;  %v5945_v31 = vld [vmem:[#allocation5 + $0x18c] ss:$16 sps:$4 sm:$0xff]  }
 0x27b   :  { %v909_v1 = vpop.xlane.xlu0 %908  ;;  %v917_v7 = vpop.xlane.xlu1 %916 }
 0x27c   :  { %v920_v6 = vmul.f32 0.005181347, %v909_v1  ;;  %v922_v2 = vmul.f32 0.005181347, %v917_v7  ;;  %v5864_v1 = vld [vmem:[#allocation5 + $0x524] ss:$16 sps:$4 sm:$0xff]  }
 0x27d   :  { %3669 = vmatpush1.bf16.msra.mxu0 %v5798_v44  ;;  %v6952_v7 = vld [vmem:[%s7653_s1 + $0x8] sm:$0xff] }
 0x27e   :  { %v939_v11 = vrot.slane %v920_v6, %v938_v4  ;;  %v949_v15 = vrot.slane %v922_v2, %v938_v4  ;;  %3670 = vmatprep.subr.bf16.mxu0 %v5806_v45  ;;  %v5862_v4 = vld [vmem:[#allocation5 + $0x520] ss:$16 sps:$4 sm:$0xff]   ;;  %v5870_v6 = vld [vmem:[#allocation5 + $0x504] ss:$16 sps:$4 sm:$0xff]   ;;  %v1996_v10 = vrot.slane %v6952_v7, %v6934_v29  ;;  %v5879_v2 = vld [vmem:[#allocation5 + $0xec] ss:$16 sps:$4 sm:$0xff]  }
 0x27f   :  { %v913_v8 = vpop.xlane.xlu0 %912 }
 0x280   :  { %v921_v13 = vmul.f32 0.005181347, %v913_v8  ;;  %v941_v0 = vsel %vm940_vm13, %v939_v11, %v934_v14  ;;  %v2004_v8 = vcombine.high %v1996_v10, %v1996_v10  ;;  %v6956_v11 = vpack.c.bf16 %v1996_v10, %v1996_v10  ;;  %v5877_v14 = vld [vmem:[#allocation5 + $0xe8] ss:$16 sps:$4 sm:$0xff]   ;;  %v5776_v10 = vld [vmem:[#allocation5 + $0x2a4] ss:$16 sps:$4 sm:$0xff]  }
 0x281   :  { %3671 = vmatpush1.bf16.msra.mxu0 %v5804_v46  ;;  %v5931_v46 = vld [vmem:[#allocation5 + $0x1c8] ss:$16 sps:$4 sm:$0xff]  }
 0x282   :  { %v945_v16 = vrot.slane %v921_v13, %v933_v9  ;;  %3672 = vmatprep.subr.bf16.mxu0 %v5812_v47  ;;  %v5868_v9 = vld [vmem:[#allocation5 + $0x500] ss:$16 sps:$4 sm:$0xff]   ;;  %v6958_v13 = vpack.c.bf16 %v2004_v8, %v2004_v8  ;;  %v5939_v47 = vld [vmem:[#allocation5 + $0x1ac] ss:$16 sps:$4 sm:$0xff]  }
 0x284   :  { %v950_v17 = vsel %vm940_vm13, %v949_v15, %v945_v16  ;;  %v5885_v15 = vld [vmem:[#allocation5 + $0xcc] ss:$16 sps:$4 sm:$0xff]   ;;  %3694 = vmatprep.mubr.bf16.mxu0 %v6958_v13  ;;  %v5883_v16 = vld [vmem:[#allocation5 + $0xc8] ss:$16 sps:$4 sm:$0xff]   ;;  %vm1600_vm13 = vcmask 1042304  }
 0x285   :  { %v952_v19 = vsel %vm951_vm14, %v950_v17, %v941_v0  ;;  %3673 = vmatpush1.bf16.msra.mxu0 %v5810_v48  ;;  %v5891_v0 = vld [vmem:[#allocation5 + $0xac] ss:$16 sps:$4 sm:$0xff]   ;;  %v5889_v17 = vld [vmem:[#allocation5 + $0xa8] ss:$16 sps:$4 sm:$0xff]   ;;  %v6976_v48 = vrot.slane %v1972_v43, %v6934_v29 }
 0x286   :  { %5673 = vmatmul.mubr.msk.f32.vlgmr.msra.gmra.mxu1 %vm953_vm15, %v952_v19  ;;  %3674 = vmatprep.subr.bf16.mxu0 %v5818_v49  ;;  %v5895_v19 = vld [vmem:[#allocation5 + $0x88] ss:$16 sps:$4 sm:$0xff]  }
 0x287   :  { %5676 = vmatpush3.msk.msra.mxu1 %vm1032_vm0, %v1027_v18  ;;  %5677 = vmatprep.mubr.msk.f32.mxu1 %vm6407_vm12, %v6405_v37  ;;  %v5897_v18 = vld [vmem:[#allocation5 + $0x8c] ss:$16 sps:$4 sm:$0xff]  }
 0x288   :  { %3621 = vmatprep.subr.bf16.mxu1 %v5764_v22  ;;  %v5909_v22 = vld [vmem:[#allocation5 + $0x4c] ss:$16 sps:$4 sm:$0xff]  }
 0x289   :  { %3675 = vmatpush1.bf16.msra.mxu0 %v5816_v50 }
 0x28a   :  { %3676 = vmatprep.subr.bf16.mxu0 %v5824_v51  ;;  %v5937_v51 = vld [vmem:[#allocation5 + $0x1a8] ss:$16 sps:$4 sm:$0xff]  }
 0x28d   :  { %3677 = vmatpush1.bf16.msra.mxu0 %v5822_v52  ;;  %v1988_v52 = vcombine.high %v6976_v48, %v6976_v48 }
 0x28e   :  { %3678 = vmatprep.subr.bf16.mxu0 %v5830_v53 }
 0x291   :  { %3679 = vmatpush2.bf16.msra.mxu0 %v5828_v54 }
 0x292   :  { %3680 = vmatprep.subr.bf16.mxu0 %v5836_v55  ;;  %v5943_v55 = vld [vmem:[#allocation5 + $0x188] ss:$16 sps:$4 sm:$0xff]  }
 0x295   :  { %3681 = vmatpush2.bf16.msra.mxu0 %v5834_v56  ;;  %v5951_v56 = vld [vmem:[#allocation5 + $0x16c] ss:$16 sps:$4 sm:$0xff]  }
 0x296   :  { %3682 = vmatprep.subr.bf16.mxu0 %v5842_v57 }
 0x299   :  { %3683 = vmatpush2.bf16.msra.mxu0 %v5840_v58  ;;  %v5762_v58 = vld [vmem:[#allocation5 + $0x2e0] ss:$16 sps:$4 sm:$0xff]  }
 0x29a   :  { %3684 = vmatprep.subr.bf16.mxu0 %v5848_v12  ;;  %v6984_v12 = vpack.c.bf16 %v1988_v52, %v1988_v52  ;;  %v5807_v52 = vld [vmem:[#allocation5 + $0x3e0] ss:$16 sps:$4 sm:$0xff]  }
 0x29d   :  { %3685 = vmatpush2.bf16.msra.mxu0 %v5846_v59 }
 0x29e   :  { %3686 = vmatprep.subr.bf16.mxu0 %v5854_v60 }
 0x29f   :  { %v1192_v24 = vpop.trf.xlu0 }
 0x2a0   :  { %1266 = vst.msk [vmem:[#allocation3 + $0xc8] sm:$0xff] %vm953_vm15, %v1192_v24 }
 0x2a1   :  { %3687 = vmatpush2.bf16.msra.mxu0 %v5852_v61  ;;  %v1128_v23 = vpop.trf.xlu1  ;;  %v5770_v61 = vld [vmem:[#allocation5 + $0x2c4] ss:$16 sps:$4 sm:$0xff]  }
 0x2a2   :  { %3688 = vmatprep.subr.bf16.mxu0 %v5858_v62  ;;  %1240 = vst.msk [vmem:[#allocation3] sm:$0xff] %vm953_vm15, %v1128_v23  ;;  %v5949_v62 = vld [vmem:[#allocation5 + $0x168] ss:$16 sps:$4 sm:$0xff]  }
 0x2a3   :  { %v1193_v28 = vpop.trf.xlu0  ;;  %v5964_v23 = vld [vmem:[#allocation5 + $0x108] ss:$16 sps:$4 sm:$0xff]  }
 0x2a4   :  { %1267 = vst.msk [vmem:[#allocation3 + $0xd0] sm:$0xff] %vm953_vm15, %v1193_v28  ;;  %v5791_v28 = vld [vmem:[#allocation5 + $0x244] ss:$16 sps:$4 sm:$0xff]  }
 0x2a5   :  { %3689 = vmatpush2.bf16.msra.mxu0 %v5856_v63  ;;  %v1129_v27 = vpop.trf.xlu1 }
 0x2a6   :  { %3690 = vmatprep.subr.bf16.mxu0 %v5864_v1  ;;  %1241 = vst.msk [vmem:[#allocation3 + $0x8] sm:$0xff] %vm953_vm15, %v1129_v27 }
 0x2a7   :  { %v1194_v34 = vpop.trf.xlu0 }
 0x2a8   :  { %1268 = vst.msk [vmem:[#allocation3 + $0xd8] sm:$0xff] %vm953_vm15, %v1194_v34  ;;  %v5789_v34 = vld [vmem:[#allocation5 + $0x240] ss:$16 sps:$4 sm:$0xff]  }
 0x2a9   :  { %3691 = vmatpush2.bf16.msra.mxu0 %v5862_v4  ;;  %v1130_v33 = vpop.trf.xlu1  ;;  %v5954_v4 = vld [vmem:[#allocation5 + $0x14c] ss:$16 sps:$4 sm:$0xff]  }
 0x2aa   :  { %3692 = vmatprep.subr.bf16.mxu0 %v5870_v6  ;;  %1242 = vst.msk [vmem:[#allocation3 + $0x10] sm:$0xff] %vm953_vm15, %v1130_v33  ;;  %v5768_v6 = vld [vmem:[#allocation5 + $0x2c0] ss:$16 sps:$4 sm:$0xff]   ;;  %v5981_v33 = vld [vmem:[#allocation5 + $0x4cc] ss:$16 sps:$4 sm:$0xff]  }
 0x2ab   :  { %v1195_v40 = vpop.trf.xlu0 }
 0x2ac   :  { %1269 = vst.msk [vmem:[#allocation3 + $0xe0] sm:$0xff] %vm953_vm15, %v1195_v40 }
 0x2ad   :  { %3693 = vmatpush2.bf16.msra.mxu0 %v5868_v9  ;;  %v1131_v39 = vpop.trf.xlu1 }
 0x2ae   :  { %3744 = vmatprep.subr.bf16.mxu0 %v5879_v2  ;;  %1243 = vst.msk [vmem:[#allocation3 + $0x18] sm:$0xff] %vm953_vm15, %v1131_v39  ;;  %v5952_v2 = vld [vmem:[#allocation5 + $0x148] ss:$16 sps:$4 sm:$0xff]  }
 0x2af   :  { %v1196_v45 = vpop.trf.xlu0  ;;  %v5979_v39 = vld [vmem:[#allocation5 + $0x4c8] ss:$16 sps:$4 sm:$0xff]  }
 0x2b0   :  { %3695 = vmatmul.mubr.bf16.vlgmr.msra.gmra.mxu0 %v6956_v11  ;;  %1270 = vst.msk [vmem:[#allocation3 + $0xe8] sm:$0xff] %vm953_vm15, %v1196_v45 }
 0x2b1   :  { %3745 = vmatpush1.bf16.msra.mxu0 %v5877_v14  ;;  %3776 = vmatprep.mubr.bf16.mxu0 %v6945_v36  ;;  %v5919_v36 = vld [vmem:[#allocation5 + $0x8] ss:$16 sps:$4 sm:$0xff]   ;;  %v1132_v44 = vpop.trf.xlu1  ;;  %v5960_v14 = vld [vmem:[#allocation5 + $0x12c] ss:$16 sps:$4 sm:$0xff]  }
 0x2b2   :  { %3746 = vmatprep.subr.bf16.mxu0 %v5885_v15  ;;  %1244 = vst.msk [vmem:[#allocation3 + $0x20] sm:$0xff] %vm953_vm15, %v1132_v44  ;;  %v5774_v15 = vld [vmem:[#allocation5 + $0x2a0] ss:$16 sps:$4 sm:$0xff]   ;;  %v5803_v44 = vld [vmem:[#allocation5 + $0x204] ss:$16 sps:$4 sm:$0xff]  }
 0x2b3   :  { %v1197_v50 = vpop.trf.xlu0 }
 0x2b4   :  { %1271 = vst.msk [vmem:[#allocation3 + $0xf0] sm:$0xff] %vm953_vm15, %v1197_v50  ;;  %v5809_v50 = vld [vmem:[#allocation5 + $0x3e4] ss:$16 sps:$4 sm:$0xff]  }
 0x2b5   :  { %3747 = vmatpush1.bf16.msra.mxu0 %v5883_v16  ;;  %v1133_v49 = vpop.trf.xlu1 }
 0x2b6   :  { %3748 = vmatprep.subr.bf16.mxu0 %v5891_v0  ;;  %1245 = vst.msk [vmem:[#allocation3 + $0x28] sm:$0xff] %vm953_vm15, %v1133_v49  ;;  %v5779_v0 = vld [vmem:[#allocation5 + $0x284] ss:$16 sps:$4 sm:$0xff]  }
 0x2b7   :  { %v1198_v54 = vpop.trf.xlu0 }
 0x2b8   :  { %1272 = vst.msk [vmem:[#allocation3 + $0xf8] sm:$0xff] %vm953_vm15, %v1198_v54  ;;  %v5815_v54 = vld [vmem:[#allocation5 + $0x3c4] ss:$16 sps:$4 sm:$0xff]  }
 0x2b9   :  { %3749 = vmatpush1.bf16.msra.mxu0 %v5889_v17  ;;  %v1134_v53 = vpop.trf.xlu1  ;;  %v5958_v17 = vld [vmem:[#allocation5 + $0x128] ss:$16 sps:$4 sm:$0xff]  }
 0x2ba   :  { %3750 = vmatprep.subr.bf16.mxu0 %v5897_v18  ;;  %1246 = vst.msk [vmem:[#allocation3 + $0x30] sm:$0xff] %vm953_vm15, %v1134_v53 }
 0x2bb   :  { %v1199_v63 = vpop.trf.xlu0 }
 0x2bc   :  { %1273 = vst.msk [vmem:[#allocation3 + $0x100] sm:$0xff] %vm953_vm15, %v1199_v63  ;;  %v6011_v63 = vld [vmem:[#allocation5 + $0x42c] ss:$16 sps:$4 sm:$0xff]  }
 0x2bd   :  { %3751 = vmatpush1.bf16.msra.mxu0 %v5895_v19  ;;  %v1135_v59 = vpop.trf.xlu1  ;;  %v5966_v19 = vld [vmem:[#allocation5 + $0x10c] ss:$16 sps:$4 sm:$0xff]  }
 0x2be   :  { %3752 = vmatprep.subr.bf16.mxu0 %v5903_v20  ;;  %1247 = vst.msk [vmem:[#allocation3 + $0x38] sm:$0xff] %vm953_vm15, %v1135_v59  ;;  %v5777_v20 = vld [vmem:[#allocation5 + $0x280] ss:$16 sps:$4 sm:$0xff]  }
 0x2bf   :  { %v1200_v8 = vpop.trf.xlu0 }
 0x2c0   :  { %1274 = vst.msk [vmem:[#allocation3 + $0x108] sm:$0xff] %vm953_vm15, %v1200_v8  ;;  %v5825_v8 = vld [vmem:[#allocation5 + $0x380] ss:$16 sps:$4 sm:$0xff]  }
 0x2c1   :  { %3753 = vmatpush1.bf16.msra.mxu0 %v5901_v21  ;;  %v1136_v9 = vpop.trf.xlu1 }
 0x2c2   :  { %3754 = vmatprep.subr.bf16.mxu0 %v5909_v22  ;;  %1248 = vst.msk [vmem:[#allocation3 + $0x40] sm:$0xff] %vm953_vm15, %v1136_v9  ;;  %v5785_v22 = vld [vmem:[#allocation5 + $0x264] ss:$16 sps:$4 sm:$0xff]   ;;  %v6009_v9 = vld [vmem:[#allocation5 + $0x428] ss:$16 sps:$4 sm:$0xff]  }
 0x2c3   :  { %v1201_v18 = vpop.trf.xlu0 }
 0x2c4   :  { %1275 = vst.msk [vmem:[#allocation3 + $0x110] sm:$0xff] %vm953_vm15, %v1201_v18  ;;  %v5831_v18 = vld [vmem:[#allocation5 + $0x360] ss:$16 sps:$4 sm:$0xff]  }
 0x2c5   :  { %3755 = vmatpush1.bf16.msra.mxu0 %v5907_v25  ;;  %v1137_v16 = vpop.trf.xlu1  ;;  %v5975_v25 = vld [vmem:[#allocation5 + $0x4ec] ss:$16 sps:$4 sm:$0xff]  }
 0x2c6   :  { %3756 = vmatprep.subr.bf16.mxu0 %v5915_v26  ;;  %1249 = vst.msk [vmem:[#allocation3 + $0x48] sm:$0xff] %vm953_vm15, %v1137_v16  ;;  %v5783_v26 = vld [vmem:[#allocation5 + $0x260] ss:$16 sps:$4 sm:$0xff]   ;;  %v6015_v16 = vld [vmem:[#allocation5 + $0x408] ss:$16 sps:$4 sm:$0xff]  }
 0x2c7   :  { %v1202_v24 = vpop.trf.xlu0 }
 0x2c8   :  { %1276 = vst.msk [vmem:[#allocation3 + $0x118] sm:$0xff] %vm953_vm15, %v1202_v24  ;;  %v5837_v24 = vld [vmem:[#allocation5 + $0x340] ss:$16 sps:$4 sm:$0xff]  }
 0x2c9   :  { %3757 = vmatpush1.bf16.msra.mxu0 %v5913_v30  ;;  %v1138_v21 = vpop.trf.xlu1  ;;  %v5973_v30 = vld [vmem:[#allocation5 + $0x4e8] ss:$16 sps:$4 sm:$0xff]  }
 0x2ca   :  { %3758 = vmatprep.subr.bf16.mxu0 %v5921_v32  ;;  %1250 = vst.msk [vmem:[#allocation3 + $0x50] sm:$0xff] %vm953_vm15, %v1138_v21  ;;  %v6021_v21 = vld [vmem:[#allocation5 + $0x5e8] ss:$16 sps:$4 sm:$0xff]  }
 0x2cb   :  { %v1203_v32 = vpop.trf.xlu0 }
 0x2cc   :  { %1277 = vst.msk [vmem:[#allocation3 + $0x120] sm:$0xff] %vm953_vm15, %v1203_v32  ;;  %v6035_v32 = vld [vmem:[#allocation5 + $0x5ac] ss:$16 sps:$4 sm:$0xff]  }
 0x2cd   :  { %3759 = vmatpush1.bf16.msra.mxu0 %v5919_v36  ;;  %v1139_v27 = vpop.trf.xlu1 }
 0x2ce   :  { %3760 = vmatprep.subr.bf16.mxu0 %v5927_v38  ;;  %1251 = vst.msk [vmem:[#allocation3 + $0x58] sm:$0xff] %vm953_vm15, %v1139_v27  ;;  %v5797_v38 = vld [vmem:[#allocation5 + $0x224] ss:$16 sps:$4 sm:$0xff]  }
 0x2cf   :  { %v1204_v40 = vpop.trf.xlu0  ;;  %v5845_v27 = vld [vmem:[#allocation5 + $0x324] ss:$16 sps:$4 sm:$0xff]  }
 0x2d0   :  { %1278 = vst.msk [vmem:[#allocation3 + $0x128] sm:$0xff] %vm953_vm15, %v1204_v40  ;;  %v6041_v40 = vld [vmem:[#allocation5 + $0x58c] ss:$16 sps:$4 sm:$0xff]  }
 0x2d1   :  { %3761 = vmatpush2.bf16.msra.mxu0 %v5925_v41  ;;  %v1140_v36 = vpop.trf.xlu1  ;;  %v5987_v41 = vld [vmem:[#allocation5 + $0x4ac] ss:$16 sps:$4 sm:$0xff]  }
 0x2d2   :  { %3762 = vmatprep.subr.bf16.mxu0 %v5933_v42  ;;  %1252 = vst.msk [vmem:[#allocation3 + $0x60] sm:$0xff] %vm953_vm15, %v1140_v36  ;;  %v5795_v42 = vld [vmem:[#allocation5 + $0x220] ss:$16 sps:$4 sm:$0xff]  }
 0x2d3   :  { %v1205_v45 = vpop.trf.xlu0 }
 0x2d4   :  { %1279 = vst.msk [vmem:[#allocation3 + $0x130] sm:$0xff] %vm953_vm15, %v1205_v45 }
 0x2d5   :  { %3763 = vmatpush2.bf16.msra.mxu0 %v5931_v46  ;;  %v1141_v43 = vpop.trf.xlu1  ;;  %v5993_v46 = vld [vmem:[#allocation5 + $0x48c] ss:$16 sps:$4 sm:$0xff]  }
 0x2d6   :  { %3764 = vmatprep.subr.bf16.mxu0 %v5939_v47  ;;  %1253 = vst.msk [vmem:[#allocation3 + $0x68] sm:$0xff] %vm953_vm15, %v1141_v43  ;;  %v5801_v47 = vld [vmem:[#allocation5 + $0x200] ss:$16 sps:$4 sm:$0xff]  }
 0x2d9   :  { %3765 = vmatpush2.bf16.msra.mxu0 %v5937_v51  ;;  %v1142_v49 = vpop.trf.xlu1  ;;  %v1206_v51 = vpop.trf.xlu0 }
 0x2da   :  { %3766 = vmatprep.subr.bf16.mxu0 %v5945_v31  ;;  %1254 = vst.msk [vmem:[#allocation3 + $0x70] sm:$0xff] %vm953_vm15, %v1142_v49  ;;  %1280 = vst.msk [vmem:[#allocation3 + $0x138] sm:$0xff] %vm953_vm15, %v1206_v51  ;;  %v5999_v31 = vld [vmem:[#allocation5 + $0x46c] ss:$16 sps:$4 sm:$0xff]   ;;  %v5859_v49 = vld [vmem:[#allocation5 + $0x6e0] ss:$16 sps:$4 sm:$0xff]  }
 0x2db   :  { %v5867_v51 = vld [vmem:[#allocation5 + $0x6c4] ss:$16 sps:$4 sm:$0xff]  }
 0x2dd   :  { %3767 = vmatpush2.bf16.msra.mxu0 %v5943_v55  ;;  %v1143_v53 = vpop.trf.xlu1  ;;  %v5997_v55 = vld [vmem:[#allocation5 + $0x468] ss:$16 sps:$4 sm:$0xff]  }
 0x2de   :  { %3768 = vmatprep.subr.bf16.mxu0 %v5951_v56  ;;  %1255 = vst.msk [vmem:[#allocation3 + $0x78] sm:$0xff] %vm953_vm15, %v1143_v53  ;;  %v1207_v56 = vpop.trf.xlu0  ;;  %v6050_v53 = vld [vmem:[#allocation5 + $0x54c] ss:$16 sps:$4 sm:$0xff]  }
 0x2df   :  { %1281 = vst.msk [vmem:[#allocation3 + $0x140] sm:$0xff] %vm953_vm15, %v1207_v56  ;;  %v5871_v56 = vld [vmem:[#allocation5 + $0x6a0] ss:$16 sps:$4 sm:$0xff]  }
 0x2e1   :  { %3769 = vmatpush2.bf16.msra.mxu0 %v5949_v62  ;;  %v1160_v59 = vpop.trf.xlu1 }
 0x2e2   :  { %3770 = vmatprep.subr.bf16.mxu0 %v5954_v4  ;;  %1256 = vst.msk [vmem:[#allocation3 + $0x80] sm:$0xff] %vm953_vm15, %v1160_v59  ;;  %v1224_v62 = vpop.trf.xlu0  ;;  %v5882_v59 = vld [vmem:[#allocation5 + $0x664] ss:$16 sps:$4 sm:$0xff]  }
 0x2e3   :  { %1282 = vst.msk [vmem:[#allocation3 + $0x148] sm:$0xff] %vm953_vm15, %v1224_v62  ;;  %v5880_v62 = vld [vmem:[#allocation5 + $0x660] ss:$16 sps:$4 sm:$0xff]  }
 0x2e5   :  { %3771 = vmatpush2.bf16.msra.mxu0 %v5952_v2  ;;  %v1161_v4 = vpop.trf.xlu1  ;;  %v6017_v2 = vld [vmem:[#allocation5 + $0x40c] ss:$16 sps:$4 sm:$0xff]  }
 0x2e6   :  { %3772 = vmatprep.subr.bf16.mxu0 %v5960_v14  ;;  %1257 = vst.msk [vmem:[#allocation3 + $0x88] sm:$0xff] %vm953_vm15, %v1161_v4  ;;  %v6060_v4 = vld [vmem:[#allocation5 + $0x508] ss:$16 sps:$4 sm:$0xff]  }
 0x2e9   :  { %3773 = vmatpush2.bf16.msra.mxu0 %v5958_v17  ;;  %v1162_v14 = vpop.trf.xlu1  ;;  %v6023_v17 = vld [vmem:[#allocation5 + $0x5ec] ss:$16 sps:$4 sm:$0xff]  }
 0x2ea   :  { %3774 = vmatprep.subr.bf16.mxu0 %v5966_v19  ;;  %1258 = vst.msk [vmem:[#allocation3 + $0x90] sm:$0xff] %vm953_vm15, %v1162_v14  ;;  %v5906_v14 = vld [vmem:[#allocation5 + $0x7e4] ss:$16 sps:$4 sm:$0xff]  }
 0x2ed   :  { %3775 = vmatpush2.bf16.msra.mxu0 %v5964_v23  ;;  %v1163_v19 = vpop.trf.xlu1  ;;  %v6029_v23 = vld [vmem:[#allocation5 + $0x5cc] ss:$16 sps:$4 sm:$0xff]  }
 0x2ee   :  { %3826 = vmatprep.subr.bf16.mxu0 %v5975_v25  ;;  %1259 = vst.msk [vmem:[#allocation3 + $0x98] sm:$0xff] %vm953_vm15, %v1163_v19  ;;  %v1989_v25 = vcombine.high %v6952_v7, %v6952_v7  ;;  %v5851_v7 = vld [vmem:[#allocation5 + $0x304] ss:$16 sps:$4 sm:$0xff]   ;;  %v5922_v19 = vld [vmem:[#allocation5 + $0x780] ss:$16 sps:$4 sm:$0xff]  }
 0x2f0   :  { %3777 = vmatmul.mubr.bf16.vlgmr.msra.gmra.mxu0 %v6943_v35  ;;  %v5985_v35 = vld [vmem:[#allocation5 + $0x4a8] ss:$16 sps:$4 sm:$0xff]  }
 0x2f1   :  { %3827 = vmatpush1.bf16.msra.mxu0 %v5973_v30  ;;  %3858 = vmatprep.mubr.bf16.mxu0 %v6958_v13  ;;  %v5991_v13 = vld [vmem:[#allocation5 + $0x488] ss:$16 sps:$4 sm:$0xff]  }
 0x2f2   :  { %3828 = vmatprep.subr.bf16.mxu0 %v5981_v33  ;;  %v5843_v33 = vld [vmem:[#allocation5 + $0x320] ss:$16 sps:$4 sm:$0xff]  }
 0x2f5   :  { %3829 = vmatpush1.bf16.msra.mxu0 %v5979_v39 }
 0x2f6   :  { %3830 = vmatprep.subr.bf16.mxu0 %v5987_v41  ;;  %v5849_v41 = vld [vmem:[#allocation5 + $0x300] ss:$16 sps:$4 sm:$0xff]  }
 0x2f9   :  { %3831 = vmatpush1.bf16.msra.mxu0 %v5985_v35  ;;  %v6039_v35 = vld [vmem:[#allocation5 + $0x588] ss:$16 sps:$4 sm:$0xff]  }
 0x2fa   :  { %3832 = vmatprep.subr.bf16.mxu0 %v5993_v46  ;;  %v6047_v46 = vld [vmem:[#allocation5 + $0x56c] ss:$16 sps:$4 sm:$0xff]  }
 0x2fd   :  { %3833 = vmatpush1.bf16.msra.mxu0 %v5991_v13 }
 0x2fe   :  { %3834 = vmatprep.subr.bf16.mxu0 %v5999_v31  ;;  %v6045_v31 = vld [vmem:[#allocation5 + $0x568] ss:$16 sps:$4 sm:$0xff]  }
 0x301   :  { %3835 = vmatpush1.bf16.msra.mxu0 %v5997_v55  ;;  %v6048_v55 = vld [vmem:[#allocation5 + $0x548] ss:$16 sps:$4 sm:$0xff]  }
 0x346   :  { %v1022_v57 = vpop.f32.mrf.mxu1 }
 0x347   :  { %v1026_v60 = vmax.f32 %v1022_v57, 0.0  ;;  %v6005_v57 = vld [vmem:[#allocation5 + $0x44c] ss:$16 sps:$4 sm:$0xff]  }
 0x348   :  { %v5674_v1 = vpop.f32.mrf.mxu1  ;;  %3836 = vmatprep.subr.bf16.mxu0 %v6005_v57  ;;  %v5876_v57 = vld [vmem:[#allocation5 + $0x684] ss:$16 sps:$4 sm:$0xff]  }
 0x349   :  { %5678 = vmatmul.mubr.msk.f32.vlgmr.msra.gmra.mxu1 %vm1028_vm1, %v1026_v60  ;;  %v5821_v60 = vld [vmem:[#allocation5 + $0x3a4] ss:$16 sps:$4 sm:$0xff]   ;;  %v5819_v1 = vld [vmem:[#allocation5 + $0x3a0] ss:$16 sps:$4 sm:$0xff]  }
 0x34a   :  { %3622 = vmatpush1.bf16.msra.mxu1 %v5762_v58  ;;  %3653 = vmatprep.mubr.bf16.mxu1 %v6984_v12  ;;  %v5813_v58 = vld [vmem:[#allocation5 + $0x3c0] ss:$16 sps:$4 sm:$0xff]  }
 0x34b   :  { %3623 = vmatprep.subr.bf16.mxu1 %v5770_v61  ;;  %v6003_v61 = vld [vmem:[#allocation5 + $0x448] ss:$16 sps:$4 sm:$0xff]  }
 0x34c   :  { %3837 = vmatpush1.bf16.msra.mxu0 %v6003_v61  ;;  %v6054_v61 = vld [vmem:[#allocation5 + $0x528] ss:$16 sps:$4 sm:$0xff]  }
 0x34d   :  { %3838 = vmatprep.subr.bf16.mxu0 %v6011_v63  ;;  %v5888_v63 = vld [vmem:[#allocation5 + $0x644] ss:$16 sps:$4 sm:$0xff]  }
 0x34e   :  { %3624 = vmatpush1.bf16.msra.mxu1 %v5768_v6  ;;  %v5827_v6 = vld [vmem:[#allocation5 + $0x384] ss:$16 sps:$4 sm:$0xff]  }
 0x34f   :  { %3625 = vmatprep.subr.bf16.mxu1 %v5776_v10  ;;  %v1225_v10 = vpop.trf.xlu0 }
 0x350   :  { %1283 = vst.msk [vmem:[#allocation3 + $0x150] sm:$0xff] %vm953_vm15, %v1225_v10  ;;  %3839 = vmatpush1.bf16.msra.mxu0 %v6009_v9  ;;  %v5894_v9 = vld [vmem:[#allocation5 + $0x624] ss:$16 sps:$4 sm:$0xff]   ;;  %v5892_v10 = vld [vmem:[#allocation5 + $0x620] ss:$16 sps:$4 sm:$0xff]  }
 0x351   :  { %3840 = vmatprep.subr.bf16.mxu0 %v6017_v2  ;;  %v5900_v2 = vld [vmem:[#allocation5 + $0x604] ss:$16 sps:$4 sm:$0xff]  }
 0x352   :  { %3626 = vmatpush1.bf16.msra.mxu1 %v5774_v15  ;;  %v5833_v15 = vld [vmem:[#allocation5 + $0x364] ss:$16 sps:$4 sm:$0xff]  }
 0x353   :  { %3627 = vmatprep.subr.bf16.mxu1 %v5779_v0  ;;  %v1226_v0 = vpop.trf.xlu0 }
 0x354   :  { %1284 = vst.msk [vmem:[#allocation3 + $0x158] sm:$0xff] %vm953_vm15, %v1226_v0  ;;  %3841 = vmatpush1.bf16.msra.mxu0 %v6015_v16  ;;  %v5912_v16 = vld [vmem:[#allocation5 + $0x7c4] ss:$16 sps:$4 sm:$0xff]   ;;  %v5910_v0 = vld [vmem:[#allocation5 + $0x7c0] ss:$16 sps:$4 sm:$0xff]  }
 0x355   :  { %3842 = vmatprep.subr.bf16.mxu0 %v6023_v17  ;;  %v5918_v17 = vld [vmem:[#allocation5 + $0x7a4] ss:$16 sps:$4 sm:$0xff]  }
 0x356   :  { %3628 = vmatpush1.bf16.msra.mxu1 %v5777_v20  ;;  %v5839_v20 = vld [vmem:[#allocation5 + $0x344] ss:$16 sps:$4 sm:$0xff]  }
 0x357   :  { %3629 = vmatprep.subr.bf16.mxu1 %v5785_v22  ;;  %v1227_v22 = vpop.trf.xlu0 }
 0x358   :  { %1285 = vst.msk [vmem:[#allocation3 + $0x160] sm:$0xff] %vm953_vm15, %v1227_v22  ;;  %3843 = vmatpush2.bf16.msra.mxu0 %v6021_v21  ;;  %v5928_v21 = vld [vmem:[#allocation5 + $0x760] ss:$16 sps:$4 sm:$0xff]   ;;  %v5936_v22 = vld [vmem:[#allocation5 + $0x744] ss:$16 sps:$4 sm:$0xff]  }
 0x359   :  { %3844 = vmatprep.subr.bf16.mxu0 %v6029_v23  ;;  %v5934_v23 = vld [vmem:[#allocation5 + $0x740] ss:$16 sps:$4 sm:$0xff]  }
 0x35a   :  { %3630 = vmatpush1.bf16.msra.mxu1 %v5783_v26  ;;  %v1164_v26 = vpop.trf.xlu1 }
 0x35b   :  { %3631 = vmatprep.subr.bf16.mxu1 %v5791_v28  ;;  %v6027_v28 = vld [vmem:[#allocation5 + $0x5c8] ss:$16 sps:$4 sm:$0xff]   ;;  %1260 = vst.msk [vmem:[#allocation3 + $0xa0] sm:$0xff] %vm953_vm15, %v1164_v26  ;;  %v1228_v30 = vpop.trf.xlu0  ;;  %v5948_v26 = vld [vmem:[#allocation5 + $0x704] ss:$16 sps:$4 sm:$0xff]  }
 0x35c   :  { %1286 = vst.msk [vmem:[#allocation3 + $0x168] sm:$0xff] %vm953_vm15, %v1228_v30  ;;  %3845 = vmatpush2.bf16.msra.mxu0 %v6027_v28  ;;  %v5957_v28 = vld [vmem:[#allocation5 + $0x2ec] ss:$16 sps:$4 sm:$0xff]  }
 0x35d   :  { %3846 = vmatprep.subr.bf16.mxu0 %v6035_v32  ;;  %v5955_v32 = vld [vmem:[#allocation5 + $0x2e8] ss:$16 sps:$4 sm:$0xff]  }
 0x35e   :  { %3632 = vmatpush1.bf16.msra.mxu1 %v5789_v34  ;;  %v7020_v34 = vrot.slane %v1989_v25, %v6934_v29  ;;  %v1165_v36 = vpop.trf.xlu1  ;;  %v5940_v25 = vld [vmem:[#allocation5 + $0x720] ss:$16 sps:$4 sm:$0xff]  }
 0x35f   :  { %3633 = vmatprep.subr.bf16.mxu1 %v5797_v38  ;;  %v6033_v38 = vld [vmem:[#allocation5 + $0x5a8] ss:$16 sps:$4 sm:$0xff]   ;;  %1261 = vst.msk [vmem:[#allocation3 + $0xa8] sm:$0xff] %vm953_vm15, %v1165_v36  ;;  %v1229_v39 = vpop.trf.xlu0 }
 0x360   :  { %1287 = vst.msk [vmem:[#allocation3 + $0x170] sm:$0xff] %vm953_vm15, %v1229_v39  ;;  %3847 = vmatpush2.bf16.msra.mxu0 %v6033_v38  ;;  %v7041_v30 = vpack.c.bf16 %v7020_v34, %v7020_v34  ;;  %v5961_v36 = vld [vmem:[#allocation5 + $0x2c8] ss:$16 sps:$4 sm:$0xff]   ;;  %v7045_v38 = vpop.f32.mrf.mxu0 }
 0x361   :  { %3848 = vmatprep.subr.bf16.mxu0 %v6041_v40  ;;  %v5967_v40 = vld [vmem:[#allocation5 + $0x2a8] ss:$16 sps:$4 sm:$0xff]  }
 0x362   :  { %3634 = vmatpush1.bf16.msra.mxu1 %v5795_v42  ;;  %v2005_v42 = vcombine.high %v7020_v34, %v7020_v34  ;;  %v1166_v43 = vpop.trf.xlu1  ;;  %v7047_v39 = vpop.f32.mrf.mxu0  ;;  %v5972_v34 = vld [vmem:[#allocation5 + $0x28c] ss:$16 sps:$4 sm:$0xff]  }
 0x363   :  { %3635 = vmatprep.subr.bf16.mxu1 %v5803_v44  ;;  %v5861_v44 = vld [vmem:[#allocation5 + $0x6e4] ss:$16 sps:$4 sm:$0xff]   ;;  %1262 = vst.msk [vmem:[#allocation3 + $0xb0] sm:$0xff] %vm953_vm15, %v1166_v43  ;;  %v1230_v45 = vpop.trf.xlu0  ;;  %v5970_v43 = vld [vmem:[#allocation5 + $0x288] ss:$16 sps:$4 sm:$0xff]  }
 0x364   :  { %1288 = vst.msk [vmem:[#allocation3 + $0x178] sm:$0xff] %vm953_vm15, %v1230_v45  ;;  %3849 = vmatpush2.bf16.msra.mxu0 %v6039_v35  ;;  %v5976_v35 = vld [vmem:[#allocation5 + $0x268] ss:$16 sps:$4 sm:$0xff]  }
 0x365   :  { %3850 = vmatprep.subr.bf16.mxu0 %v6047_v46  ;;  %v5982_v45 = vld [vmem:[#allocation5 + $0x248] ss:$16 sps:$4 sm:$0xff]  }
 0x366   :  { %3636 = vmatpush1.bf16.msra.mxu1 %v5801_v47  ;;  %v7030_v47 = vpack.c.bf16 %v6976_v48, %v6976_v48  ;;  %v1167_v13 = vpop.trf.xlu1  ;;  %v5865_v48 = vld [vmem:[#allocation5 + $0x6c0] ss:$16 sps:$4 sm:$0xff]  }
 0x367   :  { %3637 = vmatprep.subr.bf16.mxu1 %v5809_v50  ;;  %v7032_v50 = vpack.c.bf16 %v2005_v42, %v2005_v42  ;;  %1263 = vst.msk [vmem:[#allocation3 + $0xb8] sm:$0xff] %vm953_vm15, %v1167_v13 }
 0x368   :  { %3851 = vmatpush2.bf16.msra.mxu0 %v6045_v31 }
 0x369   :  { %3852 = vmatprep.subr.bf16.mxu0 %v6050_v53 }
 0x36a   :  { %3638 = vmatpush2.bf16.msra.mxu1 %v5807_v52  ;;  %v1231_v52 = vpop.trf.xlu0 }
 0x36b   :  { %3639 = vmatprep.subr.bf16.mxu1 %v5815_v54  ;;  %1289 = vst.msk [vmem:[#allocation3 + $0x180] sm:$0xff] %vm953_vm15, %v1231_v52  ;;  %v5873_v54 = vld [vmem:[#allocation5 + $0x6a4] ss:$16 sps:$4 sm:$0xff]   ;;  %v5996_v52 = vld [vmem:[#allocation5 + $0x20c] ss:$16 sps:$4 sm:$0xff]  }
 0x36c   :  { %3853 = vmatpush2.bf16.msra.mxu0 %v6048_v55  ;;  %v6000_v55 = vld [vmem:[#allocation5 + $0x3e8] ss:$16 sps:$4 sm:$0xff]  }
 0x36e   :  { %3640 = vmatpush2.bf16.msra.mxu1 %v5813_v58  ;;  %v5874_v58 = vld [vmem:[#allocation5 + $0x680] ss:$16 sps:$4 sm:$0xff]  }
 0x36f   :  { %3641 = vmatprep.subr.bf16.mxu1 %v5821_v60  ;;  %v6056_v60 = vld [vmem:[#allocation5 + $0x52c] ss:$16 sps:$4 sm:$0xff]  }
 0x370   :  { %3854 = vmatprep.subr.bf16.mxu0 %v6056_v60  ;;  %v6020_v60 = vld [vmem:[#allocation5 + $0x38c] ss:$16 sps:$4 sm:$0xff]  }
 0x371   :  { %3855 = vmatpush2.bf16.msra.mxu0 %v6054_v61  ;;  %v6018_v61 = vld [vmem:[#allocation5 + $0x388] ss:$16 sps:$4 sm:$0xff]  }
 0x372   :  { %3642 = vmatpush2.bf16.msra.mxu1 %v5819_v1  ;;  %v6062_v1 = vld [vmem:[#allocation5 + $0x50c] ss:$16 sps:$4 sm:$0xff]  }
 0x373   :  { %3643 = vmatprep.subr.bf16.mxu1 %v5827_v6  ;;  %3856 = vmatprep.subr.bf16.mxu0 %v6062_v1  ;;  %v5886_v6 = vld [vmem:[#allocation5 + $0x640] ss:$16 sps:$4 sm:$0xff]   ;;  %v6032_v1 = vld [vmem:[#allocation5 + $0x34c] ss:$16 sps:$4 sm:$0xff]  }
 0x375   :  { %3857 = vmatpush2.bf16.msra.mxu0 %v6060_v4  ;;  %v6030_v4 = vld [vmem:[#allocation5 + $0x348] ss:$16 sps:$4 sm:$0xff]  }
 0x376   :  { %3644 = vmatpush2.bf16.msra.mxu1 %v5825_v8  ;;  %v5898_v8 = vld [vmem:[#allocation5 + $0x600] ss:$16 sps:$4 sm:$0xff]  }
 0x377   :  { %3645 = vmatprep.subr.bf16.mxu1 %v5833_v15  ;;  %v5904_v15 = vld [vmem:[#allocation5 + $0x7e0] ss:$16 sps:$4 sm:$0xff]  }
 0x378   :  { %3859 = vmatmul.mubr.bf16.vlgmr.msra.gmra.mxu0 %v6956_v11  ;;  %v5924_v11 = vld [vmem:[#allocation5 + $0x784] ss:$16 sps:$4 sm:$0xff]  }
 0x37a   :  { %3646 = vmatpush2.bf16.msra.mxu1 %v5831_v18  ;;  %v5916_v18 = vld [vmem:[#allocation5 + $0x7a0] ss:$16 sps:$4 sm:$0xff]  }
 0x37b   :  { %3647 = vmatprep.subr.bf16.mxu1 %v5839_v20  ;;  %v5930_v20 = vld [vmem:[#allocation5 + $0x764] ss:$16 sps:$4 sm:$0xff]  }
 0x37e   :  { %3648 = vmatpush2.bf16.msra.mxu1 %v5837_v24  ;;  %v5942_v24 = vld [vmem:[#allocation5 + $0x724] ss:$16 sps:$4 sm:$0xff]  }
 0x37f   :  { %3649 = vmatprep.subr.bf16.mxu1 %v5845_v27  ;;  %v5946_v27 = vld [vmem:[#allocation5 + $0x700] ss:$16 sps:$4 sm:$0xff]  }
 0x382   :  { %3650 = vmatpush2.bf16.msra.mxu1 %v5843_v33  ;;  %v5963_v33 = vld [vmem:[#allocation5 + $0x2cc] ss:$16 sps:$4 sm:$0xff]  }
 0x383   :  { %3651 = vmatprep.subr.bf16.mxu1 %v5851_v7  ;;  %v5969_v7 = vld [vmem:[#allocation5 + $0x2ac] ss:$16 sps:$4 sm:$0xff]  }
 0x386   :  { %3652 = vmatpush2.bf16.msra.mxu1 %v5849_v41  ;;  %v3618_v41 = vpop.f32.mrf.mxu0 }
 0x387   :  { %3703 = vmatprep.subr.bf16.mxu1 %v5861_v44  ;;  %v5978_v44 = vld [vmem:[#allocation5 + $0x26c] ss:$16 sps:$4 sm:$0xff]  }
 0x388   :  { %v3619_v42 = vpop.f32.mrf.mxu0  ;;  %v1311_v41 = vld [vmem:[#allocation3 + $0x61] ss:$6 sm:$0xff] }
 0x389   :  { %3654 = vmatmul.mubr.bf16.vlgmr.msra.gmra.mxu1 %v7030_v47 }
 0x38a   :  { %3704 = vmatpush1.bf16.msra.mxu1 %v5859_v49  ;;  %3735 = vmatprep.mubr.bf16.mxu1 %v7032_v50  ;;  %v7049_v46 = vpop.f32.mrf.mxu0  ;;  %v5990_v49 = vld [vmem:[#allocation5 + $0x22c] ss:$16 sps:$4 sm:$0xff]  }
 0x38b   :  { %3705 = vmatprep.subr.bf16.mxu1 %v5867_v51  ;;  %v5988_v51 = vld [vmem:[#allocation5 + $0x228] ss:$16 sps:$4 sm:$0xff]  }
 0x38c   :  { %v7051_v13 = vpop.f32.mrf.mxu0 }
 0x38e   :  { %3706 = vmatpush1.bf16.msra.mxu1 %v5865_v48  ;;  %v3700_v31 = vpop.f32.mrf.mxu0  ;;  %v5994_v48 = vld [vmem:[#allocation5 + $0x208] ss:$16 sps:$4 sm:$0xff]  }
 0x38f   :  { %3707 = vmatprep.subr.bf16.mxu1 %v5873_v54  ;;  %v6002_v54 = vld [vmem:[#allocation5 + $0x3ec] ss:$16 sps:$4 sm:$0xff]  }
 0x390   :  { %v3701_v53 = vpop.f32.mrf.mxu0  ;;  %v1305_v31 = vld [vmem:[#allocation3 + $0x158] ss:$6 sm:$0xff] }
 0x391   :  { %v1321_v53 = vld [vmem:[#allocation3 + $0x159] ss:$6 sm:$0xff] }
 0x392   :  { %3708 = vmatpush1.bf16.msra.mxu1 %v5871_v56  ;;  %v6008_v56 = vld [vmem:[#allocation5 + $0x3cc] ss:$16 sps:$4 sm:$0xff]  }
 0x393   :  { %3709 = vmatprep.subr.bf16.mxu1 %v5876_v57  ;;  %v6006_v57 = vld [vmem:[#allocation5 + $0x3c8] ss:$16 sps:$4 sm:$0xff]  }
 0x396   :  { %3710 = vmatpush1.bf16.msra.mxu1 %v5874_v58  ;;  %v6014_v58 = vld [vmem:[#allocation5 + $0x3ac] ss:$16 sps:$4 sm:$0xff]  }
 0x397   :  { %3711 = vmatprep.subr.bf16.mxu1 %v5882_v59  ;;  %v6012_v59 = vld [vmem:[#allocation5 + $0x3a8] ss:$16 sps:$4 sm:$0xff]  }
 0x39a   :  { %3712 = vmatpush1.bf16.msra.mxu1 %v5880_v62  ;;  %v6026_v62 = vld [vmem:[#allocation5 + $0x36c] ss:$16 sps:$4 sm:$0xff]  }
 0x39b   :  { %3713 = vmatprep.subr.bf16.mxu1 %v5888_v63  ;;  %v6024_v63 = vld [vmem:[#allocation5 + $0x368] ss:$16 sps:$4 sm:$0xff]  }
 0x39e   :  { %3714 = vmatpush1.bf16.msra.mxu1 %v5886_v6  ;;  %v6038_v6 = vld [vmem:[#allocation5 + $0x32c] ss:$16 sps:$4 sm:$0xff]  }
 0x39f   :  { %3715 = vmatprep.subr.bf16.mxu1 %v5894_v9  ;;  %v6036_v9 = vld [vmem:[#allocation5 + $0x328] ss:$16 sps:$4 sm:$0xff]  }
 0x3a2   :  { %3716 = vmatpush1.bf16.msra.mxu1 %v5892_v10  ;;  %v6044_v10 = vld [vmem:[#allocation5 + $0x30c] ss:$16 sps:$4 sm:$0xff]  }
 0x3a3   :  { %3717 = vmatprep.subr.bf16.mxu1 %v5900_v2  ;;  %v6042_v2 = vld [vmem:[#allocation5 + $0x308] ss:$16 sps:$4 sm:$0xff]  }
 0x3a6   :  { %3718 = vmatpush1.bf16.msra.mxu1 %v5898_v8  ;;  %v6053_v8 = vld [vmem:[#allocation5 + $0x6ec] ss:$16 sps:$4 sm:$0xff]  }
 0x3a7   :  { %3719 = vmatprep.subr.bf16.mxu1 %v5906_v14  ;;  %v6051_v14 = vld [vmem:[#allocation5 + $0x6e8] ss:$16 sps:$4 sm:$0xff]  }
 0x3aa   :  { %3720 = vmatpush2.bf16.msra.mxu1 %v5904_v15  ;;  %v6059_v15 = vld [vmem:[#allocation5 + $0x6cc] ss:$16 sps:$4 sm:$0xff]  }
 0x3ab   :  { %3721 = vmatprep.subr.bf16.mxu1 %v5912_v16 }
 0x3ae   :  { %3722 = vmatpush2.bf16.msra.mxu1 %v5910_v0 }
 0x3af   :  { %3723 = vmatprep.subr.bf16.mxu1 %v5918_v17  ;;  %v6057_v17 = vld [vmem:[#allocation5 + $0x6c8] ss:$16 sps:$4 sm:$0xff]  }
 0x3b2   :  { %3724 = vmatpush2.bf16.msra.mxu1 %v5916_v18 }
 0x3b3   :  { %3725 = vmatprep.subr.bf16.mxu1 %v5924_v11  ;;  %v6065_v11 = vld [vmem:[#allocation5 + $0x6ac] ss:$16 sps:$4 sm:$0xff]  }
 0x3b6   :  { %3726 = vmatpush2.bf16.msra.mxu1 %v5922_v19  ;;  %v6063_v19 = vld [vmem:[#allocation5 + $0x6a8] ss:$16 sps:$4 sm:$0xff]  }
 0x3b7   :  { %3727 = vmatprep.subr.bf16.mxu1 %v5930_v20  ;;  %v6068_v20 = vld [vmem:[#allocation5 + $0x68c] ss:$16 sps:$4 sm:$0xff]  }
 0x3ba   :  { %3728 = vmatpush2.bf16.msra.mxu1 %v5928_v21  ;;  %v6066_v21 = vld [vmem:[#allocation5 + $0x688] ss:$16 sps:$4 sm:$0xff]  }
 0x3bb   :  { %3729 = vmatprep.subr.bf16.mxu1 %v5936_v22  ;;  %v1232_v22 = vpop.trf.xlu0 }
 0x3bc   :  { %v1359_v22 = vld [vmem:[#allocation3 + $0x63] ss:$6 sm:$0xff] }
 0x3be   :  { %3730 = vmatpush2.bf16.msra.mxu1 %v5934_v23  ;;  %v1168_v23 = vpop.trf.xlu1 }
 0x3bf   :  { %3731 = vmatprep.subr.bf16.mxu1 %v5942_v24  ;;  %v6071_v24 = vld [vmem:[#allocation5 + $0x66c] ss:$16 sps:$4 sm:$0xff]  }
 0x3c0   :  { %v1367_v23 = vld [vmem:[#allocation3 + $0x12b] ss:$6 sm:$0xff] }
 0x3c2   :  { %3732 = vmatpush2.bf16.msra.mxu1 %v5940_v25  ;;  %v6074_v25 = vld [vmem:[#allocation5 + $0x64c] ss:$16 sps:$4 sm:$0xff]  }
 0x3c3   :  { %3733 = vmatprep.subr.bf16.mxu1 %v5948_v26  ;;  %v1291_v26 = vld [vmem:[#allocation3] ss:$6 sm:$0xff] }
 0x3c6   :  { %3734 = vmatpush2.bf16.msra.mxu1 %v5946_v27  ;;  %v1307_v27 = vld [vmem:[#allocation3 + $0x1] ss:$6 sm:$0xff] }
 0x3c7   :  { %3785 = vmatprep.subr.bf16.mxu1 %v5957_v28  ;;  %v1315_v28 = vld [vmem:[#allocation3 + $0xc9] ss:$6 sm:$0xff] }
 0x3c9   :  { %3736 = vmatmul.mubr.bf16.vlgmr.msra.gmra.mxu1 %v7041_v30 }
 0x3ca   :  { %3786 = vmatpush1.bf16.msra.mxu1 %v5955_v32  ;;  %3817 = vmatprep.mubr.bf16.mxu1 %v6984_v12  ;;  %v5984_v12 = vld [vmem:[#allocation5 + $0x24c] ss:$16 sps:$4 sm:$0xff]  }
 0x3cb   :  { %3787 = vmatprep.subr.bf16.mxu1 %v5963_v33  ;;  %v1293_v32 = vld [vmem:[#allocation3 + $0x30] ss:$6 sm:$0xff] }
 0x3cc   :  { %v1301_v33 = vld [vmem:[#allocation3 + $0xf8] ss:$6 sm:$0xff] }
 0x3ce   :  { %3788 = vmatpush1.bf16.msra.mxu1 %v5961_v36  ;;  %v1309_v36 = vld [vmem:[#allocation3 + $0x31] ss:$6 sm:$0xff] }
 0x3cf   :  { %3789 = vmatprep.subr.bf16.mxu1 %v5969_v7 }
 0x3d2   :  { %3790 = vmatpush1.bf16.msra.mxu1 %v5967_v40  ;;  %v1317_v40 = vld [vmem:[#allocation3 + $0xf9] ss:$6 sm:$0xff] }
 0x3d3   :  { %3791 = vmatprep.subr.bf16.mxu1 %v5972_v34  ;;  %v1295_v34 = vld [vmem:[#allocation3 + $0x60] ss:$6 sm:$0xff] }
 0x3d6   :  { %3792 = vmatpush1.bf16.msra.mxu1 %v5970_v43  ;;  %v6072_v43 = vld [vmem:[#allocation5 + $0x648] ss:$16 sps:$4 sm:$0xff]  }
 0x3d7   :  { %3793 = vmatprep.subr.bf16.mxu1 %v5978_v44  ;;  %v1303_v44 = vld [vmem:[#allocation3 + $0x128] ss:$6 sm:$0xff] }
 0x3da   :  { %3794 = vmatpush1.bf16.msra.mxu1 %v5976_v35  ;;  %v6077_v35 = vld [vmem:[#allocation5 + $0x62c] ss:$16 sps:$4 sm:$0xff]  }
 0x3db   :  { %3795 = vmatprep.subr.bf16.mxu1 %v5984_v12  ;;  %v1319_v12 = vld [vmem:[#allocation3 + $0x129] ss:$6 sm:$0xff] }
 0x3de   :  { %3796 = vmatpush1.bf16.msra.mxu1 %v5982_v45  ;;  %v1297_v45 = vld [vmem:[#allocation3 + $0x90] ss:$6 sm:$0xff] }
 0x3df   :  { %3797 = vmatprep.subr.bf16.mxu1 %v5990_v49  ;;  %v1322_v49 = vmax.f32 %v1291_v26, %v1307_v27  ;;  %v1369_v27 = vld [vmem:[#allocation3 + $0x15b] ss:$6 sm:$0xff] }
 0x3e2   :  { %3798 = vmatpush1.bf16.msra.mxu1 %v5988_v51 }
 0x3e3   :  { %3799 = vmatprep.subr.bf16.mxu1 %v5996_v52  ;;  %v1313_v52 = vld [vmem:[#allocation3 + $0x91] ss:$6 sm:$0xff] }
 0x3e6   :  { %3800 = vmatpush1.bf16.msra.mxu1 %v5994_v48  ;;  %v1331_v48 = vld [vmem:[#allocation3 + $0x2] ss:$6 sm:$0xff] }
 0x3e7   :  { %3801 = vmatprep.subr.bf16.mxu1 %v6002_v54  ;;  %v1339_v54 = vld [vmem:[#allocation3 + $0xca] ss:$6 sm:$0xff] }
 0x3ea   :  { %3802 = vmatpush2.bf16.msra.mxu1 %v6000_v55  ;;  %v1323_v55 = vmax.f32 %v1293_v32, %v1309_v36  ;;  %v1387_v32 = vld [vmem:[#allocation3 + $0xcc] ss:$6 sm:$0xff] }
 0x3eb   :  { %3803 = vmatprep.subr.bf16.mxu1 %v6008_v56  ;;  %v1327_v56 = vmax.f32 %v1301_v33, %v1317_v40  ;;  %v1381_v40 = vld [vmem:[#allocation3 + $0x34] ss:$6 sm:$0xff] }
 0x3ee   :  { %3804 = vmatpush2.bf16.msra.mxu1 %v6006_v57  ;;  %v6075_v57 = vld [vmem:[#allocation5 + $0x628] ss:$16 sps:$4 sm:$0xff]  }
 0x3ef   :  { %3805 = vmatprep.subr.bf16.mxu1 %v6014_v58  ;;  %v1333_v58 = vld [vmem:[#allocation3 + $0x32] ss:$6 sm:$0xff] }
 0x3f2   :  { %3806 = vmatpush2.bf16.msra.mxu1 %v6012_v59  ;;  %v1341_v59 = vld [vmem:[#allocation3 + $0xfa] ss:$6 sm:$0xff] }
 0x3f3   :  { %3807 = vmatprep.subr.bf16.mxu1 %v6020_v60  ;;  %v1324_v60 = vmax.f32 %v1295_v34, %v1311_v41  ;;  %v1389_v34 = vld [vmem:[#allocation3 + $0xfc] ss:$6 sm:$0xff] }
 0x3f6   :  { %3808 = vmatpush2.bf16.msra.mxu1 %v6018_v61  ;;  %v1328_v61 = vmax.f32 %v1303_v44, %v1319_v12  ;;  %v1403_v44 = vld [vmem:[#allocation3 + $0x5] ss:$6 sm:$0xff]  ;;  %v1391_v12 = vld [vmem:[#allocation3 + $0x12c] ss:$6 sm:$0xff] }
 0x3f7   :  { %3809 = vmatprep.subr.bf16.mxu1 %v6026_v62  ;;  %v6080_v62 = vld [vmem:[#allocation5 + $0x60c] ss:$16 sps:$4 sm:$0xff]  }
 0x3fa   :  { %3810 = vmatpush2.bf16.msra.mxu1 %v6024_v63  ;;  %v1335_v63 = vld [vmem:[#allocation3 + $0x62] ss:$6 sm:$0xff] }
 0x3fb   :  { %3811 = vmatprep.subr.bf16.mxu1 %v6032_v1  ;;  %v1343_v1 = vld [vmem:[#allocation3 + $0x12a] ss:$6 sm:$0xff] }
 0x3fe   :  { %3812 = vmatpush2.bf16.msra.mxu1 %v6030_v4  ;;  %v1325_v4 = vmax.f32 %v1297_v45, %v1313_v52  ;;  %v1411_v52 = vld [vmem:[#allocation3 + $0xcd] ss:$6 sm:$0xff] }
 0x3ff   :  { %3813 = vmatprep.subr.bf16.mxu1 %v6038_v6  ;;  %v1329_v6 = vmax.f32 %v1305_v31, %v1321_v53  ;;  %v1385_v53 = vld [vmem:[#allocation3 + $0x94] ss:$6 sm:$0xff] }
 0x402   :  { %3814 = vmatpush2.bf16.msra.mxu1 %v6036_v9  ;;  %v1346_v9 = vmax.f32 %v1322_v49, %v1331_v48  ;;  %v1393_v48 = vld [vmem:[#allocation3 + $0x15c] ss:$6 sm:$0xff] }
 0x403   :  { %3815 = vmatprep.subr.bf16.mxu1 %v6044_v10 }
 0x406   :  { %3816 = vmatpush2.bf16.msra.mxu1 %v6042_v2  ;;  %v1337_v2 = vld [vmem:[#allocation3 + $0x92] ss:$6 sm:$0xff] }
 0x407   :  { %3867 = vmatprep.subr.bf16.mxu1 %v6053_v8  ;;  %v1345_v8 = vld [vmem:[#allocation3 + $0x15a] ss:$6 sm:$0xff] }
 0x409   :  { %v1102_v16 = vpop.f32.mrf.mxu1  ;;  %3818 = vmatmul.mubr.bf16.vlgmr.msra.gmra.mxu1 %v7030_v47  ;;  %v6069_v47 = vld [vmem:[#allocation5 + $0x668] ss:$16 sps:$4 sm:$0xff]  }
 0x40a   :  { %v5228_v0 = vmul.f32 -1.442695, %v1102_v16  ;;  %3868 = vmatpush1.bf16.msra.mxu1 %v6051_v14  ;;  %3899 = vmatprep.mubr.bf16.mxu1 %v7032_v50  ;;  %v1299_v50 = vld [vmem:[#allocation3 + $0xc8] ss:$6 sm:$0xff]  ;;  %v1355_v14 = vld [vmem:[#allocation3 + $0x3] ss:$6 sm:$0xff]  ;;  %v1347_v16 = vmax.f32 %v1323_v55, %v1333_v58 }
 0x40b   :  { %v5679_v18 = vpop.f32.mrf.mxu1  ;;  %3869 = vmatprep.subr.bf16.mxu1 %v6059_v15  ;;  %v1326_v51 = vmax.f32 %v1299_v50, %v1315_v28  ;;  %v1363_v15 = vld [vmem:[#allocation3 + $0xcb] ss:$6 sm:$0xff]  ;;  %v1379_v28 = vld [vmem:[#allocation3 + $0x4] ss:$6 sm:$0xff] }
 0x40c   :  { %6318 = vpow2.f32 %v5228_v0  ;;  %v1351_v0 = vmax.f32 %v1327_v56, %v1341_v59  ;;  %v1357_v18 = vld [vmem:[#allocation3 + $0x33] ss:$6 sm:$0xff]  ;;  %v2286_v59 = vsub.s32 1, %v6499_v3 }
 0x40d   :  { %v1350_v10 = vmax.f32 %v1326_v51, %v1339_v54  ;;  %v1361_v50 = vld [vmem:[#allocation3 + $0x93] ss:$6 sm:$0xff]  ;;  %v1371_v33 = vmax.f32 %v1347_v16, %v1357_v18 }
 0x40e   :  { %3870 = vmatpush1.bf16.msra.mxu1 %v6057_v17  ;;  %v6078_v17 = vld [vmem:[#allocation5 + $0x608] ss:$16 sps:$4 sm:$0xff]  }
 0x40f   :  { %3871 = vmatprep.subr.bf16.mxu1 %v6065_v11  ;;  %v1365_v11 = vld [vmem:[#allocation3 + $0xfb] ss:$6 sm:$0xff]  ;;  %v1374_v26 = vmax.f32 %v1350_v10, %v1363_v15  ;;  %v1395_v55 = vmax.f32 %v1371_v33, %v1381_v40 }
 0x410   :  { %v1375_v36 = vmax.f32 %v1351_v0, %v1365_v11  ;;  %v1413_v58 = vld [vmem:[#allocation3 + $0xfd] ss:$6 sm:$0xff]  ;;  %v1415_v10 = vld [vmem:[#allocation3 + $0x12d] ss:$6 sm:$0xff] }
 0x411   :  { %v1398_v31 = vmax.f32 %v1374_v26, %v1387_v32  ;;  %v1417_v18 = vld [vmem:[#allocation3 + $0x15d] ss:$6 sm:$0xff] }
 0x412   :  { %3872 = vmatpush1.bf16.msra.mxu1 %v6063_v19  ;;  %v1348_v19 = vmax.f32 %v1324_v60, %v1335_v63  ;;  %v1399_v56 = vmax.f32 %v1375_v36, %v1389_v34  ;;  %v6105_v26 = vld [vmem:[#allocation8 + $0x70] ss:$8 sps:$4 sm:$0xff]  }
 0x413   :  { %3873 = vmatprep.subr.bf16.mxu1 %v6068_v20  ;;  %v1352_v20 = vmax.f32 %v1328_v61, %v1343_v1  ;;  %v7058_v61 = vsub.s32 0, %v6499_v3  ;;  %v1422_v0 = vmax.f32 %v1398_v31, %v1411_v52  ;;  %v6113_v31 = vld [vmem:[#allocation8 + $0x64] ss:$8 sps:$4 sm:$0xff]  }
 0x414   :  { %v1372_v41 = vmax.f32 %v1348_v19, %v1359_v22  ;;  %v1423_v19 = vmax.f32 %v1399_v56, %v1413_v58 }
 0x416   :  { %3874 = vmatpush1.bf16.msra.mxu1 %v6066_v21  ;;  %v6083_v21 = vld [vmem:[#allocation5 + $0x7ec] ss:$16 sps:$4 sm:$0xff]  }
 0x417   :  { %3875 = vmatprep.subr.bf16.mxu1 %v6071_v24  ;;  %v1349_v24 = vmax.f32 %v1325_v4, %v1337_v2  ;;  %v2278_v4 = vld [vmem:[%s7659_s7] sm:$0xf] }
 0x419   :  { %v6319_v7 = vpop.eup %6318  ;;  %v1373_v45 = vmax.f32 %v1349_v24, %v1361_v50  ;;  %v6087_v24 = vld [vmem:[#allocation5 + $0x7a8] ss:$16 sps:$4 sm:$0xff]   ;;  %v6107_v50 = vld [vmem:[#allocation8 + $0x74] ss:$8 sps:$4 sm:$0xff]  }
 0x41a   :  { %v1109_v42 = vadd.f32 1.0, %v6319_v7  ;;  %3876 = vmatpush1.bf16.msra.mxu1 %v6069_v47  ;;  %v1353_v47 = vmax.f32 %v1329_v6, %v1345_v8  ;;  %v6081_v7 = vld [vmem:[#allocation5 + $0x7e8] ss:$16 sps:$4 sm:$0xff]   ;;  %v6089_v6 = vld [vmem:[#allocation5 + $0x7ac] ss:$16 sps:$4 sm:$0xff]   ;;  %4769 = vmatprep.subr.bf16.mxu0 %v6107_v50 }
 0x41b   :  { %3877 = vmatprep.subr.bf16.mxu1 %v6074_v25  ;;  %v1370_v25 = vmax.f32 %v1346_v9, %v1355_v14  ;;  %v1407_v9 = vld [vmem:[#allocation3 + $0x65] ss:$6 sm:$0xff]  ;;  %v1397_v2 = vmax.f32 %v1373_v45, %v1385_v53  ;;  %4770 = vmatpush1.bf16.msra.mxu0 %v6105_v26 }
 0x41c   :  { %6320 = vrcp.f32 %v1109_v42  ;;  %v1376_v42 = vmax.f32 %v1352_v20, %v1367_v23  ;;  %v1377_v49 = vmax.f32 %v1353_v47, %v1369_v27  ;;  %v2283_v20 = vrot.slane %v2278_v4, %v7058_v61  ;;  %v6092_v27 = vld [vmem:[#allocation5 + $0x78c] ss:$16 sps:$4 sm:$0xff]   ;;  %4771 = vmatprep.subr.bf16.mxu0 %v6113_v31 }
 0x41d   :  { %v1394_v51 = vmax.f32 %v1370_v25, %v1379_v28  ;;  %v6125_v50 = vld [vmem:[#allocation8 + $0x44] ss:$8 sps:$4 sm:$0xff]  }
 0x41e   :  { %3878 = vmatpush1.bf16.msra.mxu1 %v6072_v43  ;;  %v6086_v43 = vld [vmem:[#allocation5 + $0x7cc] ss:$16 sps:$4 sm:$0xff]   ;;  %v1400_v1 = vmax.f32 %v1376_v42, %v1391_v12  ;;  %v1401_v8 = vmax.f32 %v1377_v49, %v1393_v48  ;;  %v7079_v34 = vadd.f32 %v7045_v38, %v2283_v20  ;;  %v6090_v42 = vld [vmem:[#allocation5 + $0x788] ss:$16 sps:$4 sm:$0xff]  }
 0x41f   :  { %3879 = vmatprep.subr.bf16.mxu1 %v6077_v35  ;;  %v1383_v35 = vld [vmem:[#allocation3 + $0x64] ss:$6 sm:$0xff]  ;;  %v1418_v16 = vmax.f32 %v1394_v51, %v1403_v44 }
 0x420   :  { %v1396_v63 = vmax.f32 %v1372_v41, %v1383_v35  ;;  %v1424_v25 = vmax.f32 %v1400_v1, %v1415_v10  ;;  %v1425_v32 = vmax.f32 %v1401_v8, %v1417_v18  ;;  %v6095_v38 = vld [vmem:[#allocation5 + $0x76c] ss:$16 sps:$4 sm:$0xff]  }
 0x421   :  { %v6098_v8 = vld [vmem:[#allocation5 + $0x74c] ss:$16 sps:$4 sm:$0xff]  }
 0x422   :  { %3880 = vmatpush1.bf16.msra.mxu1 %v6075_v57  ;;  %v1405_v57 = vld [vmem:[#allocation3 + $0x35] ss:$6 sm:$0xff]  ;;  %v1420_v47 = vmax.f32 %v1396_v63, %v1407_v9 }
 0x423   :  { %3881 = vmatprep.subr.bf16.mxu1 %v6080_v62  ;;  %v6084_v62 = vld [vmem:[#allocation5 + $0x7c8] ss:$16 sps:$4 sm:$0xff]   ;;  %v1419_v11 = vmax.f32 %v1395_v55, %v1405_v57  ;;  %v6119_v9 = vld [vmem:[#allocation8 + $0x54] ss:$8 sps:$4 sm:$0xff]  }
 0x424   :  { %v6111_v55 = vld [vmem:[#allocation8 + $0x60] ss:$8 sps:$4 sm:$0xff]  }
 0x425   :  { %4772 = vmatpush1.bf16.msra.mxu0 %v6111_v55 }
 0x426   :  { %3882 = vmatpush1.bf16.msra.mxu1 %v6078_v17  ;;  %v1409_v17 = vld [vmem:[#allocation3 + $0x95] ss:$6 sm:$0xff]  ;;  %4773 = vmatprep.subr.bf16.mxu0 %v6119_v9 }
 0x427   :  { %3883 = vmatprep.subr.bf16.mxu1 %v6083_v21  ;;  %v2287_v21 = vrot.slane %v2278_v4, %v2286_v59  ;;  %v1421_v28 = vmax.f32 %v1397_v2, %v1409_v17 }
 0x429   :  { %v6321_v54 = vpop.eup %6320  ;;  %v7082_v41 = vadd.f32 %v7047_v39, %v2287_v21 }
 0x42a   :  { %v1433_v60 = vrot.slane %v6321_v54, %v6502_v5  ;;  %3884 = vmatpush2.bf16.msra.mxu1 %v6081_v7 }
 0x42b   :  { %3885 = vmatprep.subr.bf16.mxu1 %v6086_v43 }
 0x42c   :  { %v1434_v14 = vcombine.high %v1433_v60, %v1433_v60  ;;  %v1441_v15 = vrot.slane %v1433_v60, %v6502_v5 }
 0x42e   :  { %v1448_v22 = vrot.slane %v1434_v14, %v6502_v5  ;;  %v1452_v23 = vrot.slane %v1441_v15, %v7058_v61  ;;  %3886 = vmatpush2.bf16.msra.mxu1 %v6084_v62  ;;  %v6093_v62 = vld [vmem:[#allocation5 + $0x768] ss:$16 sps:$4 sm:$0xff]  }
 0x42f   :  { %3887 = vmatprep.subr.bf16.mxu1 %v6089_v6 }
 0x430   :  { %v1456_v33 = vrot.slane %v1448_v22, %v7058_v61  ;;  %v7070_v36 = vmul.f32 %v1452_v23, %v1418_v16  ;;  %v7072_v7 = vmul.f32 %v1452_v23, %v1419_v11  ;;  %v7074_v5 = vmul.f32 %v1452_v23, %v1420_v47  ;;  %v6117_v11 = vld [vmem:[#allocation8 + $0x50] ss:$8 sps:$4 sm:$0xff]  }
 0x431   :  { %v7076_v40 = vmul.f32 %v1452_v23, %v1421_v28  ;;  %v6096_v23 = vld [vmem:[#allocation5 + $0x748] ss:$16 sps:$4 sm:$0xff]   ;;  %4774 = vmatpush1.bf16.msra.mxu0 %v6117_v11 }
 0x432   :  { %3888 = vmatpush2.bf16.msra.mxu1 %v6087_v24  ;;  %v7084_v43 = vmul.f32 %v1456_v33, %v1422_v0  ;;  %v7088_v44 = vrot.slane %v7070_v36, %v6934_v29  ;;  %v7090_v35 = vmul.f32 %v1456_v33, %v1423_v19  ;;  %v7094_v12 = vrot.slane %v7072_v7, %v6934_v29  ;;  %v6129_v11 = vld [vmem:[#allocation8 + $0x30] ss:$8 sps:$4 sm:$0xff]  }
 0x433   :  { %3889 = vmatprep.subr.bf16.mxu1 %v6092_v27  ;;  %v7096_v45 = vmul.f32 %v1456_v33, %v1424_v25  ;;  %v7100_v39 = vrot.slane %v7074_v5, %v6934_v29  ;;  %v7102_v49 = vmul.f32 %v1456_v33, %v1425_v32  ;;  %v7106_v51 = vrot.slane %v7076_v40, %v6934_v29  ;;  %v6101_v27 = vld [vmem:[#allocation5 + $0x72c] ss:$16 sps:$4 sm:$0xff]  }
 0x434   :  { %v7110_v52 = vrot.slane %v7084_v43, %v6934_v29  ;;  %v1498_v53 = vrot.slane %v7088_v44, 1  ;;  %v7115_v48 = vrot.slane %v7090_v35, %v6934_v29  ;;  %v1627_v54 = vrot.slane %v7094_v12, 1  ;;  %4775 = vmatprep.subr.bf16.mxu0 %v6125_v50  ;;  %v6137_v50 = vld [vmem:[#allocation8 + $0x24] ss:$8 sps:$4 sm:$0xff]  }
 0x435   :  { %v7120_v56 = vrot.slane %v7096_v45, %v6934_v29  ;;  %v1749_v57 = vrot.slane %v7100_v39, 1  ;;  %v7125_v58 = vrot.slane %v7102_v49, %v6934_v29  ;;  %v1871_v60 = vrot.slane %v7106_v51, 1 }
 0x436   :  { %3890 = vmatpush2.bf16.msra.mxu1 %v6090_v42  ;;  %v1501_v63 = vsel %vm951_vm14, %v7110_v52, %v1498_v53  ;;  %v1630_v1 = vsel %vm951_vm14, %v7115_v48, %v1627_v54  ;;  %v7134_v4 = vcombine.high %v7088_v44, %v7088_v44  ;;  %v1511_v6 = vcombine.high %v7110_v52, %v7110_v52  ;;  %v6123_v54 = vld [vmem:[#allocation8 + $0x40] ss:$8 sps:$4 sm:$0xff]  }
 0x437   :  { %3891 = vmatprep.subr.bf16.mxu1 %v6095_v38  ;;  %v1502_v10 = vsel %vm1489_vm2, %v7110_v52, %v1501_v63  ;;  %v1631_v2 = vsel %vm1489_vm2, %v7115_v48, %v1630_v1  ;;  %v1752_v14 = vsel %vm951_vm14, %v7120_v56, %v1749_v57  ;;  %v1874_v15 = vsel %vm951_vm14, %v7125_v58, %v1871_v60  ;;  %v6099_v63 = vld [vmem:[#allocation5 + $0x728] ss:$16 sps:$4 sm:$0xff]  }
 0x438   :  { %v1503_v16 = vsel %vm1491_vm3, %v7110_v52, %v1502_v10  ;;  %v1632_v0 = vsel %vm1491_vm3, %v7115_v48, %v1631_v2  ;;  %v1753_v17 = vsel %vm1489_vm2, %v7120_v56, %v1752_v14  ;;  %v1875_v18 = vsel %vm1489_vm2, %v7125_v58, %v1874_v15  ;;  %v6104_v14 = vld [vmem:[#allocation5 + $0x70c] ss:$16 sps:$4 sm:$0xff]   ;;  %4776 = vmatpush1.bf16.msra.mxu0 %v6123_v54 }
 0x439   :  { %v1504_v19 = vsel %vm1493_vm4, %v7110_v52, %v1503_v16  ;;  %v1633_v20 = vsel %vm1493_vm4, %v7115_v48, %v1632_v0  ;;  %v1754_v21 = vsel %vm1491_vm3, %v7120_v56, %v1753_v17  ;;  %v1876_v22 = vsel %vm1491_vm3, %v7125_v58, %v1875_v18 }
 0x43a   :  { %3892 = vmatpush2.bf16.msra.mxu1 %v6093_v62  ;;  %1505 = vrot.lane.b32.xlu0 %v1504_v19, %s6392_s17  ;;  %v1755_v24 = vsel %vm1493_vm4, %v7120_v56, %v1754_v21  ;;  %v1877_v47 = vsel %vm1493_vm4, %v7125_v58, %v1876_v22  ;;  %v1524_v25 = vrot.slane %v7134_v4, 1  ;;  %v7170_v26 = vcombine.high %v7094_v12, %v7094_v12  ;;  %v6102_v22 = vld [vmem:[#allocation5 + $0x708] ss:$16 sps:$4 sm:$0xff]  }
 0x43b   :  { %1634 = vrot.lane.b32.xlu1 %v1633_v20, %s6392_s17  ;;  %3893 = vmatprep.subr.bf16.mxu1 %v6098_v8  ;;  %v1639_v28 = vcombine.high %v7115_v48, %v7115_v48  ;;  %v7177_v32 = vcombine.high %v7100_v39, %v7100_v39  ;;  %v7181_v33 = vcombine.high %v7120_v56, %v7120_v56  ;;  %v6131_v8 = vld [vmem:[#allocation8 + $0x34] ss:$8 sps:$4 sm:$0xff]   ;;  %v7210_v16 = vrot.slane %v1511_v6, 7 }
 0x43c   :  { %v1527_v42 = vsel %vm951_vm14, %v1511_v6, %v1524_v25  ;;  %v1651_v38 = vrot.slane %v7170_v26, 1  ;;  %v7187_v31 = vcombine.high %v7106_v51, %v7106_v51  ;;  %v7191_v53 = vcombine.high %v7125_v58, %v7125_v58  ;;  %4777 = vmatprep.subr.bf16.mxu0 %v6131_v8 }
 0x43d   :  { %v1528_v55 = vsel %vm1489_vm2, %v1511_v6, %v1527_v42  ;;  %v1773_v57 = vrot.slane %v7177_v32, 1  ;;  %v1536_v60 = vcombine.high %v7070_v36, %v7070_v36  ;;  %v1544_v62 = vcombine.high %v7084_v43, %v7084_v43  ;;  %4778 = vmatpush1.bf16.msra.mxu0 %v6129_v11 }
 0x43e   :  { %3894 = vmatpush2.bf16.msra.mxu1 %v6096_v23  ;;  %1878 = vrot.lane.b32.xlu0 %v1877_v47, %s6392_s17  ;;  %v1529_v1 = vsel %vm1491_vm3, %v1511_v6, %v1528_v55  ;;  %v1654_v9 = vsel %vm951_vm14, %v1639_v28, %v1651_v38  ;;  %v1895_v10 = vrot.slane %v7187_v31, 1  ;;  %v1662_v2 = vcombine.high %v7072_v7, %v7072_v7  ;;  %v6110_v55 = vld [vmem:[#allocation8 + $0x174] ss:$8 sps:$4 sm:$0xff]  }
 0x43f   :  { %1756 = vrot.lane.b32.xlu1 %v1755_v24, %s6392_s17  ;;  %3895 = vmatprep.subr.bf16.mxu1 %v6101_v27  ;;  %v1530_v36 = vsel %vm1493_vm4, %v1511_v6, %v1529_v1  ;;  %v1655_v43 = vsel %vm1489_vm2, %v1639_v28, %v1654_v9  ;;  %v1776_v15 = vsel %vm951_vm14, %v7181_v33, %v1773_v57  ;;  %s6409_s17 = smov 48   ;;  %v7244_v54 = vrot.slane %v1639_v28, 7  ;;  %v6135_v1 = vld [vmem:[#allocation8 + $0x20] ss:$8 sps:$4 sm:$0xff]  }
 0x440   :  { %v1656_v0 = vsel %vm1491_vm3, %v1639_v28, %v1655_v43  ;;  %v1777_v17 = vsel %vm1489_vm2, %v7181_v33, %v1776_v15  ;;  %v1898_v7 = vsel %vm951_vm14, %v7191_v53, %v1895_v10  ;;  %v7218_v18 = vrot.slane %v1536_v60, %v6934_v29  ;;  %4779 = vmatprep.subr.bf16.mxu0 %v6137_v50 }
 0x441   :  { %v1657_v19 = vsel %vm1493_vm4, %v1639_v28, %v1656_v0  ;;  %v1778_v20 = vsel %vm1491_vm3, %v7181_v33, %v1777_v17  ;;  %v1899_v6 = vsel %vm1489_vm2, %v7191_v53, %v1898_v7  ;;  %v7226_v21 = vrot.slane %v1544_v62, %v6934_v29  ;;  %v6116_v7 = vld [vmem:[#allocation8 + $0x164] ss:$8 sps:$4 sm:$0xff]   ;;  %4780 = vmatpush1.bf16.msra.mxu0 %v6135_v1 }
 0x442   :  { %3896 = vmatpush2.bf16.msra.mxu1 %v6099_v63  ;;  %1658 = vrot.lane.b32.xlu0 %v1657_v19, %s6409_s17  ;;  %v1779_v23 = vsel %vm1493_vm4, %v7181_v33, %v1778_v20  ;;  %v1900_v24 = vsel %vm1491_vm3, %v7191_v53, %v1899_v6  ;;  %v1564_v47 = vrot.slane %v7218_v18, 1  ;;  %v7235_v25 = vrot.slane %v1662_v2, %v6934_v29  ;;  %v6108_v2 = vld [vmem:[#allocation8 + $0x170] ss:$8 sps:$4 sm:$0xff]  }
 0x443   :  { %1531 = vrot.lane.b32.xlu1 %v1530_v36, %s6409_s17  ;;  %3897 = vmatprep.subr.bf16.mxu1 %v6104_v14  ;;  %v1901_v27 = vsel %vm1493_vm4, %v7191_v53, %v1900_v24  ;;  %v1670_v42 = vcombine.high %v7090_v35, %v7090_v35  ;;  %v1784_v38 = vcombine.high %v7074_v5, %v7074_v5  ;;  %v7280_v43 = vrot.slane %v7181_v33, 7  ;;  %v6114_v24 = vld [vmem:[#allocation8 + $0x160] ss:$8 sps:$4 sm:$0xff]  }
 0x444   :  { %v1567_v57 = vsel %vm951_vm14, %v7226_v21, %v1564_v47  ;;  %v1689_v60 = vrot.slane %v7235_v25, 1  ;;  %v1792_v62 = vcombine.high %v7096_v45, %v7096_v45  ;;  %v1906_v63 = vcombine.high %v7076_v40, %v7076_v40  ;;  %v7310_v47 = vpop.f32.mrf.mxu0 }
 0x445   :  { %v1568_v35 = vsel %vm1489_vm2, %v7226_v21, %v1567_v57  ;;  %v7256_v5 = vrot.slane %v1670_v42, %v6934_v29  ;;  %v7259_v28 = vrot.slane %v1784_v38, %v6934_v29  ;;  %v1914_v9 = vcombine.high %v7102_v49, %v7102_v49 }
 0x446   :  { %3898 = vmatpush2.bf16.msra.mxu1 %v6102_v22  ;;  %1902 = vrot.lane.b32.xlu0 %v1901_v27, %s6409_s17  ;;  %v1569_v40 = vsel %vm1491_vm3, %v7226_v21, %v1568_v35  ;;  %v7267_v45 = vrot.slane %v1792_v62, %v6934_v29  ;;  %v7270_v10 = vrot.slane %v1906_v63, %v6934_v29  ;;  %v7289_v17 = vrot.slane %v7191_v53, 7  ;;  %v6143_v53 = vld [vmem:[#allocation8 + $0x14] ss:$8 sps:$4 sm:$0xff]   ;;  %v6141_v62 = vld [vmem:[#allocation8 + $0x10] ss:$8 sps:$4 sm:$0xff]  }
 0x447   :  { %1780 = vrot.lane.b32.xlu1 %v1779_v23, %s6409_s17  ;;  %v1692_v8 = vsel %vm951_vm14, %v7256_v5, %v1689_v60  ;;  %v1811_v49 = vrot.slane %v7259_v28, 1  ;;  %v7277_v36 = vrot.slane %v1914_v9, %v6934_v29  ;;  %4810 = vmatprep.subr.bf16.mxu1 %v6110_v55  ;;  %v1515_v0 = vsel %vm951_vm14, %v7210_v16, %v7134_v4  ;;  %v6122_v60 = vld [vmem:[#allocation8 + $0x154] ss:$8 sps:$4 sm:$0xff]   ;;  %v6149_v35 = vld [vmem:[#allocation8 + $0x4] ss:$8 sps:$4 sm:$0xff]  }
 0x448   :  { %v1693_v14 = vsel %vm1489_vm2, %v7256_v5, %v1692_v8  ;;  %v1933_v15 = vrot.slane %v7270_v10, 1  ;;  %v1570_v33 = vsel %vm1493_vm4, %v7226_v21, %v1569_v40  ;;  %v1643_v4 = vsel %vm951_vm14, %v7244_v54, %v7170_v26  ;;  %4781 = vmatprep.subr.bf16.mxu0 %v6143_v53  ;;  %v7338_v8 = vpop.f32.mrf.mxu0  ;;  %v6147_v53 = vld [vmem:[#allocation8] ss:$8 sps:$4 sm:$0xff]  }
 0x449   :  { %3900 = vmatmul.mubr.bf16.vlgmr.msra.gmra.mxu1 %v7041_v30  ;;  %v1694_v11 = vsel %vm1491_vm3, %v7256_v5, %v1693_v14  ;;  %v3655_v19 = vpop.f32.mrf.mxu1  ;;  %v1814_v20 = vsel %vm951_vm14, %v7267_v45, %v1811_v49  ;;  %v1516_v27 = vsel %vm1489_vm2, %v7210_v16, %v1515_v0  ;;  %v1644_v55 = vsel %vm1489_vm2, %v7244_v54, %v1643_v4 }
 0x44a   :  { %v1695_v6 = vsel %vm1493_vm4, %v7256_v5, %v1694_v11  ;;  %v7304_v30 = vadd.f32 %v3655_v19, %v7079_v34  ;;  %v1815_v22 = vsel %vm1489_vm2, %v7267_v45, %v1814_v20  ;;  %v1936_v23 = vsel %vm951_vm14, %v7277_v36, %v1933_v15  ;;  %4811 = vmatpush1.bf16.msra.mxu1 %v6108_v2  ;;  %v6120_v2 = vld [vmem:[#allocation8 + $0x150] ss:$8 sps:$4 sm:$0xff]   ;;  %v6128_v11 = vld [vmem:[#allocation8 + $0x144] ss:$8 sps:$4 sm:$0xff]   ;;  %v3782_v19 = vpop.f32.mrf.mxu0 }
 0x44b   :  { %1571 = vrot.lane.b32.xlu1 %v1570_v33, %s6410_s18  ;;  %1696 = vrot.lane.b32.xlu0 %v1695_v6, %s6410_s18  ;;  %v1816_v26 = vsel %vm1491_vm3, %v7267_v45, %v1815_v22  ;;  %v1937_v34 = vsel %vm1489_vm2, %v7277_v36, %v1936_v23  ;;  %v3657_v50 = vpop.f32.mrf.mxu1  ;;  %v7326_v57 = vrot.slane %v7226_v21, 7  ;;  %v1765_v1 = vsel %vm951_vm14, %v7280_v43, %v7177_v32 }
 0x44c   :  { %v1938_v42 = vsel %vm1491_vm3, %v7277_v36, %v1937_v34  ;;  %v7321_v38 = vadd.f32 %v3657_v50, %v7082_v41  ;;  %4812 = vmatprep.subr.bf16.mxu1 %v6116_v7  ;;  %v1817_v41 = vsel %vm1493_vm4, %v7267_v45, %v1816_v26  ;;  %v1887_v40 = vsel %vm951_vm14, %v7289_v17, %v7187_v31  ;;  %v6126_v26 = vld [vmem:[#allocation8 + $0x140] ss:$8 sps:$4 sm:$0xff]   ;;  %v6155_v34 = vld [vmem:[#allocation8 + $0xf4] ss:$8 sps:$4 sm:$0xff]   ;;  %v3783_v50 = vpop.f32.mrf.mxu0 }
 0x44d   :  { %v3659_v63 = vpop.f32.mrf.mxu1  ;;  %v1939_v9 = vsel %vm1493_vm4, %v7277_v36, %v1938_v42  ;;  %v1517_v32 = vsel %vm1491_vm3, %v7210_v16, %v1516_v27  ;;  %v1645_v49 = vsel %vm1491_vm3, %v7244_v54, %v1644_v55  ;;  %v1766_v15 = vsel %vm1489_vm2, %v7280_v43, %v1765_v1  ;;  %4782 = vmatpush1.bf16.msra.mxu0 %v6141_v62  ;;  %v6134_v55 = vld [vmem:[#allocation8 + $0x134] ss:$8 sps:$4 sm:$0xff]  }
 0x44e   :  { %4813 = vmatpush1.bf16.msra.mxu1 %v6114_v24  ;;  %v7347_v0 = vrot.slane %v7256_v5, 7  ;;  %v1888_v31 = vsel %vm1489_vm2, %v7289_v17, %v1887_v40  ;;  %v1555_v7 = vsel %vm951_vm14, %v7326_v57, %v7218_v18  ;;  %v7355_v33 = vrot.slane %v7267_v45, 7  ;;  %4783 = vmatprep.subr.bf16.mxu0 %v6149_v35  ;;  %v6153_v35 = vld [vmem:[#allocation8 + $0xf0] ss:$8 sps:$4 sm:$0xff]  }
 0x44f   :  { %1818 = vrot.lane.b32.xlu1 %v1817_v41, %s6410_s18  ;;  %1940 = vrot.lane.b32.xlu0 %v1939_v9, %s6410_s18  ;;  %v3660_v14 = vpop.f32.mrf.mxu1  ;;  %v7361_v4 = vrot.slane %v7277_v36, 7  ;;  %v1518_v6 = vsel %vm1493_vm4, %v7210_v16, %v1517_v32  ;;  %v1646_v22 = vsel %vm1493_vm4, %v7244_v54, %v1645_v49  ;;  %v1767_v23 = vsel %vm1491_vm3, %v7280_v43, %v1766_v15  ;;  %v6132_v40 = vld [vmem:[#allocation8 + $0x130] ss:$8 sps:$4 sm:$0xff]  }
 0x450   :  { %4814 = vmatprep.subr.bf16.mxu1 %v6122_v60  ;;  %v1681_v20 = vsel %vm951_vm14, %v7347_v0, %v7235_v25  ;;  %v1576_v24 = vcombine.high %v7218_v18, %v7218_v18  ;;  %v1889_v27 = vsel %vm1491_vm3, %v7289_v17, %v1888_v31  ;;  %v1556_v16 = vsel %vm1489_vm2, %v7326_v57, %v1555_v7  ;;  %v6140_v31 = vld [vmem:[#allocation8 + $0x124] ss:$8 sps:$4 sm:$0xff]  }
 0x451   :  { %v1682_v54 = vsel %vm1489_vm2, %v7347_v0, %v1681_v20  ;;  %v1803_v18 = vsel %vm951_vm14, %v7355_v33, %v7259_v28  ;;  %v7382_v42 = vcombine.high %v7226_v21, %v7226_v21  ;;  %v1768_v60 = vsel %vm1493_vm4, %v7280_v43, %v1767_v23  ;;  %4784 = vmatpush1.bf16.msra.mxu0 %v6147_v53  ;;  %v6161_v7 = vld [vmem:[#allocation8 + $0xe4] ss:$8 sps:$4 sm:$0xff]  }
 0x452   :  { %4815 = vmatpush1.bf16.msra.mxu1 %v6120_v2  ;;  %v1925_v62 = vsel %vm951_vm14, %v7361_v4, %v7270_v10  ;;  %v1590_v63 = vrot.slane %v1576_v24, 1  ;;  %v1700_v1 = vcombine.high %v7235_v25, %v7235_v25  ;;  %v1890_v41 = vsel %vm1493_vm4, %v7289_v17, %v1889_v27  ;;  %4785 = vmatprep.subr.bf16.mxu0 %v6155_v34 }
 0x453   :  { %1519 = vrot.lane.b32.xlu1 %v1518_v6, %s6411_s19  ;;  %1647 = vrot.lane.b32.xlu0 %v1646_v22, %s6411_s19  ;;  %v1557_v21 = vsel %vm1491_vm3, %v7326_v57, %v1556_v16  ;;  %v7397_v9 = vcombine.high %v7256_v5, %v7256_v5  ;;  %v1580_v43 = vrot.slane %v7382_v42, 7  ;;  %v1683_v25 = vsel %vm1491_vm3, %v7347_v0, %v1682_v54  ;;  %v6159_v6 = vld [vmem:[#allocation8 + $0xe0] ss:$8 sps:$4 sm:$0xff]   ;;  %v6146_v16 = vld [vmem:[#allocation8 + $0x114] ss:$8 sps:$4 sm:$0xff]  }
 0x454   :  { %4816 = vmatprep.subr.bf16.mxu1 %v6128_v11  ;;  %v1804_v17 = vsel %vm1489_vm2, %v7355_v33, %v1803_v18  ;;  %v1593_v2 = vsel %vm951_vm14, %v7382_v42, %v1590_v63  ;;  %v1713_v32 = vrot.slane %v1700_v1, 1  ;;  %v1926_v5 = vsel %vm1489_vm2, %v7361_v4, %v1925_v62 }
 0x455   :  { %v1581_v49 = vsel %vm951_vm14, %v1580_v43, %v1576_v24  ;;  %v7410_v14 = vrot.slane %v7397_v9, 7  ;;  %v7414_v15 = vcombine.high %v7267_v45, %v7267_v45  ;;  %v1594_v11 = vsel %vm1489_vm2, %v7382_v42, %v1593_v2  ;;  %4786 = vmatpush2.bf16.msra.mxu0 %v6153_v35  ;;  %v6144_v35 = vld [vmem:[#allocation8 + $0x110] ss:$8 sps:$4 sm:$0xff]   ;;  %v6152_v2 = vld [vmem:[#allocation8 + $0x104] ss:$8 sps:$4 sm:$0xff]  }
 0x456   :  { %4817 = vmatpush1.bf16.msra.mxu1 %v6126_v26  ;;  %v1716_v19 = vsel %vm951_vm14, %v7397_v9, %v1713_v32  ;;  %v1582_v20 = vsel %vm1489_vm2, %v1580_v43, %v1581_v49  ;;  %v7423_v53 = vcombine.high %v7277_v36, %v7277_v36  ;;  %v1558_v45 = vsel %vm1493_vm4, %v7326_v57, %v1557_v21  ;;  %v6138_v26 = vld [vmem:[#allocation8 + $0x120] ss:$8 sps:$4 sm:$0xff]   ;;  %v6173_v32 = vld [vmem:[#allocation8 + $0xc4] ss:$8 sps:$4 sm:$0xff]  }
 0x457   :  { %1769 = vrot.lane.b32.xlu1 %v1768_v60, %s6411_s19  ;;  %1891 = vrot.lane.b32.xlu0 %v1890_v41, %s6411_s19  ;;  %v1684_v22 = vsel %vm1493_vm4, %v7347_v0, %v1683_v25  ;;  %v1705_v23 = vsel %vm951_vm14, %v7410_v14, %v1700_v1  ;;  %v1487_v24 = vrot.slane %v7110_v52, 7  ;;  %v1805_v36 = vsel %vm1491_vm3, %v7355_v33, %v1804_v17  ;;  %v6167_v60 = vld [vmem:[#allocation8 + $0xd4] ss:$8 sps:$4 sm:$0xff]  }
 0x458   :  { %4818 = vmatprep.subr.bf16.mxu1 %v6134_v55  ;;  %v1927_v34 = vsel %vm1491_vm3, %v7361_v4, %v1926_v5  ;;  %v7438_v57 = vcombine.high %v7259_v28, %v7259_v28  ;;  %v1595_v0 = vsel %vm1491_vm3, %v7382_v42, %v1594_v11  ;;  %v1717_v52 = vsel %vm1489_vm2, %v7397_v9, %v1716_v19  ;;  %v7455_v55 = vpop.f32.mrf.mxu0 }
 0x459   :  { %v1583_v50 = vsel %vm1491_vm3, %v1580_v43, %v1582_v20  ;;  %v7446_v27 = vrot.slane %v7414_v15, 7  ;;  %4787 = vmatprep.subr.bf16.mxu0 %v6161_v7  ;;  %v1706_v54 = vsel %vm1489_vm2, %v7410_v14, %v1705_v23  ;;  %v1944_v28 = vcombine.high %v7270_v10, %v7270_v10  ;;  %v6165_v10 = vld [vmem:[#allocation8 + $0xd0] ss:$8 sps:$4 sm:$0xff]  }
 0x45a   :  { %4819 = vmatpush1.bf16.msra.mxu1 %v6132_v40  ;;  %v7453_v18 = vrot.slane %v7423_v53, 7  ;;  %4788 = vmatpush2.bf16.msra.mxu0 %v6159_v6  ;;  %v1806_v62 = vsel %vm1493_vm4, %v7355_v33, %v1805_v36  ;;  %v1928_v63 = vsel %vm1493_vm4, %v7361_v4, %v1927_v34  ;;  %v1488_v1 = vsel %vm951_vm14, %v1487_v24, %v7088_v44  ;;  %v7469_v4 = vpop.f32.mrf.mxu0  ;;  %v6150_v6 = vld [vmem:[#allocation8 + $0x100] ss:$8 sps:$4 sm:$0xff]   ;;  %v6179_v34 = vld [vmem:[#allocation8 + $0xb4] ss:$8 sps:$4 sm:$0xff]  }
 0x45b   :  { %1559 = vrot.lane.b32.xlu1 %v1558_v45, %s6412_s20  ;;  %1685 = vrot.lane.b32.xlu0 %v1684_v22, %s6412_s20  ;;  %v1596_v41 = vsel %vm1493_vm4, %v7382_v42, %v1595_v0  ;;  %v1718_v21 = vsel %vm1491_vm3, %v7397_v9, %v1717_v52  ;;  %v1584_v33 = vsel %vm1493_vm4, %v1580_v43, %v1583_v50  ;;  %v1620_v40 = vrot.slane %v7115_v48, 7  ;;  %v6171_v45 = vld [vmem:[#allocation8 + $0xc0] ss:$8 sps:$4 sm:$0xff]  }
 0x45c   :  { %4820 = vmatprep.subr.bf16.mxu1 %v6140_v31  ;;  %v1707_v44 = vsel %vm1491_vm3, %v7410_v14, %v1706_v54  ;;  %v1827_v25 = vsel %vm951_vm14, %v7446_v27, %v7438_v57  ;;  %v1835_v17 = vrot.slane %v7438_v57, 1  ;;  %v1490_v42 = vsel %vm1489_vm2, %v1487_v24, %v1488_v1  ;;  %4789 = vmatprep.subr.bf16.mxu0 %v6167_v60  ;;  %v3864_v31 = vpop.f32.mrf.mxu0  ;;  %v6156_v54 = vld [vmem:[#allocation8 + $0x1f0] ss:$8 sps:$4 sm:$0xff]  }
 0x45d   :  { %v1949_v43 = vsel %vm951_vm14, %v7453_v18, %v1944_v28  ;;  %v1957_v48 = vrot.slane %v1944_v28, 1  ;;  %v1492_v5 = vsel %vm1491_vm3, %v1487_v24, %v1490_v42  ;;  %v1621_v49 = vsel %vm951_vm14, %v1620_v40, %v7094_v12  ;;  %v6177_v28 = vld [vmem:[#allocation8 + $0xb0] ss:$8 sps:$4 sm:$0xff]   ;;  %v6170_v42 = vld [vmem:[#allocation8 + $0x1d4] ss:$8 sps:$4 sm:$0xff]  }
 0x45e   :  { %4821 = vmatpush1.bf16.msra.mxu1 %v6138_v26  ;;  %v1719_v7 = vsel %vm1493_vm4, %v7397_v9, %v1718_v21  ;;  %v1494_v11 = vsel %vm1493_vm4, %v1487_v24, %v1492_v5  ;;  %v1622_v19 = vsel %vm1489_vm2, %v1620_v40, %v1621_v49  ;;  %v1864_v20 = vrot.slane %v7125_v58, 7  ;;  %4790 = vmatpush2.bf16.msra.mxu0 %v6165_v10  ;;  %v3865_v23 = vpop.f32.mrf.mxu0  ;;  %v6164_v10 = vld [vmem:[#allocation8 + $0x1e4] ss:$8 sps:$4 sm:$0xff]   ;;  %v6174_v49 = vld [vmem:[#allocation8 + $0x1c0] ss:$8 sps:$4 sm:$0xff]  }
 0x45f   :  { %1807 = vrot.lane.b32.xlu1 %v1806_v62, %s6412_s20  ;;  %1929 = vrot.lane.b32.xlu0 %v1928_v63, %s6412_s20  ;;  %v1708_v12 = vsel %vm1493_vm4, %v7410_v14, %v1707_v44  ;;  %v1828_v9 = vsel %vm1489_vm2, %v7446_v27, %v1827_v25  ;;  %1497 = vst.msk [vmem:[#allocation4] sm:$0x3] %vm1496_vm5, %v1494_v11  ;;  %v1742_v58 = vrot.slane %v7120_v56, 7  ;;  %v6158_v14 = vld [vmem:[#allocation8 + $0x1f4] ss:$8 sps:$4 sm:$0xff]  }
 0x460   :  { %4822 = vmatprep.subr.bf16.mxu1 %v6146_v16  ;;  %v1623_v22 = vsel %vm1491_vm3, %v1620_v40, %v1622_v19  ;;  %v1950_v24 = vsel %vm1489_vm2, %v7453_v18, %v1949_v43  ;;  %v1865_v36 = vsel %vm951_vm14, %v1864_v20, %v7106_v51  ;;  %4791 = vmatprep.subr.bf16.mxu0 %v6173_v32  ;;  %v6183_v44 = vld [vmem:[#allocation8 + $0xa0] ss:$8 sps:$4 sm:$0xff]   ;;  %v6168_v32 = vld [vmem:[#allocation8 + $0x1d0] ss:$8 sps:$4 sm:$0xff]   ;;  %v6197_v5 = vld [vmem:[#allocation8 + $0x84] ss:$8 sps:$4 sm:$0xff]  }
 0x461   :  { %v1624_v26 = vsel %vm1493_vm4, %v1620_v40, %v1623_v22  ;;  %v1838_v57 = vsel %vm951_vm14, %v7414_v15, %v1835_v17  ;;  %v1960_v0 = vsel %vm951_vm14, %v7423_v53, %v1957_v48  ;;  %v1866_v56 = vsel %vm1489_vm2, %v1864_v20, %v1865_v36  ;;  %v6162_v40 = vld [vmem:[#allocation8 + $0x1e0] ss:$8 sps:$4 sm:$0xff]   ;;  %v6189_v43 = vld [vmem:[#allocation8 + $0x90] ss:$8 sps:$4 sm:$0xff]   ;;  %v6176_v48 = vld [vmem:[#allocation8 + $0x1c4] ss:$8 sps:$4 sm:$0xff]  }
 0x462   :  { %4823 = vmatpush1.bf16.msra.mxu1 %v6144_v35  ;;  %1626 = vst.msk [vmem:[#allocation4 + $0x2] sm:$0x3] %vm1496_vm5, %v1624_v26  ;;  %v1743_v52 = vsel %vm951_vm14, %v1742_v58, %v7100_v39  ;;  %v1829_v51 = vsel %vm1491_vm3, %v7446_v27, %v1828_v9  ;;  %v1867_v50 = vsel %vm1491_vm3, %v1864_v20, %v1866_v56  ;;  %v6195_v31 = vld [vmem:[#allocation8 + $0x80] ss:$8 sps:$4 sm:$0xff]   ;;  %v6188_v11 = vld [vmem:[#allocation8 + $0x1a4] ss:$8 sps:$4 sm:$0xff]  }
 0x463   :  { %1597 = vrot.lane.b32.xlu1 %v1596_v41, %s6413_s21  ;;  %1720 = vrot.lane.b32.xlu0 %v1719_v7, %s6413_s21  ;;  %v1744_v16 = vsel %vm1489_vm2, %v1742_v58, %v1743_v52  ;;  %v1951_v60 = vsel %vm1491_vm3, %v7453_v18, %v1950_v24  ;;  %v1868_v62 = vsel %vm1493_vm4, %v1864_v20, %v1867_v50  ;;  %v6185_v41 = vld [vmem:[#allocation8 + $0xa4] ss:$8 sps:$4 sm:$0xff]   ;;  %v6180_v7 = vld [vmem:[#allocation8 + $0x1b0] ss:$8 sps:$4 sm:$0xff]   ;;  %v6186_v19 = vld [vmem:[#allocation8 + $0x1a0] ss:$8 sps:$4 sm:$0xff]  }
 0x464   :  { %4824 = vmatprep.subr.bf16.mxu1 %v6152_v2  ;;  %4792 = vmatpush2.bf16.msra.mxu0 %v6171_v45  ;;  %v1745_v39 = vsel %vm1491_vm3, %v1742_v58, %v1744_v16  ;;  %v1839_v63 = vsel %vm1489_vm2, %v7414_v15, %v1838_v57  ;;  %v1961_v1 = vsel %vm1489_vm2, %v7423_v53, %v1960_v0  ;;  %v6191_v2 = vld [vmem:[#allocation8 + $0x94] ss:$8 sps:$4 sm:$0xff]   ;;  %v6200_v45 = vld [vmem:[#allocation8 + $0x184] ss:$8 sps:$4 sm:$0xff]  }
 0x465   :  { %1870 = vst.msk [vmem:[#allocation4 + $0x6] sm:$0x3] %vm1496_vm5, %v1868_v62  ;;  %v1746_v35 = vsel %vm1493_vm4, %v1742_v58, %v1745_v39  ;;  %4793 = vmatprep.subr.bf16.mxu0 %v6179_v34  ;;  %v1830_v21 = vsel %vm1493_vm4, %v7446_v27, %v1829_v51  ;;  %v1840_v25 = vsel %vm1491_vm3, %v7414_v15, %v1839_v63  ;;  %v6194_v20 = vld [vmem:[#allocation8 + $0x194] ss:$8 sps:$4 sm:$0xff]  }
 0x466   :  { %4825 = vmatpush1.bf16.msra.mxu1 %v6150_v6  ;;  %1748 = vst.msk [vmem:[#allocation4 + $0x4] sm:$0x3] %vm1496_vm5, %v1746_v35  ;;  %v1962_v17 = vsel %vm1491_vm3, %v7423_v53, %v1961_v1  ;;  %v1841_v27 = vsel %vm1493_vm4, %v7414_v15, %v1840_v25  ;;  %v6182_v15 = vld [vmem:[#allocation8 + $0x1b4] ss:$8 sps:$4 sm:$0xff]   ;;  %v6192_v6 = vld [vmem:[#allocation8 + $0x190] ss:$8 sps:$4 sm:$0xff]   ;;  %v3697_v22 = vadd.f32 %v7049_v46, %v7304_v30 }
 0x467   :  { %1585 = vrot.lane.b32.xlu1 %v1584_v33, %s6414_s22  ;;  %1709 = vrot.lane.b32.xlu0 %v1708_v12, %s6414_s22  ;;  %v1952_v33 = vsel %vm1493_vm4, %v7453_v18, %v1951_v60  ;;  %v1963_v18 = vsel %vm1493_vm4, %v7423_v53, %v1962_v17  ;;  %v6203_v53 = vld [vmem:[#allocation8 + $0x274] ss:$8 sps:$4 sm:$0xff]   ;;  %v6198_v12 = vld [vmem:[#allocation8 + $0x180] ss:$8 sps:$4 sm:$0xff]   ;;  %v3699_v23 = vadd.f32 %v7051_v13, %v7321_v38 }
 0x468   :  { %4826 = vmatprep.subr.bf16.mxu1 %v6158_v14  ;;  %4794 = vmatpush2.bf16.msra.mxu0 %v6177_v28  ;;  %v6207_v9 = vld [vmem:[#allocation8 + $0x374] ss:$8 sps:$4 sm:$0xff]  }
 0x469   :  { %4795 = vmatprep.subr.bf16.mxu0 %v6185_v41 }
 0x46a   :  { %4827 = vmatpush2.bf16.msra.mxu1 %v6156_v54 }
 0x46b   :  { %1831 = vrot.lane.b32.xlu1 %v1830_v21, %s6414_s22  ;;  %1953 = vrot.lane.b32.xlu0 %v1952_v33, %s6414_s22 }
 0x46c   :  { %4828 = vmatprep.subr.bf16.mxu1 %v6164_v10  ;;  %4796 = vmatpush2.bf16.msra.mxu0 %v6183_v44 }
 0x46d   :  { %4797 = vmatprep.subr.bf16.mxu0 %v6191_v2 }
 0x46e   :  { %4829 = vmatpush2.bf16.msra.mxu1 %v6162_v40 }
 0x46f   :  { %1842 = vrot.lane.b32.xlu1 %v1841_v27, %s6413_s21  ;;  %1964 = vrot.lane.b32.xlu0 %v1963_v18, %s6413_s21 }
 0x470   :  { %4830 = vmatprep.subr.bf16.mxu1 %v6170_v42  ;;  %4798 = vmatpush2.bf16.msra.mxu0 %v6189_v43 }
 0x471   :  { %4799 = vmatprep.subr.bf16.mxu0 %v6197_v5 }
 0x472   :  { %4831 = vmatpush2.bf16.msra.mxu1 %v6168_v32 }
 0x473   :  { %4832 = vmatprep.subr.bf16.mxu1 %v6176_v48 }
 0x474   :  { %4800 = vmatpush2.bf16.msra.mxu0 %v6195_v31 }
 0x475   :  { %4851 = vmatprep.subr.bf16.mxu0 %v6203_v53 }
 0x476   :  { %4833 = vmatpush2.bf16.msra.mxu1 %v6174_v49 }
 0x477   :  { %4834 = vmatprep.subr.bf16.mxu1 %v6182_v15 }
 0x47a   :  { %4835 = vmatpush2.bf16.msra.mxu1 %v6180_v7 }
 0x47b   :  { %4836 = vmatprep.subr.bf16.mxu1 %v6188_v11 }
 0x47e   :  { %4837 = vmatpush2.bf16.msra.mxu1 %v6186_v19  ;;  %v6201_v19 = vld [vmem:[#allocation8 + $0x270] ss:$8 sps:$4 sm:$0xff]  }
 0x47f   :  { %4838 = vmatprep.subr.bf16.mxu1 %v6194_v20 }
 0x482   :  { %4839 = vmatpush2.bf16.msra.mxu1 %v6192_v6 }
 0x483   :  { %4840 = vmatprep.subr.bf16.mxu1 %v6200_v45  ;;  %v6210_v45 = vld [vmem:[#allocation8 + $0x264] ss:$8 sps:$4 sm:$0xff]  }
 0x486   :  { %4841 = vmatpush2.bf16.msra.mxu1 %v6198_v12 }
 0x487   :  { %4892 = vmatprep.subr.bf16.mxu1 %v6207_v9  ;;  %v6205_v9 = vld [vmem:[#allocation8 + $0x370] ss:$8 sps:$4 sm:$0xff]  }
 0x489   :  { %v3737_v58 = vpop.f32.mrf.mxu1 }
 0x48a   :  { %v3738_v24 = vadd.f32 %v3737_v58, %v3697_v22  ;;  %v6213_v58 = vld [vmem:[#allocation8 + $0x364] ss:$8 sps:$4 sm:$0xff]  }
 0x48b   :  { %v3739_v26 = vpop.f32.mrf.mxu1 }
 0x48c   :  { %v3740_v36 = vadd.f32 %v3739_v26, %v3699_v23  ;;  %v3908_v34 = vmax.f32 %v3738_v24, 0.0  ;;  %v6208_v23 = vld [vmem:[#allocation8 + $0x260] ss:$8 sps:$4 sm:$0xff]   ;;  %v6216_v24 = vld [vmem:[#allocation8 + $0x254] ss:$8 sps:$4 sm:$0xff]  }
 0x48d   :  { %v3741_v14 = vpop.f32.mrf.mxu1  ;;  %v6211_v26 = vld [vmem:[#allocation8 + $0x360] ss:$8 sps:$4 sm:$0xff]  }
 0x48e   :  { %v3909_v57 = vmax.f32 %v3740_v36, 0.0  ;;  %v6219_v36 = vld [vmem:[#allocation8 + $0x354] ss:$8 sps:$4 sm:$0xff]   ;;  %v6214_v14 = vld [vmem:[#allocation8 + $0x250] ss:$8 sps:$4 sm:$0xff]  }
 0x48f   :  { %v3742_v0 = vpop.f32.mrf.mxu1 }
 0x490   :  { %v7543_v56 = vcombine.low %v3908_v34, %v3909_v57  ;;  %v6222_v34 = vld [vmem:[#allocation8 + $0x244] ss:$8 sps:$4 sm:$0xff]   ;;  %v2290_v57 = vsub.s32 2, %v6499_v3  ;;  %v6217_v0 = vld [vmem:[#allocation8 + $0x350] ss:$8 sps:$4 sm:$0xff]  }
 0x4ac   :  { %v1506_v52 = vpop.permute.xlu0 %1505 }
 0x4ad   :  { %1509 = vst.msk [vmem:[#allocation4] sm:$0x3] %vm1508_vm6, %v1506_v52  ;;  %v1635_v51 = vpop.permute.xlu1 %1634  ;;  %v6225_v52 = vld [vmem:[#allocation8 + $0x344] ss:$8 sps:$4 sm:$0xff]  }
 0x4ae   :  { %1637 = vst.msk [vmem:[#allocation4 + $0x2] sm:$0x3] %vm1508_vm6, %v1635_v51  ;;  %v2294_v51 = vsub.s32 3, %v6499_v3 }
 0x4b0   :  { %v1879_v50 = vpop.permute.xlu0 %1878 }
 0x4b1   :  { %1881 = vst.msk [vmem:[#allocation4 + $0x6] sm:$0x3] %vm1508_vm6, %v1879_v50  ;;  %v1757_v46 = vpop.permute.xlu1 %1756  ;;  %v6220_v50 = vld [vmem:[#allocation8 + $0x240] ss:$8 sps:$4 sm:$0xff]  }
 0x4b2   :  { %1759 = vst.msk [vmem:[#allocation4 + $0x4] sm:$0x3] %vm1508_vm6, %v1757_v46  ;;  %v6228_v46 = vld [vmem:[#allocation8 + $0x234] ss:$8 sps:$4 sm:$0xff]  }
 0x4b4   :  { %v1659_v30 = vpop.permute.xlu0 %1658 }
 0x4b5   :  { %v1532_v13 = vpop.permute.xlu1 %1531 }
 0x4b8   :  { %v1903_v38 = vpop.permute.xlu0 %1902 }
 0x4b9   :  { %v1781_v16 = vpop.permute.xlu1 %1780 }
 0x4bd   :  { %v1697_v54 = vpop.permute.xlu0 %1696  ;;  %v1572_v28 = vpop.permute.xlu1 %1571 }
 0x4c1   :  { %v1941_v60 = vpop.permute.xlu0 %1940  ;;  %v1819_v62 = vpop.permute.xlu1 %1818 }
 0x4c5   :  { %v1648_v39 = vpop.permute.xlu0 %1647  ;;  %v1520_v63 = vpop.permute.xlu1 %1519 }
 0x4c6   :  { %1650 = vst.msk [vmem:[#allocation4 + $0x2] sm:$0x3] %vm1522_vm7, %v1648_v39  ;;  %1523 = vst.msk [vmem:[#allocation4] sm:$0x3] %vm1522_vm7, %v1520_v63  ;;  %v6229_v39 = vld [vmem:[#allocation8 + $0x330] ss:$8 sps:$4 sm:$0xff]  }
 0x4c7   :  { %1661 = vst.msk [vmem:[#allocation4 + $0x2] sm:$0x3] %vm1534_vm8, %v1659_v30  ;;  %1535 = vst.msk [vmem:[#allocation4] sm:$0x3] %vm1534_vm8, %v1532_v13  ;;  %v6322_v30 = vld [vmem:[%s7659_s7] sm:$0xf] }
 0x4c8   :  { %v2291_v13 = vrot.slane %v6322_v30, %v2290_v57  ;;  %v6237_v63 = vld [vmem:[#allocation8 + $0x324] ss:$8 sps:$4 sm:$0xff]  }
 0x4c9   :  { %v1892_v1 = vpop.permute.xlu0 %1891  ;;  %v1770_v35 = vpop.permute.xlu1 %1769 }
 0x4ca   :  { %1894 = vst.msk [vmem:[#allocation4 + $0x6] sm:$0x3] %vm1522_vm7, %v1892_v1  ;;  %1772 = vst.msk [vmem:[#allocation4 + $0x4] sm:$0x3] %vm1522_vm7, %v1770_v35  ;;  %v7545_v10 = vpop.f32.mrf.mxu1  ;;  %v6232_v35 = vld [vmem:[#allocation8 + $0x220] ss:$8 sps:$4 sm:$0xff]  }
 0x4cb   :  { %1783 = vst.msk [vmem:[#allocation4 + $0x4] sm:$0x3] %vm1534_vm8, %v1781_v16  ;;  %1905 = vst.msk [vmem:[#allocation4 + $0x6] sm:$0x3] %vm1534_vm8, %v1903_v38  ;;  %v6223_v38 = vld [vmem:[#allocation8 + $0x340] ss:$8 sps:$4 sm:$0xff]  }
 0x4cc   :  { %v7547_v41 = vpop.f32.mrf.mxu1  ;;  %v6231_v16 = vld [vmem:[#allocation8 + $0x334] ss:$8 sps:$4 sm:$0xff]  }
 0x4cd   :  { %v1686_v21 = vpop.permute.xlu0 %1685  ;;  %v1560_v33 = vpop.permute.xlu1 %1559 }
 0x4ce   :  { %1688 = vst.msk [vmem:[#allocation4 + $0x2] sm:$0x3] %vm1562_vm9, %v1686_v21  ;;  %1563 = vst.msk [vmem:[#allocation4] sm:$0x3] %vm1562_vm9, %v1560_v33  ;;  %v3823_v40 = vpop.f32.mrf.mxu1  ;;  %v6240_v21 = vld [vmem:[#allocation8 + $0x214] ss:$8 sps:$4 sm:$0xff]  }
 0x4cf   :  { %1699 = vst.msk [vmem:[#allocation4 + $0x2] sm:$0x3] %vm1574_vm10, %v1697_v54  ;;  %1575 = vst.msk [vmem:[#allocation4] sm:$0x3] %vm1574_vm10, %v1572_v28  ;;  %v2295_v54 = vrot.slane %v6322_v30, %v2294_v51  ;;  %v6226_v28 = vld [vmem:[#allocation8 + $0x230] ss:$8 sps:$4 sm:$0xff]  }
 0x4d0   :  { %v3824_v44 = vpop.f32.mrf.mxu1  ;;  %v6235_v40 = vld [vmem:[#allocation8 + $0x320] ss:$8 sps:$4 sm:$0xff]  }
 0x4d1   :  { %v1930_v25 = vpop.permute.xlu0 %1929  ;;  %v1808_v17 = vpop.permute.xlu1 %1807  ;;  %v3781_v1 = vadd.f32 %v7338_v8, %v2295_v54  ;;  %v6243_v44 = vld [vmem:[#allocation8 + $0x314] ss:$8 sps:$4 sm:$0xff]   ;;  %v6241_v8 = vld [vmem:[#allocation8 + $0x310] ss:$8 sps:$4 sm:$0xff]   ;;  %v6271_v30 = vld [vmem:[#allocation8 + $0x3c0] ss:$8 sps:$4 sm:$0xff]  }
 0x4d2   :  { %1932 = vst.msk [vmem:[#allocation4 + $0x6] sm:$0x3] %vm1562_vm9, %v1930_v25  ;;  %1810 = vst.msk [vmem:[#allocation4 + $0x4] sm:$0x3] %vm1562_vm9, %v1808_v17  ;;  %v6246_v17 = vld [vmem:[#allocation8 + $0x204] ss:$8 sps:$4 sm:$0xff]  }
 0x4d3   :  { %1821 = vst.msk [vmem:[#allocation4 + $0x4] sm:$0x3] %vm1574_vm10, %v1819_v62  ;;  %1943 = vst.msk [vmem:[#allocation4 + $0x6] sm:$0x3] %vm1574_vm10, %v1941_v60  ;;  %v6234_v60 = vld [vmem:[#allocation8 + $0x224] ss:$8 sps:$4 sm:$0xff]   ;;  %v3779_v62 = vadd.f32 %v7310_v47, %v2291_v13  ;;  %v3822_v25 = vadd.f32 %v7547_v41, %v3781_v1 }
 0x4d4   :  { %v6238_v47 = vld [vmem:[#allocation8 + $0x210] ss:$8 sps:$4 sm:$0xff]   ;;  %v6282_v54 = vld [vmem:[#allocation8 + $0x2a4] ss:$8 sps:$4 sm:$0xff]  }
 0x4d5   :  { %v1721_v42 = vpop.permute.xlu0 %1720  ;;  %v1598_v2 = vpop.permute.xlu1 %1597  ;;  %v3820_v33 = vadd.f32 %v7545_v10, %v3779_v62  ;;  %v6288_v62 = vld [vmem:[#allocation8 + $0x294] ss:$8 sps:$4 sm:$0xff]   ;;  %v6286_v1 = vld [vmem:[#allocation8 + $0x290] ss:$8 sps:$4 sm:$0xff]  }
 0x4d9   :  { %v1710_v27 = vpop.permute.xlu0 %1709  ;;  %v1586_v18 = vpop.permute.xlu1 %1585 }
 0x4da   :  { %1712 = vst.msk [vmem:[#allocation4 + $0x2] sm:$0x3] %vm1588_vm11, %v1710_v27  ;;  %1589 = vst.msk [vmem:[#allocation4] sm:$0x3] %vm1588_vm11, %v1586_v18  ;;  %v6249_v27 = vld [vmem:[#allocation8 + $0x304] ss:$8 sps:$4 sm:$0xff]   ;;  %v3863_v18 = vadd.f32 %v7469_v4, %v3822_v25 }
 0x4db   :  { %1723 = vst.msk [vmem:[#allocation4 + $0x2] sm:$0x3] %vm1600_vm13, %v1721_v42  ;;  %1601 = vst.msk [vmem:[#allocation4] sm:$0x3] %vm1600_vm13, %v1598_v2  ;;  %v3861_v42 = vadd.f32 %v7455_v55, %v3820_v33  ;;  %v6297_v33 = vld [vmem:[#allocation8 + $0x384] ss:$8 sps:$4 sm:$0xff]  }
 0x4dd   :  { %v1954_v32 = vpop.permute.xlu0 %1953  ;;  %v1832_v43 = vpop.permute.xlu1 %1831 }
 0x4de   :  { %1956 = vst.msk [vmem:[#allocation4 + $0x6] sm:$0x3] %vm1588_vm11, %v1954_v32  ;;  %1834 = vst.msk [vmem:[#allocation4 + $0x4] sm:$0x3] %vm1588_vm11, %v1832_v43  ;;  %v6244_v32 = vld [vmem:[#allocation8 + $0x200] ss:$8 sps:$4 sm:$0xff]  }
 0x4e1   :  { %v1965_v48 = vpop.permute.xlu0 %1964  ;;  %v1843_v5 = vpop.permute.xlu1 %1842 }
 0x4e2   :  { %1967 = vst.msk [vmem:[#allocation4 + $0x6] sm:$0x3] %vm1600_vm13, %v1965_v48  ;;  %1845 = vst.msk [vmem:[#allocation4 + $0x4] sm:$0x3] %vm1600_vm13, %v1843_v5  ;;  %v6252_v48 = vld [vmem:[#allocation8 + $0x2f4] ss:$8 sps:$4 sm:$0xff]  }
 0x4e3   :  { %v6247_v5 = vld [vmem:[#allocation8 + $0x300] ss:$8 sps:$4 sm:$0xff]  }
 0x4e9   :  { %v3935_v49 = vld [vmem:[#allocation4] sm:$0xff] }
 0x4ea   :  { %v3946_v31 = vrot.slane %v3935_v49, %v6934_v29  ;;  %v3939_v15 = vcombine.high %v3935_v49, %v3935_v49 }
 0x4ec   :  { %v3954_v53 = vcombine.high %v3946_v31, %v3946_v31  ;;  %v3953_v7 = vrot.slane %v3939_v15, %v6934_v29  ;;  %v3981_v6 = vpack.c.bf16 %v3946_v31, %v3946_v31  ;;  %v6255_v31 = vld [vmem:[#allocation8 + $0x3f4] ss:$8 sps:$4 sm:$0xff]  }
 0x4ee   :  { %v3982_v11 = vpack.c.bf16 %v3954_v53, %v3954_v53  ;;  %v3955_v20 = vcombine.high %v3953_v7, %v3953_v7  ;;  %v3983_v22 = vpack.c.bf16 %v3953_v7, %v3953_v7  ;;  %v6250_v53 = vld [vmem:[#allocation8 + $0x2f0] ss:$8 sps:$4 sm:$0xff]  }
 0x4f0   :  { %4801 = vmatprep.mubr.bf16.mxu0 %v3982_v11  ;;  %v3984_v12 = vpack.c.bf16 %v3955_v20, %v3955_v20  ;;  %v6258_v11 = vld [vmem:[#allocation8 + $0x2e4] ss:$8 sps:$4 sm:$0xff]  }
 0x4f1   :  { %4802 = vmatmul.mubr.bf16.vlgmr.msra.gmra.mxu0 %v3981_v6  ;;  %v6261_v20 = vld [vmem:[#allocation8 + $0x3e4] ss:$8 sps:$4 sm:$0xff]   ;;  %v3924_v6 = vrot.slane %v7543_v56, %v6934_v29  ;;  %v6265_v56 = vld [vmem:[#allocation8 + $0x3d0] ss:$8 sps:$4 sm:$0xff]  }
 0x4f2   :  { %4852 = vmatpush1.bf16.msra.mxu0 %v6201_v19  ;;  %4842 = vmatprep.mubr.bf16.mxu1 %v3984_v12  ;;  %v6253_v19 = vld [vmem:[#allocation8 + $0x3f0] ss:$8 sps:$4 sm:$0xff]   ;;  %v6256_v12 = vld [vmem:[#allocation8 + $0x2e0] ss:$8 sps:$4 sm:$0xff]  }
 0x4f3   :  { %4843 = vmatmul.mubr.bf16.vlgmr.msra.gmra.mxu1 %v3983_v22  ;;  %4853 = vmatprep.subr.bf16.mxu0 %v6210_v45 }
 0x4f4   :  { %4893 = vmatpush1.bf16.msra.mxu1 %v6205_v9  ;;  %v6264_v9 = vld [vmem:[#allocation8 + $0x2d4] ss:$8 sps:$4 sm:$0xff]  }
 0x4f5   :  { %4894 = vmatprep.subr.bf16.mxu1 %v6213_v58  ;;  %v6259_v58 = vld [vmem:[#allocation8 + $0x3e0] ss:$8 sps:$4 sm:$0xff]  }
 0x4f6   :  { %4854 = vmatpush1.bf16.msra.mxu0 %v6208_v23  ;;  %v6267_v23 = vld [vmem:[#allocation8 + $0x3d4] ss:$8 sps:$4 sm:$0xff]  }
 0x4f7   :  { %4855 = vmatprep.subr.bf16.mxu0 %v6216_v24  ;;  %v6262_v24 = vld [vmem:[#allocation8 + $0x2d0] ss:$8 sps:$4 sm:$0xff]  }
 0x4f8   :  { %4895 = vmatpush1.bf16.msra.mxu1 %v6211_v26 }
 0x4f9   :  { %4896 = vmatprep.subr.bf16.mxu1 %v6219_v36 }
 0x4fa   :  { %4856 = vmatpush1.bf16.msra.mxu0 %v6214_v14  ;;  %v6270_v14 = vld [vmem:[#allocation8 + $0x2c4] ss:$8 sps:$4 sm:$0xff]  }
 0x4fb   :  { %4857 = vmatprep.subr.bf16.mxu0 %v6222_v34 }
 0x4fc   :  { %4897 = vmatpush1.bf16.msra.mxu1 %v6217_v0  ;;  %v6273_v0 = vld [vmem:[#allocation8 + $0x3c4] ss:$8 sps:$4 sm:$0xff]  }
 0x4fd   :  { %4898 = vmatprep.subr.bf16.mxu1 %v6225_v52  ;;  %v6268_v52 = vld [vmem:[#allocation8 + $0x2c0] ss:$8 sps:$4 sm:$0xff]  }
 0x4fe   :  { %4858 = vmatpush1.bf16.msra.mxu0 %v6220_v50 }
 0x4ff   :  { %4859 = vmatprep.subr.bf16.mxu0 %v6228_v46  ;;  %v6276_v46 = vld [vmem:[#allocation8 + $0x2b4] ss:$8 sps:$4 sm:$0xff]  }
 0x500   :  { %4899 = vmatpush1.bf16.msra.mxu1 %v6223_v38  ;;  %v6279_v38 = vld [vmem:[#allocation8 + $0x3b4] ss:$8 sps:$4 sm:$0xff]  }
 0x501   :  { %4900 = vmatprep.subr.bf16.mxu1 %v6231_v16  ;;  %v6274_v16 = vld [vmem:[#allocation8 + $0x2b0] ss:$8 sps:$4 sm:$0xff]  }
 0x502   :  { %4860 = vmatpush1.bf16.msra.mxu0 %v6226_v28  ;;  %v6285_v28 = vld [vmem:[#allocation8 + $0x3a4] ss:$8 sps:$4 sm:$0xff]  }
 0x503   :  { %4861 = vmatprep.subr.bf16.mxu0 %v6234_v60  ;;  %v6280_v60 = vld [vmem:[#allocation8 + $0x2a0] ss:$8 sps:$4 sm:$0xff]  }
 0x504   :  { %4901 = vmatpush1.bf16.msra.mxu1 %v6229_v39  ;;  %v6283_v39 = vld [vmem:[#allocation8 + $0x3a0] ss:$8 sps:$4 sm:$0xff]  }
 0x505   :  { %4902 = vmatprep.subr.bf16.mxu1 %v6237_v63  ;;  %v6291_v63 = vld [vmem:[#allocation8 + $0x394] ss:$8 sps:$4 sm:$0xff]  }
 0x506   :  { %4862 = vmatpush1.bf16.msra.mxu0 %v6232_v35  ;;  %v6294_v35 = vld [vmem:[#allocation8 + $0x284] ss:$8 sps:$4 sm:$0xff]  }
 0x507   :  { %4863 = vmatprep.subr.bf16.mxu0 %v6240_v21  ;;  %v6289_v21 = vld [vmem:[#allocation8 + $0x390] ss:$8 sps:$4 sm:$0xff]  }
 0x508   :  { %4903 = vmatpush1.bf16.msra.mxu1 %v6235_v40  ;;  %v6292_v40 = vld [vmem:[#allocation8 + $0x280] ss:$8 sps:$4 sm:$0xff]  }
 0x509   :  { %v3901_v2 = vpop.f32.mrf.mxu1  ;;  %4904 = vmatprep.subr.bf16.mxu1 %v6243_v44  ;;  %v6295_v44 = vld [vmem:[#allocation8 + $0x380] ss:$8 sps:$4 sm:$0xff]  }
 0x50a   :  { %v3902_v10 = vadd.f32 %v3901_v2, %v3861_v42  ;;  %4864 = vmatpush1.bf16.msra.mxu0 %v6238_v47  ;;  %v6299_v42 = vld [vmem:[%s7662_s10 + $0x38] sm:$0xff]   ;;  %v6301_v2 = vld [vmem:[%s7662_s10 + $0x30] sm:$0xff]  }
 0x50b   :  { %v3903_v43 = vpop.f32.mrf.mxu1  ;;  %4865 = vmatprep.subr.bf16.mxu0 %v6246_v17  ;;  %v6298_v17 = vld [vmem:[%s7662_s10 + $0x78] sm:$0xff]  }
 0x50c   :  { %v3904_v41 = vadd.f32 %v3903_v43, %v3863_v18  ;;  %4905 = vmatpush1.bf16.msra.mxu1 %v6241_v8  ;;  %v3910_v55 = vmax.f32 %v3902_v10, 0.0  ;;  %v6300_v8 = vld [vmem:[%s7662_s10 + $0x70] sm:$0xff]   ;;  %v6303_v18 = vld [vmem:[%s7662_s10 + $0x28] sm:$0xff]   ;;  %v6304_v10 = vld [vmem:[%s7662_s10 + $0x60] sm:$0xff]  }
 0x50d   :  { %4906 = vmatprep.subr.bf16.mxu1 %v6249_v27  ;;  %v3905_v49 = vpop.f32.mrf.mxu1  ;;  %v6302_v27 = vld [vmem:[%s7662_s10 + $0x68] sm:$0xff]   ;;  %v6306_v43 = vld [vmem:[%s7662_s10 + $0x58] sm:$0xff]  }
 0x50e   :  { %v3911_v15 = vmax.f32 %v3904_v41, 0.0  ;;  %4866 = vmatpush1.bf16.msra.mxu0 %v6244_v32  ;;  %v6305_v32 = vld [vmem:[%s7662_s10 + $0x20] sm:$0xff]   ;;  %v6308_v41 = vld [vmem:[%s7662_s10 + $0x50] sm:$0xff]   ;;  %v6310_v49 = vld [vmem:[%s7662_s10 + $0x48] sm:$0xff]  }
 0x50f   :  { %4867 = vmatprep.subr.bf16.mxu0 %v6252_v48  ;;  %v3906_v7 = vpop.f32.mrf.mxu1  ;;  %v6307_v48 = vld [vmem:[%s7662_s10 + $0x18] sm:$0xff]  }
 0x510   :  { %v3917_v4 = vcombine.low %v3910_v55, %v3911_v15  ;;  %4907 = vmatpush1.bf16.msra.mxu1 %v6247_v5  ;;  %v6309_v5 = vld [vmem:[%s7662_s10 + $0x10] sm:$0xff]   ;;  %v6312_v55 = vld [vmem:[%s7662_s10 + $0x40] sm:$0xff]  }
 0x511   :  { %4908 = vmatprep.subr.bf16.mxu1 %v6255_v31  ;;  %v6311_v31 = vld [vmem:[%s7662_s10 + $0x8] sm:$0xff]   ;;  %v6313_v15 = vld [vmem:[%s7662_s10] sm:$0xff]  }
 0x512   :  { %v3931_v45 = vrot.slane %v3917_v4, %v6934_v29  ;;  %4868 = vmatpush2.bf16.msra.mxu0 %v6250_v53  ;;  %v6314_v53 = vld [vmem:[%s7664_s12 + $0x18] sm:$0xff]  }
 0x513   :  { %4869 = vmatprep.subr.bf16.mxu0 %v6258_v11 }
 0x514   :  { %v3932_v22 = vcombine.low %v3924_v6, %v3931_v45  ;;  %4909 = vmatpush2.bf16.msra.mxu1 %v6253_v19  ;;  %v6323_v36 = vcombine.low %v3931_v45, %v3931_v45 }
 0x515   :  { %4910 = vmatprep.subr.bf16.mxu1 %v6261_v20 }
 0x516   :  { %4870 = vmatpush2.bf16.msra.mxu0 %v6256_v12  ;;  %v3963_v26 = vrot.slane %v3932_v22, %v6934_v29  ;;  %v3970_v57 = vrot.slane %v6323_v36, %v6934_v29  ;;  %v6277_v29 = vld [vmem:[#allocation8 + $0x3b0] ss:$8 sps:$4 sm:$0xff]  }
 0x517   :  { %4871 = vmatprep.subr.bf16.mxu0 %v6264_v9  ;;  %v4117_v9 = vld [vmem:[%s7661_s9] sm:$0x3] }
 0x518   :  { %4911 = vmatpush2.bf16.msra.mxu1 %v6259_v58  ;;  %v3971_v34 = vcombine.high %v3963_v26, %v3963_v26  ;;  %v3972_v50 = vcombine.high %v3970_v57, %v3970_v57  ;;  %v3985_v25 = vpack.c.bf16 %v3963_v26, %v3963_v26  ;;  %v3987_v47 = vpack.c.bf16 %v3970_v57, %v3970_v57 }
 0x519   :  { %4912 = vmatprep.subr.bf16.mxu1 %v6267_v23  ;;  %v4122_v22 = vrot.slane %v4117_v9, %v7058_v61  ;;  %v4126_v58 = vrot.slane %v4117_v9, %v2286_v59 }
 0x51a   :  { %4872 = vmatpush2.bf16.msra.mxu0 %v6262_v24  ;;  %v3986_v51 = vpack.c.bf16 %v3971_v34, %v3971_v34  ;;  %v3988_v13 = vpack.c.bf16 %v3972_v50, %v3972_v50 }
 0x51b   :  { %4873 = vmatprep.subr.bf16.mxu0 %v6270_v14 }
 0x51c   :  { %4913 = vmatpush2.bf16.msra.mxu1 %v6265_v56  ;;  %4883 = vmatprep.mubr.bf16.mxu0 %v3986_v51 }
 0x51d   :  { %4914 = vmatprep.subr.bf16.mxu1 %v6273_v0  ;;  %4924 = vmatprep.mubr.bf16.mxu1 %v3988_v13 }
 0x51e   :  { %4874 = vmatpush2.bf16.msra.mxu0 %v6268_v52 }
 0x51f   :  { %4875 = vmatprep.subr.bf16.mxu0 %v6276_v46 }
 0x520   :  { %4915 = vmatpush2.bf16.msra.mxu1 %v6271_v30 }
 0x521   :  { %4916 = vmatprep.subr.bf16.mxu1 %v6279_v38 }
 0x522   :  { %4876 = vmatpush2.bf16.msra.mxu0 %v6274_v16 }
 0x523   :  { %4877 = vmatprep.subr.bf16.mxu0 %v6282_v54  ;;  %v6315_v54 = vld [vmem:[%s7664_s12 + $0x10] sm:$0xff]  }
 0x524   :  { %4917 = vmatpush2.bf16.msra.mxu1 %v6277_v29  ;;  %v6316_v29 = vld [vmem:[%s7664_s12 + $0x8] sm:$0xff]  }
 0x525   :  { %4918 = vmatprep.subr.bf16.mxu1 %v6285_v28  ;;  %v6317_v28 = vld [vmem:[%s7664_s12] sm:$0xff]   ;;  %s6415_s12 = smov [#allocation10]  }
 0x526   :  { %4878 = vmatpush2.bf16.msra.mxu0 %v6280_v60  ;;  %s5205_s19 = sshll.u32 %s6415_s12, 4  ;;  %s5206_s19 = int_to_ptr.vmem [resolvable:$true] %s5205_s19 }
 0x527   :  { %4879 = vmatprep.subr.bf16.mxu0 %v6288_v62  ;;  %v5613_v62 = vld [vmem:[%s7663_s11] ss:$0 sm:$0xff]  ;;  %s6364_s11 = scalar_lea.vmem %s5206_s19, 32  ;;  %p6369_p11 = scmp.lt.s32.totalorder %s5206_s19, %s5206_s19 }
 0x528   :  { %4919 = vmatpush2.bf16.msra.mxu1 %v6283_v39  ;;  %p6365_p10 = scmp.ne.s32.totalorder %s5206_s19, %s6364_s11  ;;  %p6370_p12 = scmp.lt.s32.totalorder %s6364_s11, %s6364_s11 }
 0x529   :  { %4920 = vmatprep.subr.bf16.mxu1 %v6291_v63 }
 0x52a   :  { %4880 = vmatpush2.bf16.msra.mxu0 %v6286_v1  ;;  %p6371_p13 = por %p6370_p12, %p6369_p11 }
 0x52b   :  { %4881 = vmatprep.subr.bf16.mxu0 %v6294_v35 }
 0x52c   :  { %4921 = vmatpush2.bf16.msra.mxu1 %v6289_v21  ;;  %p6372_p0 = pnand %p6371_p13, %p6365_p10 }
 0x52d   :  { %4922 = vmatprep.subr.bf16.mxu1 %v6297_v33 }
 0x52e   :  { %4882 = vmatpush2.bf16.msra.mxu0 %v6292_v40 }
 0x52f   :  { %5641 = vmatprep.subr.bf16.mxu0 %v6298_v17 }
 0x530   :  { %4923 = vmatpush2.bf16.msra.mxu1 %v6295_v44  ;;  %v5630_v44 = vld [vmem:[%s7665_s13] ss:$0 sm:$0xff] }
 0x531   :  { %4884 = vmatmul.mubr.bf16.vlgmr.msra.gmra.mxu0 %v3985_v25  ;;  %5680 = vmatprep.subr.bf16.mxu1 %v6405_v37 }
 0x532   :  { %5642 = vmatpush3.bf16.msra.mxu0 %v6299_v42 }
 0x533   :  { %4925 = vmatmul.mubr.bf16.vlgmr.msra.gmra.mxu1 %v3987_v47  ;;  %5643 = vmatprep.subr.bf16.mxu0 %v6300_v8 }
 0x534   :  { %5688 = vmatprep.mubr.msk.bf16.mxu1 %vm6407_vm12, %v6405_v37  ;;  %5681 = vmatpush3.bf16.msra.mxu1 %v6314_v53  ;;  %vm5153_vm12 = vcmask 523264  }
 0x535   :  { %5682 = vmatprep.subr.bf16.mxu1 %v6405_v37 }
 0x536   :  { %5644 = vmatpush3.bf16.msra.mxu0 %v6301_v2 }
 0x537   :  { %5645 = vmatprep.subr.bf16.mxu0 %v6302_v27 }
 0x538   :  { %5683 = vmatpush3.bf16.msra.mxu1 %v6315_v54 }
 0x539   :  { %5684 = vmatprep.subr.bf16.mxu1 %v6405_v37 }
 0x53a   :  { %5646 = vmatpush3.bf16.msra.mxu0 %v6303_v18 }
 0x53b   :  { %5647 = vmatprep.subr.bf16.mxu0 %v6304_v10 }
 0x53c   :  { %5685 = vmatpush3.bf16.msra.mxu1 %v6316_v29 }
 0x53d   :  { %5686 = vmatprep.subr.bf16.mxu1 %v6405_v37 }
 0x53e   :  { %5648 = vmatpush3.bf16.msra.mxu0 %v6305_v32 }
 0x53f   :  { %5649 = vmatprep.subr.bf16.mxu0 %v6306_v43 }
 0x540   :  { %5687 = vmatpush3.bf16.msra.mxu1 %v6317_v28 }
 0x542   :  { %5650 = vmatpush3.bf16.msra.mxu0 %v6307_v48 }
 0x543   :  { %5651 = vmatprep.subr.bf16.mxu0 %v6308_v41 }
 0x546   :  { %5652 = vmatpush3.bf16.msra.mxu0 %v6309_v5 }
 0x547   :  { %5653 = vmatprep.subr.bf16.mxu0 %v6310_v49 }
 0x54a   :  { %5654 = vmatpush3.bf16.msra.mxu0 %v6311_v31 }
 0x54b   :  { %5655 = vmatprep.subr.bf16.mxu0 %v6312_v55 }
 0x54e   :  { %5656 = vmatpush3.bf16.msra.mxu0 %v6313_v15 }
 0x5b1   :  { %v4803_v7 = vpop.f32.mrf.mxu0 }
 0x5b2   :  { %v4804_v23 = vadd.f32 %v4803_v7, %v4122_v22 }
 0x5b3   :  { %v4805_v11 = vpop.f32.mrf.mxu0  ;;  %v4844_v4 = vpop.f32.mrf.mxu1 }
 0x5b4   :  { %v4806_v24 = vadd.f32 %v4805_v11, %v4126_v58  ;;  %v4845_v26 = vadd.f32 %v4844_v4, %v4804_v23 }
 0x5b5   :  { %v4807_v19 = vpop.f32.mrf.mxu0  ;;  %v4846_v20 = vpop.f32.mrf.mxu1 }
 0x5b6   :  { %v4847_v14 = vadd.f32 %v4846_v20, %v4806_v24 }
 0x5b7   :  { %v4808_v6 = vpop.f32.mrf.mxu0  ;;  %v4848_v45 = vpop.f32.mrf.mxu1 }
 0x5b9   :  { %v4849_v12 = vpop.f32.mrf.mxu1 }
 0x5f1   :  { %v4885_v36 = vpop.f32.mrf.mxu0 }
 0x5f2   :  { %v4886_v56 = vadd.f32 %v4885_v36, %v4845_v26 }
 0x5f3   :  { %v4887_v34 = vpop.f32.mrf.mxu0  ;;  %v4926_v57 = vpop.f32.mrf.mxu1 }
 0x5f4   :  { %v4888_v0 = vadd.f32 %v4887_v34, %v4847_v14  ;;  %v4927_v52 = vadd.f32 %v4926_v57, %v4886_v56 }
 0x5f5   :  { %v4889_v51 = vpop.f32.mrf.mxu0  ;;  %v4928_v50 = vpop.f32.mrf.mxu1 }
 0x5f6   :  { %v4929_v46 = vadd.f32 %v4928_v50, %v4888_v0  ;;  %v4933_v30 = vmax.f32 %v4927_v52, 0.0 }
 0x5f7   :  { %v4890_v13 = vpop.f32.mrf.mxu0  ;;  %v4930_v38 = vpop.f32.mrf.mxu1 }
 0x5f8   :  { %v4934_v61 = vmax.f32 %v4929_v46, 0.0  ;;  %v4935_v59 = vpack.c.bf16 %v4933_v30, %v4933_v30 }
 0x5f9   :  { %v4931_v16 = vpop.f32.mrf.mxu1 }
 0x5fa   :  { %v4936_v3 = vpack.c.bf16 %v4934_v61, %v4934_v61 }
 0x5fc   :  { %5104 = vmatprep.mubr.bf16.mxu0 %v4936_v3 }
 0x5fd   :  { %5105 = vmatmul.mubr.bf16.vlgmr.msra.gmra.mxu0 %v4935_v59 }
 0x6bd   :  { %v5657_v60 = vpop.f32.mrf.mxu0 }
 0x6bf   :  { %v5658_v39 = vpop.f32.mrf.mxu0 }
 0x6c0   :  { %v5659_v63 = vadd.f32 %v5658_v39, %v5657_v60 }
 0x6c1   :  { %v5660_v1 = vpop.f32.mrf.mxu0 }
 0x6c2   :  { %v5107_v35 = vadd.f32 %v5659_v63, %v5613_v62 }
 0x6c3   :  { %v5661_v21 = vpop.f32.mrf.mxu0 }
 0x6c4   :  { %v5112_v33 = vmax.f32 %v5107_v35, 0.0 }
 0x6c6   :  { %v5113_v40 = vpack.c.bf16 %v5112_v33, %v5112_v33 }
 0x6c8   :  { %5689 = vmatmul.mubr.msk.bf16.vlgmr.msra.gmra.mxu1 %vm5153_vm12, %v5113_v40 }
 0x788   :  { %v5191_v37 = vpop.f32.mrf.mxu1 }
 0x789   :  { %v5192_v25 = vadd.f32 %v5630_v44, %v5191_v37 }
 0x78a   :  { %v5690_v47 = vpop.f32.mrf.mxu1 }
 0x78b   :  { %v5197_v17 = vmax.f32 %v5192_v25, 0.0 }
 0x78c   :  { %v5194_v42 = vpop.f32.mrf.mxu1 }
 0x78d   :  { %5198 = vst [vmem:[#allocation10] sm:$0x3] %v5197_v17 }
 0x78e   :  { %v5691_v8 = vpop.f32.mrf.mxu1 }
 0x78f   :  { %6375 = shalt.err (!%p6372_p0)
}
 0x790   :  { %5208 = dma.vmem_to_hbm [thread:$0]  %s5206_s19, 32, %s7666_s14, [#allocation7]  }
 0x791   :  { %6388 = dma.done.wait [#allocation7], 32  }
 0x792   :  { %6389 = vsyncadd [#allocation7], 4294967264 }
 0x793   :  { %5212 = vsyncpa [#allocation6], 1 }
 0x794   :  { %5213 = vsyncpa [#allocation9], 1 }
 0x795   :  { %5214 = vsyncpa [#allocation7], 1 }

</bundles_post_ra>
